<compile_context>
chip_gen: v7x
topology: tpu7x:2x2x1
jax: 0.10.0
libtpu: 0.0.40
codegen_flags: <defaults>
</compile_context>

<pallas_src>
import functools

import jax
import jax.numpy as jnp
from jax import lax
from jax.experimental import pallas as pl
from jax.experimental.pallas import tpu as pltpu


# ----------------------------------------------------------------------------
# Fused kernel helpers.
# ----------------------------------------------------------------------------
def _edge_conv_block(x, slab_ref, meta, k, s_ref):
    """One DynamicEdgeConv(MLP) layer on a block of Bg graphs.  x: [Bg, P, c_in] f32."""
    c_in, h, offs = meta
    Bg, P, _ = x.shape
    M = Bg * k * P

    slab = slab_ref[...]

    def seg(name):
        off, rows = offs[name]           # 8-row-aligned start offsets -> free views
        return slab[off:off + rows, :]

    w1a, w1b, b1 = seg("w1a"), seg("w1b"), seg("b1")
    w2, b2 = seg("w2"), seg("b2")
    w3, b3 = seg("w3"), seg("b3")
    w4, b4 = seg("w4"), seg("b4")

    # ---------------- kNN graph (f32; kept exact so tie-breaks are stable) ---------
    xx = x * x
    gram = jnp.einsum("bic,bjc->bij", x, x,
                      preferred_element_type=jnp.float32)               # [Bg,P,P]
    sq_i = jnp.sum(xx, axis=-1, keepdims=True)                          # [Bg,P,1]
    ones_row = jnp.ones((Bg, 1, c_in), jnp.float32)
    sq_j = jnp.einsum("bqc,bjc->bqj", ones_row, xx,
                      preferred_element_type=jnp.float32)               # [Bg,1,P]
    d = sq_i + sq_j - 2.0 * gram                                        # [Bg,P,P]

    row2 = lax.broadcasted_iota(jnp.int32, (P, P), 0)
    col2 = lax.broadcasted_iota(jnp.int32, (P, P), 1)
    diag = row2 == col2
    # Self-loop is always the closest neighbour; the +1 shift keeps every
    # off-diagonal entry > 0 (monotone under the int32 bitcast) without changing
    # the relative order of off-diagonal distances.
    d = jnp.where(diag, 0.0, jnp.maximum(d, 0.0) + 1.0)

    # Pack (distance, column index) into a single monotone int32 key so each of the
    # k picks needs only ONE cross-lane min; equality against the row min gives the
    # one-hot directly (lowest-column tie-break is encoded in the low bits).
    nbits = max((P - 1).bit_length(), 1)
    key = (pltpu.bitcast(d, jnp.int32) & jnp.int32(~((1 << nbits) - 1))) | col2

    eye_f = diag.astype(jnp.float32)
    int_max = jnp.int32(2 ** 31 - 1)
    # S = onehot(neighbour) - I, written pick-by-pick into a persistent VMEM scratch.
    for n in range(k):                                   # k is small -> static unroll
        rowmin = jnp.min(key, axis=-1, keepdims=True)    # [Bg,P,1]  (one XLU reduce)
        sel = key == rowmin                              # exactly one hit per row
        s_ref[:, n * P:(n + 1) * P, :] = sel.astype(jnp.float32) - eye_f
        key = jnp.where(sel, int_max, key)               # mask the picked neighbour

    # ---------------- gather + edge MLP (single big-M 2-D matmuls) ----------------
    S = s_ref[...]                                                      # [Bg,k*P,P]
    dxy = jnp.einsum("bmp,bpc->bmc", S, x,
                     preferred_element_type=jnp.float32)                # x_j - x_i
    dxy = dxy.reshape(M, c_in)

    # Loop-invariant x_i branch of the first Linear, computed once per node.
    hi = (jnp.dot(x.reshape(Bg * P, c_in), w1a,
                  preferred_element_type=jnp.float32) + b1).reshape(Bg, P, h)

    hm = jnp.dot(dxy, w1b, preferred_element_type=jnp.float32)          # [M,h]
    hm = jnp.maximum(hm.reshape(Bg, k, P, h) + hi[:, None, :, :], 0.0).reshape(M, h)
    hm = jnp.maximum(jnp.dot(hm, w2, preferred_element_type=jnp.float32) + b2, 0.0)
    hm = jnp.maximum(jnp.dot(hm, w3, preferred_element_type=jnp.float32) + b3, 0.0)

    # aggr='mean' over k BEFORE the final Linear (mean commutes with it), so the w4
    # matmul runs with k-times fewer rows.
    hm = hm.reshape(Bg, k, P, h)
    agg = hm[:, 0]
    for n in range(1, k):
        agg = agg + hm[:, n]
    agg = (agg * (1.0 / k)).reshape(Bg * P, h)
    out = jnp.dot(agg, w4, preferred_element_type=jnp.float32) + b4     # [Bg*P,h]
    return out.reshape(Bg, P, h)


def fused_gnn_kernel(*refs, k, layer_meta, head_meta):
    n_layers = len(layer_meta)
    x_ref = refs[0]
    slab_refs = refs[1:1 + n_layers]
    head_ref = refs[1 + n_layers]
    out_ref = refs[2 + n_layers]
    s_ref = refs[3 + n_layers]                        # VMEM scratch [Bg, k*P, P]

    x = x_ref[...]                                    # [Bg, P, C]
    for meta, slab_ref in zip(layer_meta, slab_refs):
        x = _edge_conv_block(x, slab_ref, meta, k, s_ref)

    Bg, P, h_last = x.shape
    # global_mean_pool over each graph's nodes as a batched MXU matmul.
    pooled = jnp.einsum("bqp,bph->bqh",
                        jnp.full((Bg, 1, P), 1.0 / P, jnp.float32), x,
                        preferred_element_type=jnp.float32).reshape(Bg, h_last)

    wf_rows, bf_off = head_meta
    head = head_ref[...]
    wf = head[0:wf_rows, :]
    bf = head[bf_off:bf_off + 1, :]
    out_ref[0] = jnp.dot(pooled, wf, preferred_element_type=jnp.float32) + bf


# ----------------------------------------------------------------------------
# Host-side parameter packing (8-row-aligned slab segments) + wrapper.
# ----------------------------------------------------------------------------
def _pad8(a):
    pad = (-a.shape[0]) % 8
    if pad:
        a = jnp.concatenate([a, jnp.zeros((pad, a.shape[1]), a.dtype)], axis=0)
    return a


def pack_gnn_params(layer_params, head_params):
    slabs, layer_meta = [], []
    for (w1, b1, w2, b2, w3, b3, w4, b4) in layer_params:
        c_in = w1.shape[0] // 2
        h = w4.shape[1]
        named = [("w1a", w1[:c_in]), ("w1b", w1[c_in:]), ("b1", b1),
                 ("w2", w2), ("b2", b2), ("w3", w3), ("b3", b3),
                 ("w4", w4), ("b4", b4)]
        offs, parts, off = {}, [], 0
        for name, p in named:
            offs[name] = (off, p.shape[0])
            p = _pad8(p)                 # sublane-aligned segment
            parts.append(p)
            off += p.shape[0]
        slabs.append(jnp.concatenate(parts, axis=0))
        layer_meta.append((c_in, h, offs))
    wf, bf = head_params
    wf_p = _pad8(wf)
    head_slab = jnp.concatenate([wf_p, _pad8(bf)], axis=0)
    head_meta = (wf.shape[0], wf_p.shape[0])          # (rows of wf, offset of bf)
    return slabs, head_slab, tuple(layer_meta), head_meta, wf.shape[1]


def gnn_encoder_forward(x, slabs, head_slab, layer_meta, head_meta, out_dim, k,
                        graphs_per_step=None):
    B, P, C = x.shape
    Bg = graphs_per_step or B
    assert B % Bg == 0 and k <= P
    G = B // Bg

    in_specs = [pl.BlockSpec((Bg, P, C), lambda g: (g, 0, 0))]
    for s in list(slabs) + [head_slab]:
        in_specs.append(pl.BlockSpec(s.shape, lambda g: (0, 0)))   # resident weights

    out = pl.pallas_call(
        functools.partial(fused_gnn_kernel, k=k, layer_meta=layer_meta,
                          head_meta=head_meta),
        out_shape=jax.ShapeDtypeStruct((G, Bg, out_dim), jnp.float32),
        grid=(G,),
        in_specs=in_specs,
        out_specs=pl.BlockSpec((1, Bg, out_dim), lambda g: (g, 0, 0)),
        scratch_shapes=[pltpu.VMEM((Bg, k * P, P), jnp.float32)],
        compiler_params=pltpu.CompilerParams(
            dimension_semantics=("parallel",)),        # megacore sharding on v7x
    )(x, *slabs, head_slab)
    return out.reshape(B, out_dim)


# ----------------------------------------------------------------------------
# Parameter construction (deterministic); BatchNorm1d (inference, running
# mean=0 / var=1) folded into the preceding Linear.
# ----------------------------------------------------------------------------
def init_edge_mlp_params(key, in_dim, hidden_dim, out_dim, eps=1e-5):
    dims = [(in_dim, hidden_dim), (hidden_dim, hidden_dim),
            (hidden_dim, hidden_dim), (hidden_dim, out_dim)]
    params = []
    for din, dout in dims:
        key, k1, k2, k3, k4 = jax.random.split(key, 5)
        w = jax.random.normal(k1, (din, dout), jnp.float32) / jnp.sqrt(float(din))
        b = 0.1 * jax.random.normal(k2, (dout,), jnp.float32)
        gamma = 1.0 + 0.1 * jax.random.normal(k3, (dout,), jnp.float32)
        beta = 0.1 * jax.random.normal(k4, (dout,), jnp.float32)
        scale = gamma / jnp.sqrt(1.0 + eps)        # running_var = 1, running_mean = 0
        w = w * scale[None, :]
        b = b * scale + beta
        params += [w, b.reshape(1, dout)]
    return key, tuple(params)


def init_gnn_encoder_params(key, layers, input_dim, output_dim):
    layer_params = []
    cur = input_dim
    for hidden in layers:
        key, p = init_edge_mlp_params(key, 2 * cur, hidden, hidden)
        layer_params.append(p)
        cur = hidden
    key, k1, k2 = jax.random.split(key, 3)
    wf = jax.random.normal(k1, (cur, output_dim), jnp.float32) / jnp.sqrt(float(cur))
    bf = 0.1 * jax.random.normal(k2, (1, output_dim), jnp.float32)
    return layer_params, (wf, bf)


# ----------------------------------------------------------------------------
# Pure-JAX reference (same folded parameters) for numerical sanity check.
# ----------------------------------------------------------------------------
def reference_forward(x, layer_params, head_params, k):
    B, P, _ = x.shape
    for (w1, b1, w2, b2, w3, b3, w4, b4) in layer_params:
        sq = jnp.sum(x * x, axis=-1)
        d = sq[:, :, None] + sq[:, None, :] - 2.0 * jnp.einsum('bic,bjc->bij', x, x)
        eye = jnp.arange(P)
        d = d.at[:, eye, eye].set(-1.0)
        idx = jnp.argsort(d, axis=-1)[:, :, :k]                       # [B, P, k]
        xb = jnp.broadcast_to(x[:, None, :, :], (B, P, P, x.shape[-1]))
        xj = jnp.take_along_axis(xb, idx[..., None], axis=2)          # [B, P, k, C]
        xi = jnp.broadcast_to(x[:, :, None, :], xj.shape)
        e = jnp.concatenate([xi, xj - xi], axis=-1)                   # [B, P, k, 2C]
        h = jnp.maximum(e @ w1 + b1[0], 0.0)
        h = jnp.maximum(h @ w2 + b2[0], 0.0)
        h = jnp.maximum(h @ w3 + b3[0], 0.0)
        h = h @ w4 + b4[0]
        x = jnp.mean(h, axis=2)                                       # [B, P, H]
    pooled = jnp.mean(x, axis=1)
    wf, bf = head_params
    return pooled @ wf + bf


if __name__ == "__main__":
    # Module hyperparameters (small, consistent with GNNEncoder(layers, k, in, out)).
    layers = (16, 32)      # hidden dims of the DynamicEdgeConv layers
    k = 4                  # kNN neighbours (self-loop included)
    input_dim = 4
    output_dim = 8
    B, P = 8, 16           # 8 graphs, 16 nodes each (data.batch = [0]*16 + ... + [7]*16)
    Bg = 4                 # graphs per grid step -> M = Bg*k*P = 256 MXU rows, grid of 2

    key = jax.random.PRNGKey(0)
    key, kx = jax.random.split(key)
    x = jax.random.normal(kx, (B, P, input_dim), jnp.float32)

    layer_params, head_params = init_gnn_encoder_params(key, layers, input_dim, output_dim)
    slabs, head_slab, layer_meta, head_meta, out_dim = pack_gnn_params(layer_params,
                                                                       head_params)

    out = gnn_encoder_forward(x, slabs, head_slab, layer_meta, head_meta, out_dim, k,
                              graphs_per_step=Bg)
    out = jax.block_until_ready(out)

    ref = reference_forward(x, layer_params, head_params, k)
    assert out.shape == (B, output_dim)
    assert jnp.allclose(out, ref, rtol=1e-2, atol=1e-2), (out, ref)

    print("KERNEL_OK")
</pallas_src>

<mosaic_0001>
module attributes {stable_mosaic.version = 11 : i64} {
  func.func @fused_gnn_kernel(%arg0: i32, %arg1: memref<4x16x4xf32, #tpu.memory_space<vmem>>, %arg2: memref<96x16xf32, #tpu.memory_space<vmem>>, %arg3: memref<160x32xf32, #tpu.memory_space<vmem>>, %arg4: memref<40x8xf32, #tpu.memory_space<vmem>>, %arg5: memref<1x4x8xf32, #tpu.memory_space<vmem>>, %arg6: memref<4x64x16xf32, #tpu.memory_space<vmem>>) attributes {dimension_semantics = [#tpu.dimension_semantics<parallel>], iteration_bounds = array<i64: 2>, scalar_prefetch = 0 : i64, scratch_operands = 1 : i64, tpu.core_type = #tpu.core_type<tc>, window_params = [{transform_indices = @transform_0, window_bounds = array<i64: 4, 16, 4>}, {pipeline_mode = #tpu.pipeline_mode<synchronous>, transform_indices = @transform_1, window_bounds = array<i64: 96, 16>}, {pipeline_mode = #tpu.pipeline_mode<synchronous>, transform_indices = @transform_2, window_bounds = array<i64: 160, 32>}, {pipeline_mode = #tpu.pipeline_mode<synchronous>, transform_indices = @transform_3, window_bounds = array<i64: 40, 8>}, {transform_indices = @transform_4, window_bounds = array<i64: 1, 4, 8>}]} {
    %c0 = arith.constant 0 : index
    %c0_0 = arith.constant 0 : index
    %c0_1 = arith.constant 0 : index
    %0 = vector.load %arg1[%c0, %c0_0, %c0_1] : memref<4x16x4xf32, #tpu.memory_space<vmem>>, vector<4x16x4xf32>
    %c0_2 = arith.constant 0 : index
    %c0_3 = arith.constant 0 : index
    %1 = vector.load %arg2[%c0_2, %c0_3] : memref<96x16xf32, #tpu.memory_space<vmem>>, vector<96x16xf32>
    %2 = vector.extract_strided_slice %1 {offsets = [0, 0], sizes = [4, 16], strides = [1, 1]} : vector<96x16xf32> to vector<4x16xf32>
    %3 = vector.extract_strided_slice %1 {offsets = [8, 0], sizes = [4, 16], strides = [1, 1]} : vector<96x16xf32> to vector<4x16xf32>
    %4 = vector.extract_strided_slice %1 {offsets = [16, 0], sizes = [1, 16], strides = [1, 1]} : vector<96x16xf32> to vector<1x16xf32>
    %5 = vector.extract_strided_slice %1 {offsets = [24, 0], sizes = [16, 16], strides = [1, 1]} : vector<96x16xf32> to vector<16x16xf32>
    %6 = vector.extract_strided_slice %1 {offsets = [40, 0], sizes = [1, 16], strides = [1, 1]} : vector<96x16xf32> to vector<1x16xf32>
    %7 = vector.extract_strided_slice %1 {offsets = [48, 0], sizes = [16, 16], strides = [1, 1]} : vector<96x16xf32> to vector<16x16xf32>
    %8 = vector.extract_strided_slice %1 {offsets = [64, 0], sizes = [1, 16], strides = [1, 1]} : vector<96x16xf32> to vector<1x16xf32>
    %9 = vector.extract_strided_slice %1 {offsets = [72, 0], sizes = [16, 16], strides = [1, 1]} : vector<96x16xf32> to vector<16x16xf32>
    %10 = vector.extract_strided_slice %1 {offsets = [88, 0], sizes = [1, 16], strides = [1, 1]} : vector<96x16xf32> to vector<1x16xf32>
    %11 = arith.mulf %0, %0 : vector<4x16x4xf32>
    "tpu.trace_start"() <{level = 10 : i32, message = "bic,bjc->bij"}> : () -> ()
    %cst = arith.constant dense<0.000000e+00> : vector<4x16x16xf32>
    %12 = tpu.matmul %0, %0, %cst {dimension_numbers = #tpu.dot_dimension_numbers<[2], [2], [1], [1], [0, 0, 0, 1, 1, 1], [0], [0]>} : vector<4x16x4xf32>, vector<4x16x4xf32>, vector<4x16x16xf32> -> vector<4x16x16xf32>
    "tpu.trace_stop"() : () -> ()
    %cst_4 = arith.constant dense<0.000000e+00> : vector<4x16xf32>
    %13 = vector.multi_reduction <add>, %11, %cst_4 [2] : vector<4x16x4xf32> to vector<4x16xf32>
    %14 = vector.shape_cast %13 : vector<4x16xf32> to vector<4x16x1xf32>
    %cst_5 = arith.constant 1.000000e+00 : f32
    %15 = vector.broadcast %cst_5 : f32 to vector<4x1x4xf32>
    "tpu.trace_start"() <{level = 10 : i32, message = "bqc,bjc->bqj"}> : () -> ()
    %cst_6 = arith.constant dense<0.000000e+00> : vector<4x1x16xf32>
    %16 = tpu.matmul %15, %11, %cst_6 {dimension_numbers = #tpu.dot_dimension_numbers<[2], [2], [1], [1], [0, 0, 0, 1, 1, 1], [0], [0]>} : vector<4x1x4xf32>, vector<4x16x4xf32>, vector<4x1x16xf32> -> vector<4x1x16xf32>
    "tpu.trace_stop"() : () -> ()
    %17 = vector.broadcast %14 : vector<4x16x1xf32> to vector<4x16x16xf32>
    %18 = vector.broadcast %16 : vector<4x1x16xf32> to vector<4x16x16xf32>
    %19 = arith.addf %17, %18 : vector<4x16x16xf32>
    %cst_7 = arith.constant 2.000000e+00 : f32
    %20 = vector.broadcast %cst_7 : f32 to vector<4x16x16xf32>
    %21 = arith.mulf %20, %12 : vector<4x16x16xf32>
    %22 = arith.subf %19, %21 : vector<4x16x16xf32>
    %23 = tpu.iota {dimensions = array<i32: 0>} : vector<16x16xi32>
    %24 = tpu.iota {dimensions = array<i32: 1>} : vector<16x16xi32>
    %25 = arith.cmpi eq, %23, %24 : vector<16x16xi32>
    %cst_8 = arith.constant 0.000000e+00 : f32
    %26 = vector.broadcast %cst_8 : f32 to vector<4x16x16xf32>
    %27 = arith.maximumf %22, %26 : vector<4x16x16xf32>
    %cst_9 = arith.constant 1.000000e+00 : f32
    %28 = vector.broadcast %cst_9 : f32 to vector<4x16x16xf32>
    %29 = arith.addf %27, %28 : vector<4x16x16xf32>
    %cst_10 = arith.constant 0.000000e+00 : f32
    %30 = vector.shape_cast %25 : vector<16x16xi1> to vector<1x16x16xi1>
    %31 = vector.broadcast %30 : vector<1x16x16xi1> to vector<4x16x16xi1>
    %32 = vector.broadcast %cst_10 : f32 to vector<4x16x16xf32>
    %33 = arith.select %31, %32, %29 : vector<4x16x16xi1>, vector<4x16x16xf32>
    %34 = tpu.bitcast %33 : vector<4x16x16xf32> -> vector<4x16x16xi32>
    %c-16_i32 = arith.constant -16 : i32
    %35 = vector.broadcast %c-16_i32 : i32 to vector<4x16x16xi32>
    %36 = arith.andi %34, %35 : vector<4x16x16xi32>
    %37 = vector.shape_cast %24 : vector<16x16xi32> to vector<1x16x16xi32>
    %38 = vector.broadcast %37 : vector<1x16x16xi32> to vector<4x16x16xi32>
    %39 = arith.ori %36, %38 : vector<4x16x16xi32>
    %40 = arith.extui %25 : vector<16x16xi1> to vector<16x16xi32>
    %41 = arith.sitofp %40 : vector<16x16xi32> to vector<16x16xf32>
    %cst_11 = arith.constant dense<2147483647> : vector<4x16xi32>
    %42 = vector.multi_reduction <minsi>, %39, %cst_11 [2] : vector<4x16x16xi32> to vector<4x16xi32>
    %43 = vector.shape_cast %42 : vector<4x16xi32> to vector<4x16x1xi32>
    %44 = vector.broadcast %43 : vector<4x16x1xi32> to vector<4x16x16xi32>
    %45 = arith.cmpi eq, %39, %44 : vector<4x16x16xi32>
    %46 = arith.extui %45 : vector<4x16x16xi1> to vector<4x16x16xi32>
    %47 = arith.sitofp %46 : vector<4x16x16xi32> to vector<4x16x16xf32>
    %48 = vector.shape_cast %41 : vector<16x16xf32> to vector<1x16x16xf32>
    %49 = vector.broadcast %48 : vector<1x16x16xf32> to vector<4x16x16xf32>
    %50 = arith.subf %47, %49 : vector<4x16x16xf32>
    %c0_12 = arith.constant 0 : index
    %c0_13 = arith.constant 0 : index
    %c0_14 = arith.constant 0 : index
    %51 = vector.load %arg6[%c0_12, %c0_13, %c0_14] : memref<4x64x16xf32, #tpu.memory_space<vmem>>, vector<4x16x16xf32>
    tpu.vector_store %arg6[%c0_12, %c0_13, %c0_14], %50 {strides = array<i32>} : memref<4x64x16xf32, #tpu.memory_space<vmem>>, vector<4x16x16xf32>,
    %c2147483647_i32 = arith.constant 2147483647 : i32
    %52 = vector.broadcast %c2147483647_i32 : i32 to vector<4x16x16xi32>
    %53 = arith.select %45, %52, %39 : vector<4x16x16xi1>, vector<4x16x16xi32>
    %cst_15 = arith.constant dense<2147483647> : vector<4x16xi32>
    %54 = vector.multi_reduction <minsi>, %53, %cst_15 [2] : vector<4x16x16xi32> to vector<4x16xi32>
    %55 = vector.shape_cast %54 : vector<4x16xi32> to vector<4x16x1xi32>
    %56 = vector.broadcast %55 : vector<4x16x1xi32> to vector<4x16x16xi32>
    %57 = arith.cmpi eq, %53, %56 : vector<4x16x16xi32>
    %58 = arith.extui %57 : vector<4x16x16xi1> to vector<4x16x16xi32>
    %59 = arith.sitofp %58 : vector<4x16x16xi32> to vector<4x16x16xf32>
    %60 = vector.shape_cast %41 : vector<16x16xf32> to vector<1x16x16xf32>
    %61 = vector.broadcast %60 : vector<1x16x16xf32> to vector<4x16x16xf32>
    %62 = arith.subf %59, %61 : vector<4x16x16xf32>
    %c0_16 = arith.constant 0 : index
    %c16 = arith.constant 16 : index
    %c0_17 = arith.constant 0 : index
    %63 = vector.load %arg6[%c0_16, %c16, %c0_17] : memref<4x64x16xf32, #tpu.memory_space<vmem>>, vector<4x16x16xf32>
    tpu.vector_store %arg6[%c0_16, %c16, %c0_17], %62 {strides = array<i32>} : memref<4x64x16xf32, #tpu.memory_space<vmem>>, vector<4x16x16xf32>,
    %c2147483647_i32_18 = arith.constant 2147483647 : i32
    %64 = vector.broadcast %c2147483647_i32_18 : i32 to vector<4x16x16xi32>
    %65 = arith.select %57, %64, %53 : vector<4x16x16xi1>, vector<4x16x16xi32>
    %cst_19 = arith.constant dense<2147483647> : vector<4x16xi32>
    %66 = vector.multi_reduction <minsi>, %65, %cst_19 [2] : vector<4x16x16xi32> to vector<4x16xi32>
    %67 = vector.shape_cast %66 : vector<4x16xi32> to vector<4x16x1xi32>
    %68 = vector.broadcast %67 : vector<4x16x1xi32> to vector<4x16x16xi32>
    %69 = arith.cmpi eq, %65, %68 : vector<4x16x16xi32>
    %70 = arith.extui %69 : vector<4x16x16xi1> to vector<4x16x16xi32>
    %71 = arith.sitofp %70 : vector<4x16x16xi32> to vector<4x16x16xf32>
    %72 = vector.shape_cast %41 : vector<16x16xf32> to vector<1x16x16xf32>
    %73 = vector.broadcast %72 : vector<1x16x16xf32> to vector<4x16x16xf32>
    %74 = arith.subf %71, %73 : vector<4x16x16xf32>
    %c0_20 = arith.constant 0 : index
    %c32 = arith.constant 32 : index
    %c0_21 = arith.constant 0 : index
    %75 = vector.load %arg6[%c0_20, %c32, %c0_21] : memref<4x64x16xf32, #tpu.memory_space<vmem>>, vector<4x16x16xf32>
    tpu.vector_store %arg6[%c0_20, %c32, %c0_21], %74 {strides = array<i32>} : memref<4x64x16xf32, #tpu.memory_space<vmem>>, vector<4x16x16xf32>,
    %c2147483647_i32_22 = arith.constant 2147483647 : i32
    %76 = vector.broadcast %c2147483647_i32_22 : i32 to vector<4x16x16xi32>
    %77 = arith.select %69, %76, %65 : vector<4x16x16xi1>, vector<4x16x16xi32>
    %cst_23 = arith.constant dense<2147483647> : vector<4x16xi32>
    %78 = vector.multi_reduction <minsi>, %77, %cst_23 [2] : vector<4x16x16xi32> to vector<4x16xi32>
    %79 = vector.shape_cast %78 : vector<4x16xi32> to vector<4x16x1xi32>
    %80 = vector.broadcast %79 : vector<4x16x1xi32> to vector<4x16x16xi32>
    %81 = arith.cmpi eq, %77, %80 : vector<4x16x16xi32>
    %82 = arith.extui %81 : vector<4x16x16xi1> to vector<4x16x16xi32>
    %83 = arith.sitofp %82 : vector<4x16x16xi32> to vector<4x16x16xf32>
    %84 = vector.shape_cast %41 : vector<16x16xf32> to vector<1x16x16xf32>
    %85 = vector.broadcast %84 : vector<1x16x16xf32> to vector<4x16x16xf32>
    %86 = arith.subf %83, %85 : vector<4x16x16xf32>
    %c0_24 = arith.constant 0 : index
    %c48 = arith.constant 48 : index
    %c0_25 = arith.constant 0 : index
    %87 = vector.load %arg6[%c0_24, %c48, %c0_25] : memref<4x64x16xf32, #tpu.memory_space<vmem>>, vector<4x16x16xf32>
    tpu.vector_store %arg6[%c0_24, %c48, %c0_25], %86 {strides = array<i32>} : memref<4x64x16xf32, #tpu.memory_space<vmem>>, vector<4x16x16xf32>,
    %c0_26 = arith.constant 0 : index
    %c0_27 = arith.constant 0 : index
    %c0_28 = arith.constant 0 : index
    %88 = vector.load %arg6[%c0_26, %c0_27, %c0_28] : memref<4x64x16xf32, #tpu.memory_space<vmem>>, vector<4x64x16xf32>
    "tpu.trace_start"() <{level = 10 : i32, message = "bmp,bpc->bmc"}> : () -> ()
    %cst_29 = arith.constant dense<0.000000e+00> : vector<4x64x4xf32>
    %89 = tpu.matmul %88, %0, %cst_29 {dimension_numbers = #tpu.dot_dimension_numbers<[2], [1], [1], [2], [0, 0, 0, 1, 1, 2], [0], [0]>} : vector<4x64x16xf32>, vector<4x16x4xf32>, vector<4x64x4xf32> -> vector<4x64x4xf32>
    "tpu.trace_stop"() : () -> ()
    %90 = vector.shape_cast %89 : vector<4x64x4xf32> to vector<256x4xf32>
    %91 = vector.shape_cast %0 : vector<4x16x4xf32> to vector<64x4xf32>
    %cst_30 = arith.constant dense<0.000000e+00> : vector<64x16xf32>
    %92 = tpu.matmul %91, %2, %cst_30 {dimension_numbers = #tpu.dot_dimension_numbers<[1], [0], [0], [1], [0, 0, 1, 1], [], []>} : vector<64x4xf32>, vector<4x16xf32>, vector<64x16xf32> -> vector<64x16xf32>
    %93 = vector.broadcast %4 : vector<1x16xf32> to vector<64x16xf32>
    %94 = arith.addf %92, %93 : vector<64x16xf32>
    %95 = vector.shape_cast %94 : vector<64x16xf32> to vector<4x16x16xf32>
    %cst_31 = arith.constant dense<0.000000e+00> : vector<256x16xf32>
    %96 = tpu.matmul %90, %3, %cst_31 {dimension_numbers = #tpu.dot_dimension_numbers<[1], [0], [0], [1], [0, 0, 1, 1], [], []>} : vector<256x4xf32>, vector<4x16xf32>, vector<256x16xf32> -> vector<256x16xf32>
    %97 = vector.shape_cast %96 : vector<256x16xf32> to vector<4x4x16x16xf32>
    %98 = vector.shape_cast %95 : vector<4x16x16xf32> to vector<4x1x16x16xf32>
    %99 = vector.broadcast %98 : vector<4x1x16x16xf32> to vector<4x4x16x16xf32>
    %100 = arith.addf %97, %99 : vector<4x4x16x16xf32>
    %cst_32 = arith.constant 0.000000e+00 : f32
    %101 = vector.broadcast %cst_32 : f32 to vector<4x4x16x16xf32>
    %102 = arith.maximumf %100, %101 : vector<4x4x16x16xf32>
    %103 = vector.shape_cast %102 : vector<4x4x16x16xf32> to vector<256x16xf32>
    %cst_33 = arith.constant dense<0.000000e+00> : vector<256x16xf32>
    %104 = tpu.matmul %103, %5, %cst_33 {dimension_numbers = #tpu.dot_dimension_numbers<[1], [0], [0], [1], [0, 0, 1, 1], [], []>} : vector<256x16xf32>, vector<16x16xf32>, vector<256x16xf32> -> vector<256x16xf32>
    %105 = vector.broadcast %6 : vector<1x16xf32> to vector<256x16xf32>
    %106 = arith.addf %104, %105 : vector<256x16xf32>
    %cst_34 = arith.constant 0.000000e+00 : f32
    %107 = vector.broadcast %cst_34 : f32 to vector<256x16xf32>
    %108 = arith.maximumf %106, %107 : vector<256x16xf32>
    %cst_35 = arith.constant dense<0.000000e+00> : vector<256x16xf32>
    %109 = tpu.matmul %108, %7, %cst_35 {dimension_numbers = #tpu.dot_dimension_numbers<[1], [0], [0], [1], [0, 0, 1, 1], [], []>} : vector<256x16xf32>, vector<16x16xf32>, vector<256x16xf32> -> vector<256x16xf32>
    %110 = vector.broadcast %8 : vector<1x16xf32> to vector<256x16xf32>
    %111 = arith.addf %109, %110 : vector<256x16xf32>
    %cst_36 = arith.constant 0.000000e+00 : f32
    %112 = vector.broadcast %cst_36 : f32 to vector<256x16xf32>
    %113 = arith.maximumf %111, %112 : vector<256x16xf32>
    %114 = vector.shape_cast %113 : vector<256x16xf32> to vector<4x4x16x16xf32>
    %115 = vector.extract_strided_slice %114 {offsets = [0, 0, 0, 0], sizes = [4, 1, 16, 16], strides = [1, 1, 1, 1]} : vector<4x4x16x16xf32> to vector<4x1x16x16xf32>
    %116 = vector.shape_cast %115 : vector<4x1x16x16xf32> to vector<4x16x16xf32>
    %117 = vector.extract_strided_slice %114 {offsets = [0, 1, 0, 0], sizes = [4, 1, 16, 16], strides = [1, 1, 1, 1]} : vector<4x4x16x16xf32> to vector<4x1x16x16xf32>
    %118 = vector.shape_cast %117 : vector<4x1x16x16xf32> to vector<4x16x16xf32>
    %119 = arith.addf %116, %118 : vector<4x16x16xf32>
    %120 = vector.extract_strided_slice %114 {offsets = [0, 2, 0, 0], sizes = [4, 1, 16, 16], strides = [1, 1, 1, 1]} : vector<4x4x16x16xf32> to vector<4x1x16x16xf32>
    %121 = vector.shape_cast %120 : vector<4x1x16x16xf32> to vector<4x16x16xf32>
    %122 = arith.addf %119, %121 : vector<4x16x16xf32>
    %123 = vector.extract_strided_slice %114 {offsets = [0, 3, 0, 0], sizes = [4, 1, 16, 16], strides = [1, 1, 1, 1]} : vector<4x4x16x16xf32> to vector<4x1x16x16xf32>
    %124 = vector.shape_cast %123 : vector<4x1x16x16xf32> to vector<4x16x16xf32>
    %125 = arith.addf %122, %124 : vector<4x16x16xf32>
    %cst_37 = arith.constant 2.500000e-01 : f32
    %126 = vector.broadcast %cst_37 : f32 to vector<4x16x16xf32>
    %127 = arith.mulf %125, %126 : vector<4x16x16xf32>
    %128 = vector.shape_cast %127 : vector<4x16x16xf32> to vector<64x16xf32>
    %cst_38 = arith.constant dense<0.000000e+00> : vector<64x16xf32>
    %129 = tpu.matmul %128, %9, %cst_38 {dimension_numbers = #tpu.dot_dimension_numbers<[1], [0], [0], [1], [0, 0, 1, 1], [], []>} : vector<64x16xf32>, vector<16x16xf32>, vector<64x16xf32> -> vector<64x16xf32>
    %130 = vector.broadcast %10 : vector<1x16xf32> to vector<64x16xf32>
    %131 = arith.addf %129, %130 : vector<64x16xf32>
    %132 = vector.shape_cast %131 : vector<64x16xf32> to vector<4x16x16xf32>
    %c0_39 = arith.constant 0 : index
    %c0_40 = arith.constant 0 : index
    %133 = vector.load %arg3[%c0_39, %c0_40] : memref<160x32xf32, #tpu.memory_space<vmem>>, vector<160x32xf32>
    %134 = vector.extract_strided_slice %133 {offsets = [0, 0], sizes = [16, 32], strides = [1, 1]} : vector<160x32xf32> to vector<16x32xf32>
    %135 = vector.extract_strided_slice %133 {offsets = [16, 0], sizes = [16, 32], strides = [1, 1]} : vector<160x32xf32> to vector<16x32xf32>
    %136 = vector.extract_strided_slice %133 {offsets = [32, 0], sizes = [1, 32], strides = [1, 1]} : vector<160x32xf32> to vector<1x32xf32>
    %137 = vector.extract_strided_slice %133 {offsets = [40, 0], sizes = [32, 32], strides = [1, 1]} : vector<160x32xf32> to vector<32x32xf32>
    %138 = vector.extract_strided_slice %133 {offsets = [72, 0], sizes = [1, 32], strides = [1, 1]} : vector<160x32xf32> to vector<1x32xf32>
    %139 = vector.extract_strided_slice %133 {offsets = [80, 0], sizes = [32, 32], strides = [1, 1]} : vector<160x32xf32> to vector<32x32xf32>
    %140 = vector.extract_strided_slice %133 {offsets = [112, 0], sizes = [1, 32], strides = [1, 1]} : vector<160x32xf32> to vector<1x32xf32>
    %141 = vector.extract_strided_slice %133 {offsets = [120, 0], sizes = [32, 32], strides = [1, 1]} : vector<160x32xf32> to vector<32x32xf32>
    %142 = vector.extract_strided_slice %133 {offsets = [152, 0], sizes = [1, 32], strides = [1, 1]} : vector<160x32xf32> to vector<1x32xf32>
    %143 = arith.mulf %132, %132 : vector<4x16x16xf32>
    "tpu.trace_start"() <{level = 10 : i32, message = "bic,bjc->bij"}> : () -> ()
    %cst_41 = arith.constant dense<0.000000e+00> : vector<4x16x16xf32>
    %144 = tpu.matmul %132, %132, %cst_41 {dimension_numbers = #tpu.dot_dimension_numbers<[2], [2], [1], [1], [0, 0, 0, 1, 1, 1], [0], [0]>} : vector<4x16x16xf32>, vector<4x16x16xf32>, vector<4x16x16xf32> -> vector<4x16x16xf32>
    "tpu.trace_stop"() : () -> ()
    %cst_42 = arith.constant dense<0.000000e+00> : vector<4x16xf32>
    %145 = vector.multi_reduction <add>, %143, %cst_42 [2] : vector<4x16x16xf32> to vector<4x16xf32>
    %146 = vector.shape_cast %145 : vector<4x16xf32> to vector<4x16x1xf32>
    %cst_43 = arith.constant 1.000000e+00 : f32
    %147 = vector.broadcast %cst_43 : f32 to vector<4x1x16xf32>
    "tpu.trace_start"() <{level = 10 : i32, message = "bqc,bjc->bqj"}> : () -> ()
    %cst_44 = arith.constant dense<0.000000e+00> : vector<4x1x16xf32>
    %148 = tpu.matmul %147, %143, %cst_44 {dimension_numbers = #tpu.dot_dimension_numbers<[2], [2], [1], [1], [0, 0, 0, 1, 1, 1], [0], [0]>} : vector<4x1x16xf32>, vector<4x16x16xf32>, vector<4x1x16xf32> -> vector<4x1x16xf32>
    "tpu.trace_stop"() : () -> ()
    %149 = vector.broadcast %146 : vector<4x16x1xf32> to vector<4x16x16xf32>
    %150 = vector.broadcast %148 : vector<4x1x16xf32> to vector<4x16x16xf32>
    %151 = arith.addf %149, %150 : vector<4x16x16xf32>
    %cst_45 = arith.constant 2.000000e+00 : f32
    %152 = vector.broadcast %cst_45 : f32 to vector<4x16x16xf32>
    %153 = arith.mulf %152, %144 : vector<4x16x16xf32>
    %154 = arith.subf %151, %153 : vector<4x16x16xf32>
    %155 = tpu.iota {dimensions = array<i32: 0>} : vector<16x16xi32>
    %156 = tpu.iota {dimensions = array<i32: 1>} : vector<16x16xi32>
    %157 = arith.cmpi eq, %155, %156 : vector<16x16xi32>
    %cst_46 = arith.constant 0.000000e+00 : f32
    %158 = vector.broadcast %cst_46 : f32 to vector<4x16x16xf32>
    %159 = arith.maximumf %154, %158 : vector<4x16x16xf32>
    %cst_47 = arith.constant 1.000000e+00 : f32
    %160 = vector.broadcast %cst_47 : f32 to vector<4x16x16xf32>
    %161 = arith.addf %159, %160 : vector<4x16x16xf32>
    %cst_48 = arith.constant 0.000000e+00 : f32
    %162 = vector.shape_cast %157 : vector<16x16xi1> to vector<1x16x16xi1>
    %163 = vector.broadcast %162 : vector<1x16x16xi1> to vector<4x16x16xi1>
    %164 = vector.broadcast %cst_48 : f32 to vector<4x16x16xf32>
    %165 = arith.select %163, %164, %161 : vector<4x16x16xi1>, vector<4x16x16xf32>
    %166 = tpu.bitcast %165 : vector<4x16x16xf32> -> vector<4x16x16xi32>
    %c-16_i32_49 = arith.constant -16 : i32
    %167 = vector.broadcast %c-16_i32_49 : i32 to vector<4x16x16xi32>
    %168 = arith.andi %166, %167 : vector<4x16x16xi32>
    %169 = vector.shape_cast %156 : vector<16x16xi32> to vector<1x16x16xi32>
    %170 = vector.broadcast %169 : vector<1x16x16xi32> to vector<4x16x16xi32>
    %171 = arith.ori %168, %170 : vector<4x16x16xi32>
    %172 = arith.extui %157 : vector<16x16xi1> to vector<16x16xi32>
    %173 = arith.sitofp %172 : vector<16x16xi32> to vector<16x16xf32>
    %cst_50 = arith.constant dense<2147483647> : vector<4x16xi32>
    %174 = vector.multi_reduction <minsi>, %171, %cst_50 [2] : vector<4x16x16xi32> to vector<4x16xi32>
    %175 = vector.shape_cast %174 : vector<4x16xi32> to vector<4x16x1xi32>
    %176 = vector.broadcast %175 : vector<4x16x1xi32> to vector<4x16x16xi32>
    %177 = arith.cmpi eq, %171, %176 : vector<4x16x16xi32>
    %178 = arith.extui %177 : vector<4x16x16xi1> to vector<4x16x16xi32>
    %179 = arith.sitofp %178 : vector<4x16x16xi32> to vector<4x16x16xf32>
    %180 = vector.shape_cast %173 : vector<16x16xf32> to vector<1x16x16xf32>
    %181 = vector.broadcast %180 : vector<1x16x16xf32> to vector<4x16x16xf32>
    %182 = arith.subf %179, %181 : vector<4x16x16xf32>
    %c0_51 = arith.constant 0 : index
    %c0_52 = arith.constant 0 : index
    %c0_53 = arith.constant 0 : index
    %183 = vector.load %arg6[%c0_51, %c0_52, %c0_53] : memref<4x64x16xf32, #tpu.memory_space<vmem>>, vector<4x16x16xf32>
    tpu.vector_store %arg6[%c0_51, %c0_52, %c0_53], %182 {strides = array<i32>} : memref<4x64x16xf32, #tpu.memory_space<vmem>>, vector<4x16x16xf32>,
    %c2147483647_i32_54 = arith.constant 2147483647 : i32
    %184 = vector.broadcast %c2147483647_i32_54 : i32 to vector<4x16x16xi32>
    %185 = arith.select %177, %184, %171 : vector<4x16x16xi1>, vector<4x16x16xi32>
    %cst_55 = arith.constant dense<2147483647> : vector<4x16xi32>
    %186 = vector.multi_reduction <minsi>, %185, %cst_55 [2] : vector<4x16x16xi32> to vector<4x16xi32>
    %187 = vector.shape_cast %186 : vector<4x16xi32> to vector<4x16x1xi32>
    %188 = vector.broadcast %187 : vector<4x16x1xi32> to vector<4x16x16xi32>
    %189 = arith.cmpi eq, %185, %188 : vector<4x16x16xi32>
    %190 = arith.extui %189 : vector<4x16x16xi1> to vector<4x16x16xi32>
    %191 = arith.sitofp %190 : vector<4x16x16xi32> to vector<4x16x16xf32>
    %192 = vector.shape_cast %173 : vector<16x16xf32> to vector<1x16x16xf32>
    %193 = vector.broadcast %192 : vector<1x16x16xf32> to vector<4x16x16xf32>
    %194 = arith.subf %191, %193 : vector<4x16x16xf32>
    %c0_56 = arith.constant 0 : index
    %c16_57 = arith.constant 16 : index
    %c0_58 = arith.constant 0 : index
    %195 = vector.load %arg6[%c0_56, %c16_57, %c0_58] : memref<4x64x16xf32, #tpu.memory_space<vmem>>, vector<4x16x16xf32>
    tpu.vector_store %arg6[%c0_56, %c16_57, %c0_58], %194 {strides = array<i32>} : memref<4x64x16xf32, #tpu.memory_space<vmem>>, vector<4x16x16xf32>,
    %c2147483647_i32_59 = arith.constant 2147483647 : i32
    %196 = vector.broadcast %c2147483647_i32_59 : i32 to vector<4x16x16xi32>
    %197 = arith.select %189, %196, %185 : vector<4x16x16xi1>, vector<4x16x16xi32>
    %cst_60 = arith.constant dense<2147483647> : vector<4x16xi32>
    %198 = vector.multi_reduction <minsi>, %197, %cst_60 [2] : vector<4x16x16xi32> to vector<4x16xi32>
    %199 = vector.shape_cast %198 : vector<4x16xi32> to vector<4x16x1xi32>
    %200 = vector.broadcast %199 : vector<4x16x1xi32> to vector<4x16x16xi32>
    %201 = arith.cmpi eq, %197, %200 : vector<4x16x16xi32>
    %202 = arith.extui %201 : vector<4x16x16xi1> to vector<4x16x16xi32>
    %203 = arith.sitofp %202 : vector<4x16x16xi32> to vector<4x16x16xf32>
    %204 = vector.shape_cast %173 : vector<16x16xf32> to vector<1x16x16xf32>
    %205 = vector.broadcast %204 : vector<1x16x16xf32> to vector<4x16x16xf32>
    %206 = arith.subf %203, %205 : vector<4x16x16xf32>
    %c0_61 = arith.constant 0 : index
    %c32_62 = arith.constant 32 : index
    %c0_63 = arith.constant 0 : index
    %207 = vector.load %arg6[%c0_61, %c32_62, %c0_63] : memref<4x64x16xf32, #tpu.memory_space<vmem>>, vector<4x16x16xf32>
    tpu.vector_store %arg6[%c0_61, %c32_62, %c0_63], %206 {strides = array<i32>} : memref<4x64x16xf32, #tpu.memory_space<vmem>>, vector<4x16x16xf32>,
    %c2147483647_i32_64 = arith.constant 2147483647 : i32
    %208 = vector.broadcast %c2147483647_i32_64 : i32 to vector<4x16x16xi32>
    %209 = arith.select %201, %208, %197 : vector<4x16x16xi1>, vector<4x16x16xi32>
    %cst_65 = arith.constant dense<2147483647> : vector<4x16xi32>
    %210 = vector.multi_reduction <minsi>, %209, %cst_65 [2] : vector<4x16x16xi32> to vector<4x16xi32>
    %211 = vector.shape_cast %210 : vector<4x16xi32> to vector<4x16x1xi32>
    %212 = vector.broadcast %211 : vector<4x16x1xi32> to vector<4x16x16xi32>
    %213 = arith.cmpi eq, %209, %212 : vector<4x16x16xi32>
    %214 = arith.extui %213 : vector<4x16x16xi1> to vector<4x16x16xi32>
    %215 = arith.sitofp %214 : vector<4x16x16xi32> to vector<4x16x16xf32>
    %216 = vector.shape_cast %173 : vector<16x16xf32> to vector<1x16x16xf32>
    %217 = vector.broadcast %216 : vector<1x16x16xf32> to vector<4x16x16xf32>
    %218 = arith.subf %215, %217 : vector<4x16x16xf32>
    %c0_66 = arith.constant 0 : index
    %c48_67 = arith.constant 48 : index
    %c0_68 = arith.constant 0 : index
    %219 = vector.load %arg6[%c0_66, %c48_67, %c0_68] : memref<4x64x16xf32, #tpu.memory_space<vmem>>, vector<4x16x16xf32>
    tpu.vector_store %arg6[%c0_66, %c48_67, %c0_68], %218 {strides = array<i32>} : memref<4x64x16xf32, #tpu.memory_space<vmem>>, vector<4x16x16xf32>,
    %c0_69 = arith.constant 0 : index
    %c0_70 = arith.constant 0 : index
    %c0_71 = arith.constant 0 : index
    %220 = vector.load %arg6[%c0_69, %c0_70, %c0_71] : memref<4x64x16xf32, #tpu.memory_space<vmem>>, vector<4x64x16xf32>
    "tpu.trace_start"() <{level = 10 : i32, message = "bmp,bpc->bmc"}> : () -> ()
    %cst_72 = arith.constant dense<0.000000e+00> : vector<4x64x16xf32>
    %221 = tpu.matmul %220, %132, %cst_72 {dimension_numbers = #tpu.dot_dimension_numbers<[2], [1], [1], [2], [0, 0, 0, 1, 1, 2], [0], [0]>} : vector<4x64x16xf32>, vector<4x16x16xf32>, vector<4x64x16xf32> -> vector<4x64x16xf32>
    "tpu.trace_stop"() : () -> ()
    %222 = vector.shape_cast %221 : vector<4x64x16xf32> to vector<256x16xf32>
    %223 = vector.shape_cast %132 : vector<4x16x16xf32> to vector<64x16xf32>
    %cst_73 = arith.constant dense<0.000000e+00> : vector<64x32xf32>
    %224 = tpu.matmul %223, %134, %cst_73 {dimension_numbers = #tpu.dot_dimension_numbers<[1], [0], [0], [1], [0, 0, 1, 1], [], []>} : vector<64x16xf32>, vector<16x32xf32>, vector<64x32xf32> -> vector<64x32xf32>
    %225 = vector.broadcast %136 : vector<1x32xf32> to vector<64x32xf32>
    %226 = arith.addf %224, %225 : vector<64x32xf32>
    %227 = vector.shape_cast %226 : vector<64x32xf32> to vector<4x16x32xf32>
    %cst_74 = arith.constant dense<0.000000e+00> : vector<256x32xf32>
    %228 = tpu.matmul %222, %135, %cst_74 {dimension_numbers = #tpu.dot_dimension_numbers<[1], [0], [0], [1], [0, 0, 1, 1], [], []>} : vector<256x16xf32>, vector<16x32xf32>, vector<256x32xf32> -> vector<256x32xf32>
    %229 = vector.shape_cast %228 : vector<256x32xf32> to vector<4x4x16x32xf32>
    %230 = vector.shape_cast %227 : vector<4x16x32xf32> to vector<4x1x16x32xf32>
    %231 = vector.broadcast %230 : vector<4x1x16x32xf32> to vector<4x4x16x32xf32>
    %232 = arith.addf %229, %231 : vector<4x4x16x32xf32>
    %cst_75 = arith.constant 0.000000e+00 : f32
    %233 = vector.broadcast %cst_75 : f32 to vector<4x4x16x32xf32>
    %234 = arith.maximumf %232, %233 : vector<4x4x16x32xf32>
    %235 = vector.shape_cast %234 : vector<4x4x16x32xf32> to vector<256x32xf32>
    %cst_76 = arith.constant dense<0.000000e+00> : vector<256x32xf32>
    %236 = tpu.matmul %235, %137, %cst_76 {dimension_numbers = #tpu.dot_dimension_numbers<[1], [0], [0], [1], [0, 0, 1, 1], [], []>} : vector<256x32xf32>, vector<32x32xf32>, vector<256x32xf32> -> vector<256x32xf32>
    %237 = vector.broadcast %138 : vector<1x32xf32> to vector<256x32xf32>
    %238 = arith.addf %236, %237 : vector<256x32xf32>
    %cst_77 = arith.constant 0.000000e+00 : f32
    %239 = vector.broadcast %cst_77 : f32 to vector<256x32xf32>
    %240 = arith.maximumf %238, %239 : vector<256x32xf32>
    %cst_78 = arith.constant dense<0.000000e+00> : vector<256x32xf32>
    %241 = tpu.matmul %240, %139, %cst_78 {dimension_numbers = #tpu.dot_dimension_numbers<[1], [0], [0], [1], [0, 0, 1, 1], [], []>} : vector<256x32xf32>, vector<32x32xf32>, vector<256x32xf32> -> vector<256x32xf32>
    %242 = vector.broadcast %140 : vector<1x32xf32> to vector<256x32xf32>
    %243 = arith.addf %241, %242 : vector<256x32xf32>
    %cst_79 = arith.constant 0.000000e+00 : f32
    %244 = vector.broadcast %cst_79 : f32 to vector<256x32xf32>
    %245 = arith.maximumf %243, %244 : vector<256x32xf32>
    %246 = vector.shape_cast %245 : vector<256x32xf32> to vector<4x4x16x32xf32>
    %247 = vector.extract_strided_slice %246 {offsets = [0, 0, 0, 0], sizes = [4, 1, 16, 32], strides = [1, 1, 1, 1]} : vector<4x4x16x32xf32> to vector<4x1x16x32xf32>
    %248 = vector.shape_cast %247 : vector<4x1x16x32xf32> to vector<4x16x32xf32>
    %249 = vector.extract_strided_slice %246 {offsets = [0, 1, 0, 0], sizes = [4, 1, 16, 32], strides = [1, 1, 1, 1]} : vector<4x4x16x32xf32> to vector<4x1x16x32xf32>
    %250 = vector.shape_cast %249 : vector<4x1x16x32xf32> to vector<4x16x32xf32>
    %251 = arith.addf %248, %250 : vector<4x16x32xf32>
    %252 = vector.extract_strided_slice %246 {offsets = [0, 2, 0, 0], sizes = [4, 1, 16, 32], strides = [1, 1, 1, 1]} : vector<4x4x16x32xf32> to vector<4x1x16x32xf32>
    %253 = vector.shape_cast %252 : vector<4x1x16x32xf32> to vector<4x16x32xf32>
    %254 = arith.addf %251, %253 : vector<4x16x32xf32>
    %255 = vector.extract_strided_slice %246 {offsets = [0, 3, 0, 0], sizes = [4, 1, 16, 32], strides = [1, 1, 1, 1]} : vector<4x4x16x32xf32> to vector<4x1x16x32xf32>
    %256 = vector.shape_cast %255 : vector<4x1x16x32xf32> to vector<4x16x32xf32>
    %257 = arith.addf %254, %256 : vector<4x16x32xf32>
    %cst_80 = arith.constant 2.500000e-01 : f32
    %258 = vector.broadcast %cst_80 : f32 to vector<4x16x32xf32>
    %259 = arith.mulf %257, %258 : vector<4x16x32xf32>
    %260 = vector.shape_cast %259 : vector<4x16x32xf32> to vector<64x32xf32>
    %cst_81 = arith.constant dense<0.000000e+00> : vector<64x32xf32>
    %261 = tpu.matmul %260, %141, %cst_81 {dimension_numbers = #tpu.dot_dimension_numbers<[1], [0], [0], [1], [0, 0, 1, 1], [], []>} : vector<64x32xf32>, vector<32x32xf32>, vector<64x32xf32> -> vector<64x32xf32>
    %262 = vector.broadcast %142 : vector<1x32xf32> to vector<64x32xf32>
    %263 = arith.addf %261, %262 : vector<64x32xf32>
    %264 = vector.shape_cast %263 : vector<64x32xf32> to vector<4x16x32xf32>
    %cst_82 = arith.constant 6.250000e-02 : f32
    %265 = vector.broadcast %cst_82 : f32 to vector<4x1x16xf32>
    "tpu.trace_start"() <{level = 10 : i32, message = "bqp,bph->bqh"}> : () -> ()
    %cst_83 = arith.constant dense<0.000000e+00> : vector<4x1x32xf32>
    %266 = tpu.matmul %265, %264, %cst_83 {dimension_numbers = #tpu.dot_dimension_numbers<[2], [1], [1], [2], [0, 0, 0, 1, 1, 2], [0], [0]>} : vector<4x1x16xf32>, vector<4x16x32xf32>, vector<4x1x32xf32> -> vector<4x1x32xf32>
    "tpu.trace_stop"() : () -> ()
    %267 = vector.shape_cast %266 : vector<4x1x32xf32> to vector<4x32xf32>
    %c0_84 = arith.constant 0 : index
    %c0_85 = arith.constant 0 : index
    %268 = vector.load %arg4[%c0_84, %c0_85] : memref<40x8xf32, #tpu.memory_space<vmem>>, vector<40x8xf32>
    %269 = vector.extract_strided_slice %268 {offsets = [0, 0], sizes = [32, 8], strides = [1, 1]} : vector<40x8xf32> to vector<32x8xf32>
    %270 = vector.extract_strided_slice %268 {offsets = [32, 0], sizes = [1, 8], strides = [1, 1]} : vector<40x8xf32> to vector<1x8xf32>
    %cst_86 = arith.constant dense<0.000000e+00> : vector<4x8xf32>
    %271 = tpu.matmul %267, %269, %cst_86 {dimension_numbers = #tpu.dot_dimension_numbers<[1], [0], [0], [1], [0, 0, 1, 1], [], []>} : vector<4x32xf32>, vector<32x8xf32>, vector<4x8xf32> -> vector<4x8xf32>
    %272 = vector.broadcast %270 : vector<1x8xf32> to vector<4x8xf32>
    %273 = arith.addf %271, %272 : vector<4x8xf32>
    %c0_87 = arith.constant 0 : index
    %c0_88 = arith.constant 0 : index
    %c0_89 = arith.constant 0 : index
    %274 = vector.load %arg5[%c0_87, %c0_88, %c0_89] : memref<1x4x8xf32, #tpu.memory_space<vmem>>, vector<1x4x8xf32>
    %275 = vector.shape_cast %274 : vector<1x4x8xf32> to vector<4x8xf32>
    %276 = vector.shape_cast %273 : vector<4x8xf32> to vector<1x4x8xf32>
    tpu.vector_store %arg5[%c0_87, %c0_88, %c0_89], %276 {strides = array<i32>} : memref<1x4x8xf32, #tpu.memory_space<vmem>>, vector<1x4x8xf32>,
    return
  }
  func.func @transform_0(%arg0: i32) -> (i32, i32, i32) {
    %c0_i32 = arith.constant 0 : i32
    %c0_i32_0 = arith.constant 0 : i32
    %c0_i32_1 = arith.constant 0 : i32
    return %arg0, %c0_i32, %c0_i32_0 : i32, i32, i32
  }
  func.func @transform_1(%arg0: i32) -> (i32, i32) {
    %c0_i32 = arith.constant 0 : i32
    %c0_i32_0 = arith.constant 0 : i32
    %c0_i32_1 = arith.constant 0 : i32
    return %c0_i32, %c0_i32_0 : i32, i32
  }
  func.func @transform_2(%arg0: i32) -> (i32, i32) {
    %c0_i32 = arith.constant 0 : i32
    %c0_i32_0 = arith.constant 0 : i32
    %c0_i32_1 = arith.constant 0 : i32
    return %c0_i32, %c0_i32_0 : i32, i32
  }
  func.func @transform_3(%arg0: i32) -> (i32, i32) {
    %c0_i32 = arith.constant 0 : i32
    %c0_i32_0 = arith.constant 0 : i32
    %c0_i32_1 = arith.constant 0 : i32
    return %c0_i32, %c0_i32_0 : i32, i32
  }
  func.func @transform_4(%arg0: i32) -> (i32, i32, i32) {
    %c0_i32 = arith.constant 0 : i32
    %c0_i32_0 = arith.constant 0 : i32
    %c0_i32_1 = arith.constant 0 : i32
    return %arg0, %c0_i32, %c0_i32_0 : i32, i32, i32
  }
}

</mosaic_0001>

<bundles_post_ra>
// kernel: tpu_custom_call.1
= control target key start
LH: loop header
LB: loop body
LE: loop exit
PB: predicated region body
PF: predicated region fallthrough
CT: control target
= control target key end

     0   :  { %9 = vsyncpa [#allocation4], 0  ;;  %s11182_s0 = inlined_call_operand.vmem [shape: f32[8,16,4], index: 0, kind: input, shape index: {}]   ;;  %s11183_s1 = inlined_call_operand.vmem [shape: f32[96,16], index: 1, kind: input, shape index: {}]   ;;  %s11184_s2 = inlined_call_operand.vmem [shape: f32[160,32], index: 2, kind: input, shape index: {}]   ;;  %s11185_s3 = inlined_call_operand.vmem [shape: f32[40,8], index: 3, kind: input, shape index: {}]   ;;  %s11186_s4 = inlined_call_operand.hbm [shape: f32[2,4,8], index: 4, kind: output, shape index: {}]  }
   0x1   :  { %11 = vsyncpa [#allocation4 + $0x1], 0  ;;  %s9204_s15 = smov 0   ;;  %s9206_s16 = smov 0  }
   0x2   :  { %s9208_s17 = smov 0   ;;  %s9210_s18 = smov 0  }
   0x3 LB: > { %s9225_s19 = sadd.s32 4294967295, %s9171_s18   ;;  %s7387_s20 = sadd.s32 4294967294, %s9171_s18   ;;  %s9171_s18 = sphi %s9210_s18, %s11200_s18   ;;  %s9167_s17 = sphi %s9208_s17, %s11199_s17   ;;  %s9163_s16 = sphi %s9206_s16, %s11198_s16   ;;  %s9159_s15 = sphi %s9204_s15, %s11197_s15  }
   0x4   : > { %s9229_s21 = sadd.s32 1, %s9171_s18   ;;  %s113_s22 = sadd.s32 1, %s9167_s17 }
   0x5   : > { %s110_s23 = ssub.s32 %s9171_s18, %s9229_s21  ;;  %p123_p0 = scmp.ne.s32.totalorder %s9167_s17, %s9163_s16 }
   0x6   : > { %p111_p1 = scmp.eq.s32.totalorder %s110_s23, 0  ;;  %p124_p2 = scmp.eq.s32.totalorder %s9225_s19, 1 }
   0x7   : > { %p129_p3 = scmp.ne.s32.totalorder %s9163_s16, %s9159_s15  ;;  %p130_p4 = scmp.eq.s32.totalorder %s7387_s20, 1 }
   0x8   : > { %s9240_s24 = scalar_select %p111_p1, %s9167_s17, %s113_s22  }
   0x9   : > { %p9242_p5 = por %p124_p2, %p123_p0  ;;  %p9246_p6 = por %p130_p4, %p129_p3 }
   0xa   : > { %p7390_p7 = scmp.ge.s32.totalorder %s9171_s18, 1  ;;  %p167_p8 = scmp.lt.s32.totalorder %s9171_s18, 3 }
   0xc   : > { %p168_p9 = pnand %p7390_p7, %p167_p8 }
   0xd   : > { %s7392_s27 = sshll.u32 (!%p168_p9), %s9225_s19, 2  ;;  %vm229_vm0 = vcmask (!%p168_p9), 31744   ;;  %v9173_v25 = vmov (!%p168_p9), 0.0|0.0   ;;  %vm9174_vm2 = vmmov (!%p168_p9), 0   ;;  %v9175_v32 = vmov (!%p168_p9), 0.0   ;;  %s191_s10 = sand.u32 (!%p168_p9), 1, %s9163_s16  }
   0xe   : > { %171 = sbr.rel (%p168_p9) target bundleno = 5651 (0x1613), region = 36  ;;  %p195_p10 = scmp.lt.s32.totalorder (!%p168_p9), %s7392_s27, 7  ;;  %vm9260_vm1 = vmpackc.low (!%p168_p9), %vm229_vm0, %vm229_vm0  ;;  %v9176_v35 = vmov (!%p168_p9), 1.0   ;;  %v885_v40 = vlaneseq (!%p168_p9)  ;;  %vm986_vm5 = vcmask (!%p168_p9), 130048  }
   0xf   : > { %s7391_s11 = sshll.u32 (!%p168_p9), %s191_s10, 2  ;;  %s7813_s14 = sshll.u32 (!%p168_p9), %s9225_s19, 6 }
  0x10   : > { %v886_v46 = vshrl.u32 (!%p168_p9), %v885_v40, 7  ;;  %v9357_v53 = vand.u32 (!%p168_p9), 127, %v885_v40  ;;  %s193_s20 = scalar_lea.vmem (!%p168_p9), [#allocation3], %s7391_s11  ;;  %s7315_s29 = scalar_lea.sflag (!%p168_p9), [#allocation4], %s191_s10 }
  0x11   : > { %s7328_s22 = sshll.u32 (!%p168_p9), %s193_s20, 4  ;;  %s9178_s19 = smov (!%p168_p9), [#allocation3]   ;;  %s11142_s22 = int_to_ptr.vmem [resolvable:$true] %s7328_s22 }
  0x12   : > { %v9354_v48 = vsub.s32 (!%p168_p9), 0, %v886_v46  ;;  %v927_v59 = vadd.s32 (!%p168_p9), 8, %v886_v46  ;;  %vm9361_vm3 = vcmp.eq.s32.totalorder (!%p168_p9), %v886_v46, %v9357_v53  ;;  %s9109_s30 = scalar_lea.vmem (!%p168_p9), %s11142_s22, 64 }
  0x13   : > { %p9110_p11 = scmp.ne.s32.totalorder (!%p168_p9), %s11142_s22, %s9109_s30 }
  0x14   : > { %vm9366_vm4 = vcmp.eq.s32.totalorder (!%p168_p9), %v927_v59, %v9357_v53 }
  0x15   : > { %s11202_s27 = smov (!%p195_p10, %s7392_s27), 7  ;;  %p9111_p12 = pnand %p9110_p11, %p9242_p5 }
  0x16   : > { %s7816_s28 = sshll.u32 %s11202_s27, 4 }
  0x17   : > { %s9256_s5 = scalar_lea.vmem %s11182_s0, %s7816_s28  ;;  %s11140_s28 = scalar_lea.hbm %s11186_s4, %s7813_s14 }
  0x18   : > { %v201_v1 = vld [vmem:[%s9256_s5] sm:$0xff]  ;;  %v202_v2 = vld [vmem:[%s9256_s5 + $0x8] sm:$0xff]  ;;  %v203_v3 = vld [vmem:[%s9256_s5 + $0x10] sm:$0xff]  ;;  %p9112_p13 = pneg %p9111_p12 }
  0x19   : > { %v9267_v4 = vpack.c.bf16 %v202_v2, %v201_v1  ;;  %v204_v5 = vld [vmem:[%s9256_s5 + $0x18] sm:$0xff]  ;;  %8222 = vmatprep.mubr.msk.f32.mxu0 %vm229_vm0, %v201_v1  ;;  %8229 = vmatprep.mubr.msk.f32.mxu1 %vm229_vm0, %v203_v3  ;;  %v205_v6 = vld [vmem:[%s9256_s5 + $0x20] sm:$0xff]  ;;  %v206_v7 = vld [vmem:[%s9256_s5 + $0x28] sm:$0xff]  ;;  %v223_v12 = vmul.f32 %v203_v3, %v203_v3  ;;  %v221_v14 = vmul.f32 %v201_v1, %v201_v1 }
  0x1a   : > { %v9274_v8 = vpack.c.bf16 %v204_v5, %v203_v3  ;;  %v9276_v9 = vpack.c.bf16 %v206_v7, %v205_v6  ;;  %v207_v10 = vld [vmem:[%s9256_s5 + $0x30] sm:$0xff]  ;;  %v208_v11 = vld [vmem:[%s9256_s5 + $0x38] sm:$0xff]  ;;  %v224_v16 = vmul.f32 %v204_v5, %v204_v5  ;;  %v222_v18 = vmul.f32 %v202_v2, %v202_v2 }
  0x1b   : > { %8883 = vmatprep.subr.msk.bf16.mxu0 %vm9260_vm1, %v9267_v4  ;;  %v9283_v13 = vpack.c.bf16 %v208_v11, %v207_v10  ;;  %v560_v15 = vsel %vm229_vm0, %v223_v12, 0.0  ;;  %v554_v17 = vsel %vm229_vm0, %v221_v14, 0.0  ;;  %v226_v21 = vmul.f32 %v206_v7, %v206_v7 }
  0x1c   : > { %8889 = vmatprep.subr.msk.bf16.mxu1 %vm9260_vm1, %v9274_v8  ;;  %8886 = vmatpush3.bf16.xpose.msk.msra.mxu0 %vm9260_vm1, %v9267_v4  ;;  %v563_v19 = vsel %vm229_vm0, %v224_v16, 0.0  ;;  %v557_v20 = vsel %vm229_vm0, %v222_v18, 0.0  ;;  %v225_v22 = vmul.f32 %v205_v6, %v205_v6  ;;  %v228_v26 = vmul.f32 %v208_v11, %v208_v11 }
  0x1d   : > { %8892 = vmatpush3.bf16.xpose.msk.msra.mxu1 %vm9260_vm1, %v9274_v8  ;;  %8895 = vmatprep.subr.msk.bf16.mxu0 %vm9260_vm1, %v9276_v9  ;;  %v569_v23 = vsel %vm229_vm0, %v226_v21, 0.0  ;;  %v8906_v27 = vpack.c.bf16 %v222_v18, %v221_v14  ;;  %v8910_v29 = vpack.c.bf16 %v224_v16, %v223_v12  ;;  %v227_v30 = vmul.f32 %v207_v10, %v207_v10 }
  0x1e   : > { %8901 = vmatprep.subr.msk.bf16.mxu1 %vm9260_vm1, %v9283_v13  ;;  %561 = vadd.xlane.f32.xlu1 %v560_v15  ;;  %v566_v24 = vsel %vm229_vm0, %v225_v22, 0.0  ;;  %v575_v28 = vsel %vm229_vm0, %v228_v26, 0.0  ;;  %v8914_v33 = vpack.c.bf16 %v226_v21, %v225_v22 }
  0x1f   : > { %555 = vadd.xlane.f32.xlu0 %v554_v17  ;;  %v572_v31 = vsel %vm229_vm0, %v227_v30, 0.0  ;;  %v8918_v34 = vpack.c.bf16 %v228_v26, %v227_v30 }
  0x22   : > { %564 = vadd.xlane.f32.xlu1 %v563_v19 }
  0x23   : > { %8223 = vmatmul.mubr.msk.f32.vlgmr.msra.gmra.mrb[0].mxu0 %vm229_vm0, %v202_v2  ;;  %558 = vadd.xlane.f32.xlu0 %v557_v20 }
  0x24   : > { %8230 = vmatmul.mubr.msk.f32.vlgmr.msra.gmra.mrb[0].mxu1 %vm229_vm0, %v204_v5  ;;  %8898 = vmatpush3.bf16.xpose.msk.msra.mxu0 %vm9260_vm1, %v9276_v9 }
  0x25   : > { %8904 = vmatpush3.bf16.xpose.msk.msra.mxu1 %vm9260_vm1, %v9283_v13  ;;  %8236 = vmatprep.mubr.msk.f32.mxu0 %vm229_vm0, %v205_v6 }
  0x26   : > { %8243 = vmatprep.mubr.msk.f32.mxu1 %vm229_vm0, %v207_v10  ;;  %8905 = vmatprep.subr.bf16.mxu0 %v9173_v25 }
  0x27   : > { %8909 = vmatprep.subr.bf16.mxu1 %v9173_v25  ;;  %570 = vadd.xlane.f32.xlu1 %v569_v23 }
  0x28   : > { %567 = vadd.xlane.f32.xlu0 %v566_v24 }
  0x2b   : > { %8237 = vmatmul.mubr.msk.f32.vlgmr.msra.gmra.mrb[2].mxu0 %vm229_vm0, %v206_v7  ;;  %576 = vadd.xlane.f32.xlu1 %v575_v28 }
  0x2c   : > { %8244 = vmatmul.mubr.msk.f32.vlgmr.msra.gmra.mrb[2].mxu1 %vm229_vm0, %v208_v11  ;;  %8908 = vmatpush3.bf16.xpose.msk.msra.mxu0 %vm9260_vm1, %v8906_v27 }
  0x2d   : > { %8912 = vmatpush3.bf16.xpose.msk.msra.mxu1 %vm9260_vm1, %v8910_v29  ;;  %8250 = vmatprep.mubr.msk.f32.mxu0 %vm9174_vm2, %v9175_v32 }
  0x2e   : > { %8257 = vmatprep.mubr.msk.f32.mxu1 %vm9174_vm2, %v9175_v32  ;;  %8913 = vmatprep.subr.bf16.mxu0 %v9173_v25 }
  0x2f   : > { %8917 = vmatprep.subr.bf16.mxu1 %v9173_v25  ;;  %573 = vadd.xlane.f32.xlu0 %v572_v31 }
  0x33   : > { %8251 = vmatmul.mubr.msk.f32.vlgmr.msra.gmra.mrb[4].mxu0 %vm229_vm0, %v9176_v35 }
  0x34   : > { %8258 = vmatmul.mubr.msk.f32.vlgmr.msra.gmra.mrb[4].mxu1 %vm229_vm0, %v9176_v35  ;;  %8916 = vmatpush3.bf16.xpose.msk.msra.mxu0 %vm9260_vm1, %v8914_v33 }
  0x35   : > { %8920 = vmatpush3.bf16.xpose.msk.msra.mxu1 %vm9260_vm1, %v8918_v34  ;;  %8264 = vmatprep.mubr.msk.f32.mxu0 %vm9174_vm2, %v9175_v32 }
  0x36   : > { %8271 = vmatprep.mubr.msk.f32.mxu1 %vm9174_vm2, %v9175_v32  ;;  %8922 = vmatprep.subr.bf16.mxu0 %v9267_v4 }
  0x37   : > { %9055 = vmatprep.subr.bf16.mxu1 %v9274_v8 }
  0x3b   : > { %8265 = vmatmul.mubr.msk.f32.vlgmr.msra.gmra.mrb[6].mxu0 %vm229_vm0, %v9176_v35 }
  0x3c   : > { %8272 = vmatmul.mubr.msk.f32.vlgmr.msra.gmra.mrb[6].mxu1 %vm229_vm0, %v9176_v35  ;;  %8924 = vmatpush3.bf16.msra.mxu0 %v9267_v4 }
  0x3d   : > { %9056 = vmatpush3.bf16.msra.mxu1 %v9274_v8  ;;  %8926 = vmatprep.subr.bf16.mxu0 %v9274_v8 }
  0x3e   : > { %8934 = vmatprep.subr.bf16.mxu1 %v9283_v13 }
  0xab   : > { %v562_v41 = vpop.xlane.xlu1 %561 }
  0xac   : > { %v556_v43 = vpop.xlane.xlu0 %555 }
  0xaf   : > { %v565_v49 = vpop.xlane.xlu1 %564 }
  0xb0   : > { %v559_v50 = vpop.xlane.xlu0 %558 }
  0xb4   : > { %v571_v5 = vpop.xlane.xlu1 %570 }
  0xb5   : > { %v568_v6 = vpop.xlane.xlu0 %567 }
  0xbc   : > { %v574_v40 = vpop.xlane.xlu0 %573 }
  0xf6   : > { %v8224_v36 = vpop.f32.mrb[0].mxu0 }
  0xf7   : > { %v302_v37 = vpop.f32.mrb[1].mxu0  ;;  %v8231_v38 = vpop.f32.mrb[0].mxu1  ;;  %v910_v61 = vmul.f32 2.0, %v8224_v36 }
  0xf8   : > { %v383_v39 = vpop.f32.mrb[1].mxu1  ;;  %v912_v56 = vmul.f32 2.0, %v8231_v38  ;;  %v909_v62 = vmul.f32 2.0, %v302_v37 }
  0xf9   : > { %v911_v57 = vmul.f32 2.0, %v383_v39  ;;  %v577_v39 = vpop.xlane.xlu1 %576 }
  0xfe   : > { %v8238_v42 = vpop.f32.mrb[2].mxu0 }
  0xff   : > { %v464_v44 = vpop.f32.mrb[3].mxu0  ;;  %v8245_v45 = vpop.f32.mrb[2].mxu1  ;;  %v914_v16 = vmul.f32 2.0, %v8238_v42 }
 0x100   : > { %v545_v47 = vpop.f32.mrb[3].mxu1  ;;  %v913_v17 = vmul.f32 2.0, %v464_v44  ;;  %v916_v21 = vmul.f32 2.0, %v8245_v45 }
 0x101   : > { %v915_v28 = vmul.f32 2.0, %v545_v47 }
 0x106   : > { %v653_v51 = vpop.f32.mrb[4].mxu0 }
 0x107   : > { %v888_v52 = vrot.slane %v653_v51, %v9354_v48  ;;  %v729_v54 = vpop.f32.mrb[4].mxu1  ;;  %v8252_v55 = vpop.f32.mrb[5].mxu0 }
 0x108   : > { %v892_v58 = vrot.slane %v729_v54, %v9354_v48  ;;  %v8259_v60 = vpop.f32.mrb[5].mxu1 }
 0x109   : > { %v901_v63 = vadd.f32 %v888_v52, %v556_v43  ;;  %v902_v0 = vadd.f32 %v888_v52, %v559_v50 }
 0x10a   : > { %v903_v1 = vadd.f32 %v892_v58, %v562_v41  ;;  %v904_v2 = vadd.f32 %v892_v58, %v565_v49 }
 0x10b   : > { %v917_v3 = vsub.f32 %v901_v63, %v909_v62  ;;  %v918_v4 = vsub.f32 %v902_v0, %v910_v61 }
 0x10c   : > { %v919_v10 = vsub.f32 %v903_v1, %v911_v57  ;;  %v920_v11 = vsub.f32 %v904_v2, %v912_v56 }
 0x10d   : > { %v932_v12 = vmax.f32 %v917_v3, 0.0  ;;  %v933_v15 = vmax.f32 %v918_v4, 0.0 }
 0x10e   : > { %v934_v18 = vmax.f32 %v919_v10, 0.0  ;;  %v935_v19 = vmax.f32 %v920_v11, 0.0  ;;  %v805_v20 = vpop.f32.mrb[6].mxu0 }
 0x10f   : > { %v940_v22 = vadd.f32 1.0, %v932_v12  ;;  %v941_v23 = vadd.f32 1.0, %v933_v15  ;;  %v896_v24 = vrot.slane %v805_v20, %v9354_v48  ;;  %v881_v26 = vpop.f32.mrb[6].mxu1  ;;  %v8266_v27 = vpop.f32.mrb[7].mxu0 }
 0x110   : > { %v942_v29 = vadd.f32 1.0, %v934_v18  ;;  %v943_v30 = vadd.f32 1.0, %v935_v19  ;;  %v900_v31 = vrot.slane %v881_v26, %v9354_v48  ;;  %v8273_v33 = vpop.f32.mrb[7].mxu1 }
 0x111   : > { %v952_v34 = vsel %vm9361_vm3, 0.0, %v940_v22  ;;  %v953_v36 = vsel %vm9366_vm4, 0.0, %v941_v23  ;;  %v905_v37 = vadd.f32 %v896_v24, %v568_v6  ;;  %v906_v38 = vadd.f32 %v896_v24, %v571_v5 }
 0x112   : > { %v968_v41 = vand.u32 4294967280, %v952_v34  ;;  %v954_v42 = vsel %vm9361_vm3, 0.0, %v942_v29  ;;  %v955_v43 = vsel %vm9366_vm4, 0.0, %v943_v30  ;;  %v969_v44 = vand.u32 4294967280, %v953_v36 }
 0x113   : > { %v970_v45 = vand.u32 4294967280, %v954_v42  ;;  %v971_v46 = vand.u32 4294967280, %v955_v43  ;;  %v921_v47 = vsub.f32 %v905_v37, %v913_v17  ;;  %v922_v49 = vsub.f32 %v906_v38, %v914_v16 }
 0x114   : > { %v908_v50 = vadd.f32 %v900_v31, %v577_v39  ;;  %v907_v51 = vadd.f32 %v900_v31, %v574_v40  ;;  %v9381_v52 = vor.u32 %v968_v41, %v9357_v53  ;;  %v9384_v54 = vor.u32 %v969_v44, %v9357_v53 }
 0x115   : > { %v936_v55 = vmax.f32 %v921_v47, 0.0  ;;  %v937_v56 = vmax.f32 %v922_v49, 0.0  ;;  %v9387_v57 = vor.u32 %v970_v45, %v9357_v53  ;;  %v9390_v58 = vor.u32 %v971_v46, %v9357_v53 }
 0x116   : > { %v924_v59 = vsub.f32 %v908_v50, %v916_v21  ;;  %v923_v60 = vsub.f32 %v907_v51, %v915_v28  ;;  %v987_v61 = vsel %vm986_vm5, %v9381_v52, 2147483647  ;;  %v1002_v62 = vsel %vm986_vm5, %v9384_v54, 2147483647 }
 0x117   : > { %v944_v63 = vadd.f32 1.0, %v936_v55  ;;  %v945_v0 = vadd.f32 1.0, %v937_v56  ;;  %v989_v1 = vshra.s32 %v987_v61, 16  ;;  %v1004_v2 = vshra.s32 %v1002_v62, 16 }
 0x118   : > { %v939_v3 = vmax.f32 %v924_v59, 0.0  ;;  %v938_v4 = vmax.f32 %v923_v60, 0.0  ;;  %v1017_v5 = vsel %vm986_vm5, %v9387_v57, 2147483647  ;;  %v1032_v6 = vsel %vm986_vm5, %v9390_v58, 2147483647 }
 0x119   : > { %v956_v10 = vsel %vm9361_vm3, 0.0, %v944_v63  ;;  %v957_v11 = vsel %vm9366_vm4, 0.0, %v945_v0  ;;  %v991_v12 = vcvt.s32.f32 %v989_v1  ;;  %v1006_v15 = vcvt.s32.f32 %v1004_v2 }
 0x11a   : > { %v972_v16 = vand.u32 4294967280, %v956_v10  ;;  %v973_v17 = vand.u32 4294967280, %v957_v11  ;;  %v947_v18 = vadd.f32 1.0, %v939_v3  ;;  %v946_v19 = vadd.f32 1.0, %v938_v4 }
 0x11b   : > { %992 = vmin.xlane.f32.xlu0 %v991_v12  ;;  %1007 = vmin.xlane.f32.xlu1 %v1006_v15  ;;  %v1019_v20 = vshra.s32 %v1017_v5, 16  ;;  %v1034_v21 = vshra.s32 %v1032_v6, 16  ;;  %v1003_v47 = vand.u32 65535, %v1002_v62  ;;  %v988_v49 = vand.u32 65535, %v987_v61 }
 0x11c   : > { %v959_v22 = vsel %vm9366_vm4, 0.0, %v947_v18  ;;  %v958_v23 = vsel %vm9361_vm3, 0.0, %v946_v19  ;;  %v9409_v24 = vor.u32 %v973_v17, %v9357_v53  ;;  %v9412_v26 = vor.u32 %v972_v16, %v9357_v53 }
 0x11d   : > { %v975_v27 = vand.u32 4294967280, %v959_v22  ;;  %v974_v28 = vand.u32 4294967280, %v958_v23  ;;  %v1021_v29 = vcvt.s32.f32 %v1019_v20  ;;  %v1036_v30 = vcvt.s32.f32 %v1034_v21 }
 0x11e   : > { %v1062_v31 = vsel %vm986_vm5, %v9409_v24, 2147483647  ;;  %v1047_v33 = vsel %vm986_vm5, %v9412_v26, 2147483647  ;;  %v1005_v55 = vcvt.s32.f32 %v1003_v47  ;;  %v990_v56 = vcvt.s32.f32 %v988_v49 }
 0x11f   : > { %1022 = vmin.xlane.f32.xlu0 %v1021_v29  ;;  %1037 = vmin.xlane.f32.xlu1 %v1036_v30  ;;  %v1064_v34 = vshra.s32 %v1062_v31, 16  ;;  %v1049_v36 = vshra.s32 %v1047_v33, 16  ;;  %v9419_v37 = vor.u32 %v975_v27, %v9357_v53  ;;  %v9422_v38 = vor.u32 %v974_v28, %v9357_v53 }
 0x120   : > { %v1033_v59 = vand.u32 65535, %v1032_v6  ;;  %v1018_v60 = vand.u32 65535, %v1017_v5  ;;  %v1063_v10 = vand.u32 65535, %v1062_v31  ;;  %v1048_v11 = vand.u32 65535, %v1047_v33 }
 0x121   : > { %v1066_v39 = vcvt.s32.f32 %v1064_v34  ;;  %v1051_v40 = vcvt.s32.f32 %v1049_v36  ;;  %v1092_v41 = vsel %vm986_vm5, %v9419_v37, 2147483647  ;;  %v1077_v42 = vsel %vm986_vm5, %v9422_v38, 2147483647 }
 0x122   : > { %v1094_v43 = vshra.s32 %v1092_v41, 16  ;;  %v1079_v44 = vshra.s32 %v1077_v42, 16  ;;  %v1035_v3 = vcvt.s32.f32 %v1033_v59  ;;  %v1020_v4 = vcvt.s32.f32 %v1018_v60 }
 0x123   : > { %1067 = vmin.xlane.f32.xlu1 %v1066_v39  ;;  %1052 = vmin.xlane.f32.xlu0 %v1051_v40  ;;  %v1093_v16 = vand.u32 65535, %v1092_v41  ;;  %v1078_v17 = vand.u32 65535, %v1077_v42 }
 0x124   : > { %v1096_v45 = vcvt.s32.f32 %v1094_v43  ;;  %v1081_v46 = vcvt.s32.f32 %v1079_v44 }
 0x125   : > { %v1095_v22 = vcvt.s32.f32 %v1093_v16  ;;  %v1080_v23 = vcvt.s32.f32 %v1078_v17 }
 0x127   : > { %1097 = vmin.xlane.f32.xlu1 %v1096_v45  ;;  %1082 = vmin.xlane.f32.xlu0 %v1081_v46 }
 0x1a8   : > { %v1008_v50 = vpop.xlane.xlu1 %1007  ;;  %v993_v51 = vpop.xlane.xlu0 %992 }
 0x1a9   : > { %vm1009_vm6 = vcmp.eq.f32.partialorder %v1006_v15, %v1008_v50  ;;  %vm994_vm7 = vcmp.eq.f32.partialorder %v991_v12, %v993_v51  ;;  %v1065_v15 = vcvt.s32.f32 %v1063_v10  ;;  %v1050_v12 = vcvt.s32.f32 %v1048_v11 }
 0x1aa   : > { %v1010_v63 = vsel %vm1009_vm6, %v1005_v55, inf  ;;  %v995_v0 = vsel %vm994_vm7, %v990_v56, inf }
 0x1ab   : > { %1011 = vmin.xlane.f32.xlu1 %v1010_v63  ;;  %996 = vmin.xlane.f32.xlu0 %v995_v0 }
 0x1ac   : > { %v1038_v1 = vpop.xlane.xlu1 %1037  ;;  %v1023_v2 = vpop.xlane.xlu0 %1022 }
 0x1ad   : > { %vm1039_vm8 = vcmp.eq.f32.partialorder %v1036_v30, %v1038_v1  ;;  %vm1024_vm9 = vcmp.eq.f32.partialorder %v1021_v29, %v1023_v2  ;;  %v1014_v29 = vcvt.f32.s32 %v1008_v50  ;;  %v999_v30 = vcvt.f32.s32 %v993_v51 }
 0x1ae   : > { %v1040_v61 = vsel %vm1039_vm8, %v1035_v3, inf  ;;  %v1025_v62 = vsel %vm1024_vm9, %v1020_v4, inf  ;;  %v1044_v31 = vcvt.f32.s32 %v1038_v1  ;;  %v1029_v33 = vcvt.f32.s32 %v1023_v2 }
 0x1af   : > { %1041 = vmin.xlane.f32.xlu1 %v1040_v61  ;;  %1026 = vmin.xlane.f32.xlu0 %v1025_v62  ;;  %v1015_v41 = vshll.u32 %v1014_v29, 16  ;;  %v1000_v42 = vshll.u32 %v999_v30, 16 }
 0x1b0   : > { %v1068_v6 = vpop.xlane.xlu1 %1067  ;;  %v1053_v5 = vpop.xlane.xlu0 %1052  ;;  %v1045_v47 = vshll.u32 %v1044_v31, 16  ;;  %v1030_v49 = vshll.u32 %v1029_v33, 16 }
 0x1b1   : > { %vm1069_vm10 = vcmp.eq.f32.partialorder %v1066_v39, %v1068_v6  ;;  %vm1054_vm11 = vcmp.eq.f32.partialorder %v1051_v40, %v1053_v5  ;;  %v1074_v34 = vcvt.f32.s32 %v1068_v6  ;;  %v1059_v36 = vcvt.f32.s32 %v1053_v5 }
 0x1b2   : > { %v1070_v18 = vsel %vm1069_vm10, %v1065_v15, inf  ;;  %v1055_v19 = vsel %vm1054_vm11, %v1050_v12, inf }
 0x1b3   : > { %1071 = vmin.xlane.f32.xlu1 %v1070_v18  ;;  %1056 = vmin.xlane.f32.xlu0 %v1055_v19  ;;  %v1075_v55 = vshll.u32 %v1074_v34, 16  ;;  %v1060_v56 = vshll.u32 %v1059_v36, 16 }
 0x1b4   : > { %v1098_v20 = vpop.xlane.xlu1 %1097  ;;  %v1083_v21 = vpop.xlane.xlu0 %1082 }
 0x1b5   : > { %vm1099_vm12 = vcmp.eq.f32.partialorder %v1096_v45, %v1098_v20  ;;  %vm1084_vm13 = vcmp.eq.f32.partialorder %v1081_v46, %v1083_v21  ;;  %v9431_v45 = vsel %vm9361_vm3, 1.0, %v9175_v32  ;;  %v9436_v46 = vsel %vm9366_vm4, 1.0, %v9175_v32 }
 0x1b6   : > { %v1100_v27 = vsel %vm1099_vm12, %v1095_v22, inf  ;;  %v1085_v28 = vsel %vm1084_vm13, %v1080_v23, inf  ;;  %v1104_v59 = vcvt.f32.s32 %v1098_v20  ;;  %v1089_v60 = vcvt.f32.s32 %v1083_v21 }
 0x1b7   : > { %1101 = vmin.xlane.f32.xlu1 %v1100_v27  ;;  %1086 = vmin.xlane.f32.xlu0 %v1085_v28 }
 0x1b8   : > { %v1105_v15 = vshll.u32 %v1104_v59, 16  ;;  %v1090_v12 = vshll.u32 %v1089_v60, 16 }
 0x238   : > { %v1012_v39 = vpop.xlane.xlu1 %1011  ;;  %v997_v40 = vpop.xlane.xlu0 %996 }
 0x239   : > { %v1013_v43 = vcvt.f32.s32 %v1012_v39  ;;  %v998_v44 = vcvt.f32.s32 %v997_v40 }
 0x23b   : > { %v1016_v50 = vadd.s32 %v1015_v41, %v1013_v43  ;;  %v1001_v51 = vadd.s32 %v1000_v42, %v998_v44 }
 0x23c   : > { %v1042_v63 = vpop.xlane.xlu1 %1041  ;;  %v1027_v0 = vpop.xlane.xlu0 %1026 }
 0x23d   : > { %vm1108_vm14 = vcmp.eq.s32.totalorder %v9384_v54, %v1016_v50  ;;  %vm1107_vm15 = vcmp.eq.s32.totalorder %v9381_v52, %v1001_v51  ;;  %v1043_v1 = vcvt.f32.s32 %v1042_v63  ;;  %v1028_v2 = vcvt.f32.s32 %v1027_v0 }
 0x23e   : > { %v7426_v3 = vsel %vm1108_vm14, 1.0, %v9175_v32  ;;  %v7425_v4 = vsel %vm1107_vm15, 1.0, %v9175_v32  ;;  %v9443_v10 = vsel %vm1108_vm14, 2147483647, %v9384_v54  ;;  %v9446_v11 = vsel %vm1107_vm15, 2147483647, %v9381_v52 }
 0x23f   : > { %v1132_v61 = vsub.f32 %v7426_v3, %v9436_v46  ;;  %v1131_v62 = vsub.f32 %v7425_v4, %v9431_v45  ;;  %v1046_v6 = vadd.s32 %v1045_v47, %v1043_v1  ;;  %v1031_v5 = vadd.s32 %v1030_v49, %v1028_v2 }
 0x240   : > { %v1072_v16 = vpop.xlane.xlu1 %1071  ;;  %v1057_v17 = vpop.xlane.xlu0 %1056  ;;  %v9452_v18 = vsel %vm986_vm5, %v9443_v10, 2147483647  ;;  %v9456_v54 = vsel %vm986_vm5, %v9446_v11, 2147483647 }
 0x241   : > { %1140 = vst.msk [vmem:[#allocation2 + $0x8] sm:$0xff] %vm986_vm5, %v1132_v61  ;;  %1139 = vst.msk [vmem:[#allocation2] sm:$0xff] %vm986_vm5, %v1131_v62  ;;  %vm1110_vm1 = vcmp.eq.s32.totalorder %v9390_v58, %v1046_v6  ;;  %vm1109_vm6 = vcmp.eq.s32.totalorder %v9387_v57, %v1031_v5  ;;  %v1073_v52 = vcvt.f32.s32 %v1072_v16  ;;  %v1058_v19 = vcvt.f32.s32 %v1057_v17 }
 0x242   : > { %v7428_v20 = vsel %vm1110_vm1, 1.0, %v9175_v32  ;;  %v7427_v21 = vsel %vm1109_vm6, 1.0, %v9175_v32  ;;  %v1172_v22 = vshra.s32 %v9452_v18, 16  ;;  %v1157_v23 = vshra.s32 %v9456_v54, 16 }
 0x243   : > { %v1134_v27 = vsub.f32 %v7428_v20, %v9436_v46  ;;  %v1133_v28 = vsub.f32 %v7427_v21, %v9431_v45  ;;  %v1076_v29 = vadd.s32 %v1075_v55, %v1073_v52  ;;  %v1061_v30 = vadd.s32 %v1060_v56, %v1058_v19 }
 0x244   : > { %v9472_v31 = vcvt.s32.f32 %v1172_v22  ;;  %v1102_v33 = vpop.xlane.xlu1 %1101  ;;  %v9474_v34 = vcvt.s32.f32 %v1157_v23  ;;  %v1087_v36 = vpop.xlane.xlu0 %1086  ;;  %v9479_v39 = vsel %vm1110_vm1, 2147483647, %v9390_v58  ;;  %v9484_v40 = vsel %vm1109_vm6, 2147483647, %v9387_v57 }
 0x245   : > { %1142 = vst.msk [vmem:[#allocation2 + $0x48] sm:$0xff] %vm986_vm5, %v1134_v27  ;;  %1141 = vst.msk [vmem:[#allocation2 + $0x40] sm:$0xff] %vm986_vm5, %v1133_v28  ;;  %vm1112_vm7 = vcmp.eq.s32.totalorder %v9409_v24, %v1076_v29  ;;  %vm1111_vm8 = vcmp.eq.s32.totalorder %v9412_v26, %v1061_v30  ;;  %v1103_v41 = vcvt.f32.s32 %v1102_v33  ;;  %v1088_v42 = vcvt.f32.s32 %v1087_v36 }
 0x246   : > { %v7430_v58 = vsel %vm1112_vm7, 1.0, %v9175_v32  ;;  %v7429_v43 = vsel %vm1111_vm8, 1.0, %v9175_v32  ;;  %1175 = vmin.xlane.f32.xlu1 %v9472_v31  ;;  %1160 = vmin.xlane.f32.xlu0 %v9474_v34  ;;  %v9500_v57 = vsel %vm986_vm5, %v9479_v39, 2147483647  ;;  %v9504_v44 = vsel %vm986_vm5, %v9484_v40, 2147483647 }
 0x247   : > { %v1136_v47 = vsub.f32 %v7430_v58, %v9436_v46  ;;  %v1135_v49 = vsub.f32 %v7429_v43, %v9431_v45  ;;  %v1106_v50 = vadd.s32 %v1105_v15, %v1103_v41  ;;  %v1091_v51 = vadd.s32 %v1090_v12, %v1088_v42 }
 0x248   : > { %v1202_v55 = vshra.s32 %v9500_v57, 16  ;;  %v1187_v56 = vshra.s32 %v9504_v44, 16  ;;  %v1651_v59 = vld [vmem:[#allocation2] sm:$0xff]  ;;  %v1652_v60 = vld [vmem:[#allocation2 + $0x8] sm:$0xff]  ;;  %v9513_v63 = vsel %vm1112_vm7, 2147483647, %v9409_v24 }
 0x249   : > { %1144 = vst.msk [vmem:[#allocation2 + $0x88] sm:$0xff] %vm986_vm5, %v1136_v47  ;;  %1143 = vst.msk [vmem:[#allocation2 + $0x80] sm:$0xff] %vm986_vm5, %v1135_v49  ;;  %vm1114_vm9 = vcmp.eq.s32.totalorder %v9419_v37, %v1106_v50  ;;  %vm1113_vm10 = vcmp.eq.s32.totalorder %v9422_v38, %v1091_v51  ;;  %8278 = vmatprep.mubr.msk.f32.mxu0 %vm986_vm5, %v1651_v59  ;;  %v1230_v0 = vsel %vm986_vm5, %v9513_v63, 2147483647  ;;  %v9525_v1 = vsel %vm1111_vm8, 2147483647, %v9412_v26 }
 0x24a   : > { %v7432_v24 = vsel %vm1114_vm9, 1.0, %v9175_v32  ;;  %v7431_v2 = vsel %vm1113_vm10, 1.0, %v9175_v32  ;;  %v1204_v3 = vcvt.s32.f32 %v1202_v55  ;;  %v1189_v4 = vcvt.s32.f32 %v1187_v56  ;;  %8279 = vmatmul.mubr.msk.f32.vlgmr.msra.gmra.mrb[8].mxu0 %vm986_vm5, %v1652_v60 }
 0x24b   : > { %v1138_v61 = vsub.f32 %v7432_v24, %v9436_v46  ;;  %v1137_v62 = vsub.f32 %v7431_v2, %v9431_v45  ;;  %v1232_v6 = vshra.s32 %v1230_v0, 16  ;;  %v1215_v26 = vsel %vm986_vm5, %v9525_v1, 2147483647  ;;  %8928 = vmatpush3.bf16.msra.mxu0 %v9274_v8 }
 0x24c   : > { %1205 = vmin.xlane.f32.xlu1 %v1204_v3  ;;  %1190 = vmin.xlane.f32.xlu0 %v1189_v4  ;;  %v1217_v5 = vshra.s32 %v1215_v26, 16  ;;  %v9542_v15 = vsel %vm1114_vm9, 2147483647, %v9419_v37  ;;  %v9547_v12 = vsel %vm1113_vm10, 2147483647, %v9422_v38  ;;  %v1171_v21 = vand.u32 65535, %v9452_v18 }
 0x24d   : > { %1146 = vst.msk [vmem:[#allocation2 + $0xc8] sm:$0xff] %vm986_vm5, %v1138_v61  ;;  %1145 = vst.msk [vmem:[#allocation2 + $0xc0] sm:$0xff] %vm986_vm5, %v1137_v62  ;;  %v1234_v16 = vcvt.s32.f32 %v1232_v6  ;;  %v1260_v8 = vsel %vm986_vm5, %v9542_v15, 2147483647  ;;  %v1245_v17 = vsel %vm986_vm5, %v9547_v12, 2147483647  ;;  %8930 = vmatprep.subr.bf16.mxu0 %v9276_v9 }
 0x24e   : > { %v1219_v37 = vcvt.s32.f32 %v1217_v5  ;;  %v1262_v52 = vshra.s32 %v1260_v8, 16  ;;  %v1247_v19 = vshra.s32 %v1245_v17, 16  ;;  %v1156_v22 = vand.u32 65535, %v9456_v54 }
 0x24f   : > { %v1173_v28 = vcvt.s32.f32 %v1171_v21  ;;  %v1201_v36 = vand.u32 65535, %v9500_v57  ;;  %v1186_v41 = vand.u32 65535, %v9504_v44  ;;  %v1231_v43 = vand.u32 65535, %v1230_v0 }
 0x250   : > { %1235 = vmin.xlane.f32.xlu1 %v1234_v16  ;;  %1220 = vmin.xlane.f32.xlu0 %v1219_v37  ;;  %v1264_v38 = vcvt.s32.f32 %v1262_v52  ;;  %v1249_v20 = vcvt.s32.f32 %v1247_v19  ;;  %v1158_v29 = vcvt.s32.f32 %v1156_v22  ;;  %v1216_v47 = vand.u32 65535, %v1215_v26 }
 0x251   : > { %v1203_v58 = vcvt.s32.f32 %v1201_v36  ;;  %v1188_v54 = vcvt.s32.f32 %v1186_v41  ;;  %v1233_v51 = vcvt.s32.f32 %v1231_v43  ;;  %v1261_v55 = vand.u32 65535, %v1260_v8 }
 0x252   : > { %v1218_v57 = vcvt.s32.f32 %v1216_v47  ;;  %v1246_v44 = vand.u32 65535, %v1245_v17 }
 0x253   : > { %v1263_v24 = vcvt.s32.f32 %v1261_v55 }
 0x254   : > { %1265 = vmin.xlane.f32.xlu1 %v1264_v38  ;;  %1250 = vmin.xlane.f32.xlu0 %v1249_v20  ;;  %v1248_v2 = vcvt.s32.f32 %v1246_v44 }
 0x2d3   : > { %v1176_v23 = vpop.xlane.xlu1 %1175  ;;  %v1161_v27 = vpop.xlane.xlu0 %1160 }
 0x2d4   : > { %vm1177_vm11 = vcmp.eq.f32.partialorder %v9472_v31, %v1176_v23  ;;  %vm1162_vm12 = vcmp.eq.f32.partialorder %v9474_v34, %v1161_v27  ;;  %v1182_v6 = vcvt.f32.s32 %v1176_v23  ;;  %v1167_v26 = vcvt.f32.s32 %v1161_v27 }
 0x2d5   : > { %v1178_v30 = vsel %vm1177_vm11, %v1173_v28, inf  ;;  %v1163_v33 = vsel %vm1162_vm12, %v1158_v29, inf }
 0x2d6   : > { %1179 = vmin.xlane.f32.xlu1 %v1178_v30  ;;  %1164 = vmin.xlane.f32.xlu0 %v1163_v33  ;;  %v1168_v52 = vshll.u32 %v1167_v26, 16 }
 0x2d9   : > { %v1206_v42 = vpop.xlane.xlu1 %1205  ;;  %v1191_v18 = vpop.xlane.xlu0 %1190 }
 0x2da   : > { %vm1207_vm13 = vcmp.eq.f32.partialorder %v1204_v3, %v1206_v42  ;;  %vm1192_vm14 = vcmp.eq.f32.partialorder %v1189_v4, %v1191_v18  ;;  %v1212_v5 = vcvt.f32.s32 %v1206_v42 }
 0x2db   : > { %v1208_v49 = vsel %vm1207_vm13, %v1203_v58, inf  ;;  %v1193_v31 = vsel %vm1192_vm14, %v1188_v54, inf }
 0x2dc   : > { %1209 = vmin.xlane.f32.xlu1 %v1208_v49  ;;  %1194 = vmin.xlane.f32.xlu0 %v1193_v31  ;;  %v1213_v22 = vshll.u32 %v1212_v5, 16 }
 0x2dd   : > { %v1236_v34 = vpop.xlane.xlu1 %1235  ;;  %v1221_v50 = vpop.xlane.xlu0 %1220 }
 0x2de   : > { %vm1237_vm15 = vcmp.eq.f32.partialorder %v1234_v16, %v1236_v34  ;;  %vm1222_vm1 = vcmp.eq.f32.partialorder %v1219_v37, %v1221_v50  ;;  %v1197_v16 = vcvt.f32.s32 %v1191_v18  ;;  %v1183_v37 = vshll.u32 %v1182_v6, 16 }
 0x2df   : > { %v1238_v56 = vsel %vm1237_vm15, %v1233_v51, inf  ;;  %v1223_v59 = vsel %vm1222_vm1, %v1218_v57, inf  ;;  %v1242_v29 = vcvt.f32.s32 %v1236_v34  ;;  %v1227_v30 = vcvt.f32.s32 %v1221_v50 }
 0x2e0   : > { %1239 = vmin.xlane.f32.xlu1 %v1238_v56  ;;  %1224 = vmin.xlane.f32.xlu0 %v1223_v59  ;;  %v1198_v28 = vshll.u32 %v1197_v16, 16 }
 0x2e1   : > { %v9562_v60 = vpop.xlane.xlu1 %1265  ;;  %v9564_v0 = vpop.xlane.xlu0 %1250  ;;  %v1243_v50 = vshll.u32 %v1242_v29, 16  ;;  %v1228_v51 = vshll.u32 %v1227_v30, 16 }
 0x2e2   : > { %vm1267_vm6 = vcmp.eq.f32.partialorder %v1264_v38, %v9562_v60  ;;  %vm1252_vm7 = vcmp.eq.f32.partialorder %v1249_v20, %v9564_v0  ;;  %v1272_v57 = vcvt.f32.s32 %v9562_v60  ;;  %v1257_v55 = vcvt.f32.s32 %v9564_v0 }
 0x2e3   : > { %v1268_v3 = vsel %vm1267_vm6, %v1263_v24, inf  ;;  %v1253_v4 = vsel %vm1252_vm7, %v1248_v2, inf }
 0x2e4   : > { %1269 = vmin.xlane.f32.xlu1 %v1268_v3  ;;  %1254 = vmin.xlane.f32.xlu0 %v1253_v4  ;;  %v1273_v16 = vshll.u32 %v1272_v57, 16 }
 0x31d   : > { %v9568_v61 = vpop.f32.mrb[8].mxu0 }
 0x31e   : > { %v9570_v62 = vpop.f32.mrb[9].mxu0 }
 0x363   : > { %v1180_v8 = vpop.xlane.xlu1 %1179  ;;  %v1165_v17 = vpop.xlane.xlu0 %1164 }
 0x364   : > { %v1181_v19 = vcvt.f32.s32 %v1180_v8  ;;  %v1166_v38 = vcvt.f32.s32 %v1165_v17  ;;  %v1258_v8 = vshll.u32 %v1257_v55, 16 }
 0x366   : > { %v1184_v21 = vadd.s32 %v1183_v37, %v1181_v19  ;;  %v1169_v20 = vadd.s32 %v1168_v52, %v1166_v38 }
 0x368   : > { %vm1276_vm8 = vcmp.eq.s32.totalorder %v9443_v10, %v1184_v21  ;;  %vm1275_vm9 = vcmp.eq.s32.totalorder %v9446_v11, %v1169_v20 }
 0x369   : > { %v7434_v23 = vsel %vm1276_vm8, 1.0, %v9175_v32  ;;  %v7433_v27 = vsel %vm1275_vm9, 1.0, %v9175_v32  ;;  %v1210_v33 = vpop.xlane.xlu1 %1209  ;;  %v1195_v36 = vpop.xlane.xlu0 %1194  ;;  %v9577_v41 = vsel %vm1276_vm8, 2147483647, %v9443_v10  ;;  %v9580_v42 = vsel %vm1275_vm9, 2147483647, %v9446_v11 }
 0x36a   : > { %v1300_v18 = vsub.f32 %v7434_v23, %v9436_v46  ;;  %v1299_v58 = vsub.f32 %v7433_v27, %v9431_v45  ;;  %v1211_v54 = vcvt.f32.s32 %v1210_v33  ;;  %v1196_v43 = vcvt.f32.s32 %v1195_v36 }
 0x36b   : > { %v9586_v47 = vsel %vm986_vm5, %v9577_v41, 2147483647  ;;  %v9590_v49 = vsel %vm986_vm5, %v9580_v42, 2147483647 }
 0x36c   : > { %1308 = vst.msk [vmem:[#allocation2 + $0x18] sm:$0xff] %vm986_vm5, %v1300_v18  ;;  %1307 = vst.msk [vmem:[#allocation2 + $0x10] sm:$0xff] %vm986_vm5, %v1299_v58  ;;  %v1214_v10 = vadd.s32 %v1213_v22, %v1211_v54  ;;  %v1199_v11 = vadd.s32 %v1198_v28, %v1196_v43  ;;  %v1340_v31 = vshra.s32 %v9586_v47, 16  ;;  %v1325_v34 = vshra.s32 %v9590_v49, 16 }
 0x36d   : > { %v1240_v44 = vpop.xlane.xlu1 %1239  ;;  %v1225_v56 = vpop.xlane.xlu0 %1224 }
 0x36e   : > { %vm1278_vm10 = vcmp.eq.s32.totalorder %v9479_v39, %v1214_v10  ;;  %vm1277_vm11 = vcmp.eq.s32.totalorder %v9484_v40, %v1199_v11  ;;  %v1241_v59 = vcvt.f32.s32 %v1240_v44  ;;  %v1226_v24 = vcvt.f32.s32 %v1225_v56 }
 0x36f   : > { %v7436_v2 = vsel %vm1278_vm10, 1.0, %v9175_v32  ;;  %v7435_v3 = vsel %vm1277_vm11, 1.0, %v9175_v32  ;;  %v9606_v4 = vcvt.s32.f32 %v1340_v31  ;;  %v9608_v60 = vcvt.s32.f32 %v1325_v34 }
 0x370   : > { %v1302_v0 = vsub.f32 %v7436_v2, %v9436_v46  ;;  %v1301_v6 = vsub.f32 %v7435_v3, %v9431_v45  ;;  %v1244_v26 = vadd.s32 %v1243_v50, %v1241_v59  ;;  %v1229_v5 = vadd.s32 %v1228_v51, %v1226_v24 }
 0x371   : > { %1343 = vmin.xlane.f32.xlu1 %v9606_v4  ;;  %v1270_v17 = vpop.xlane.xlu1 %1269  ;;  %1328 = vmin.xlane.f32.xlu0 %v9608_v60  ;;  %v1255_v37 = vpop.xlane.xlu0 %1254  ;;  %v9617_v52 = vsel %vm1278_vm10, 2147483647, %v9479_v39  ;;  %v9622_v19 = vsel %vm1277_vm11, 2147483647, %v9484_v40 }
 0x372   : > { %1310 = vst.msk [vmem:[#allocation2 + $0x58] sm:$0xff] %vm986_vm5, %v1302_v0  ;;  %1309 = vst.msk [vmem:[#allocation2 + $0x50] sm:$0xff] %vm986_vm5, %v1301_v6  ;;  %vm1280_vm12 = vcmp.eq.s32.totalorder %v9513_v63, %v1244_v26  ;;  %vm1279_vm13 = vcmp.eq.s32.totalorder %v9525_v1, %v1229_v5  ;;  %v1271_v38 = vcvt.f32.s32 %v1270_v17  ;;  %v1256_v21 = vcvt.f32.s32 %v1255_v37 }
 0x373   : > { %v7438_v39 = vsel %vm1280_vm12, 1.0, %v9175_v32  ;;  %v7437_v20 = vsel %vm1279_vm13, 1.0, %v9175_v32  ;;  %v9636_v40 = vsel %vm986_vm5, %v9617_v52, 2147483647  ;;  %v9640_v22 = vsel %vm986_vm5, %v9622_v19, 2147483647 }
 0x374   : > { %v1304_v28 = vsub.f32 %v7438_v39, %v9436_v46  ;;  %v1303_v29 = vsub.f32 %v7437_v20, %v9431_v45  ;;  %v1274_v30 = vadd.s32 %v1273_v16, %v1271_v38  ;;  %v1259_v23 = vadd.s32 %v1258_v8, %v1256_v21  ;;  %v1653_v27 = vld [vmem:[#allocation2 + $0x10] sm:$0xff]  ;;  %v1654_v33 = vld [vmem:[#allocation2 + $0x18] sm:$0xff] }
 0x375   : > { %v1370_v36 = vshra.s32 %v9636_v40, 16  ;;  %v1355_v18 = vshra.s32 %v9640_v22, 16  ;;  %8281 = vmatprep.mubr.msk.f32.mxu0 %vm986_vm5, %v1653_v27  ;;  %v9650_v58 = vsel %vm1280_vm12, 2147483647, %v9513_v63  ;;  %v9655_v54 = vsel %vm1279_vm13, 2147483647, %v9525_v1 }
 0x376   : > { %1312 = vst.msk [vmem:[#allocation2 + $0x98] sm:$0xff] %vm986_vm5, %v1304_v28  ;;  %1311 = vst.msk [vmem:[#allocation2 + $0x90] sm:$0xff] %vm986_vm5, %v1303_v29  ;;  %vm1282_vm14 = vcmp.eq.s32.totalorder %v9542_v15, %v1274_v30  ;;  %vm1281_vm15 = vcmp.eq.s32.totalorder %v9547_v12, %v1259_v23  ;;  %8282 = vmatmul.mubr.msk.f32.gmra.mrb[10].mxu0 %vm986_vm5, %v1654_v33  ;;  %v1398_v43 = vsel %vm986_vm5, %v9650_v58, 2147483647  ;;  %v1383_v63 = vsel %vm986_vm5, %v9655_v54, 2147483647 }
 0x377   : > { %v7440_v1 = vsel %vm1282_vm14, 1.0, %v9175_v32  ;;  %v7439_v10 = vsel %vm1281_vm15, 1.0, %v9175_v32  ;;  %v1372_v11 = vcvt.s32.f32 %v1370_v36  ;;  %v1357_v31 = vcvt.s32.f32 %v1355_v18 }
 0x378   : > { %v1306_v34 = vsub.f32 %v7440_v1, %v9436_v46  ;;  %v1305_v50 = vsub.f32 %v7439_v10, %v9431_v45  ;;  %v1400_v51 = vshra.s32 %v1398_v43, 16  ;;  %v1385_v57 = vshra.s32 %v1383_v63, 16 }
 0x379   : > { %1373 = vmin.xlane.f32.xlu1 %v1372_v11  ;;  %1358 = vmin.xlane.f32.xlu0 %v1357_v31  ;;  %v1661_v55 = vld [vmem:[#allocation2 + $0x50] sm:$0xff]  ;;  %v1662_v44 = vld [vmem:[#allocation2 + $0x58] sm:$0xff]  ;;  %v9677_v56 = vsel %vm1282_vm14, 2147483647, %v9542_v15  ;;  %v9682_v59 = vsel %vm1281_vm15, 2147483647, %v9547_v12 }
 0x37a   : > { %1314 = vst.msk [vmem:[#allocation2 + $0xd8] sm:$0xff] %vm986_vm5, %v1306_v34  ;;  %1313 = vst.msk [vmem:[#allocation2 + $0xd0] sm:$0xff] %vm986_vm5, %v1305_v50  ;;  %v1402_v24 = vcvt.s32.f32 %v1400_v51  ;;  %v1387_v2 = vcvt.s32.f32 %v1385_v57  ;;  %8297 = vmatprep.mubr.msk.f32.mxu1 %vm986_vm5, %v1661_v55  ;;  %v1428_v3 = vsel %vm986_vm5, %v9677_v56, 2147483647  ;;  %v1413_v15 = vsel %vm986_vm5, %v9682_v59, 2147483647 }
 0x37b   : > { %8298 = vmatmul.mubr.msk.f32.vlgmr.msra.gmra.mrb[8].mxu1 %vm986_vm5, %v1662_v44  ;;  %v1430_v0 = vshra.s32 %v1428_v3, 16  ;;  %v1415_v6 = vshra.s32 %v1413_v15, 16  ;;  %v1339_v5 = vand.u32 65535, %v9586_v47  ;;  %v1324_v16 = vand.u32 65535, %v9590_v49 }
 0x37c   : > { %8936 = vmatpush3.bf16.msra.mxu1 %v9283_v13  ;;  %v1369_v39 = vand.u32 65535, %v9636_v40  ;;  %v1354_v20 = vand.u32 65535, %v9640_v22  ;;  %v1399_v30 = vand.u32 65535, %v1398_v43  ;;  %v1384_v23 = vand.u32 65535, %v1383_v63 }
 0x37d   : > { %1403 = vmin.xlane.f32.xlu1 %v1402_v24  ;;  %1388 = vmin.xlane.f32.xlu0 %v1387_v2  ;;  %v1432_v12 = vcvt.s32.f32 %v1430_v0  ;;  %v1417_v26 = vcvt.s32.f32 %v1415_v6  ;;  %v1341_v37 = vcvt.s32.f32 %v1339_v5  ;;  %v1326_v38 = vcvt.s32.f32 %v1324_v16 }
 0x37e   : > { %v1371_v49 = vcvt.s32.f32 %v1369_v39  ;;  %v1356_v29 = vcvt.s32.f32 %v1354_v20  ;;  %v1401_v22 = vcvt.s32.f32 %v1399_v30  ;;  %v1386_v33 = vcvt.s32.f32 %v1384_v23 }
 0x37f   : > { %v1429_v36 = vand.u32 65535, %v1428_v3  ;;  %v1414_v18 = vand.u32 65535, %v1413_v15 }
 0x381   : > { %1433 = vmin.xlane.f32.xlu1 %v1432_v12  ;;  %1418 = vmin.xlane.f32.xlu0 %v1417_v26 }
 0x3fe   : > { %v1344_v8 = vpop.xlane.xlu1 %1343  ;;  %v1329_v17 = vpop.xlane.xlu0 %1328 }
 0x3ff   : > { %vm1345_vm1 = vcmp.eq.f32.partialorder %v9606_v4, %v1344_v8  ;;  %vm1330_vm6 = vcmp.eq.f32.partialorder %v9608_v60, %v1329_v17 }
 0x400   : > { %v1346_v21 = vsel %vm1345_vm1, %v1341_v37, inf  ;;  %v1331_v13 = vsel %vm1330_vm6, %v1326_v38, inf }
 0x401   : > { %1347 = vmin.xlane.f32.xlu1 %v1346_v21  ;;  %1332 = vmin.xlane.f32.xlu0 %v1331_v13 }
 0x406   : > { %v9699_v28 = vpop.xlane.xlu1 %1373  ;;  %v9701_v47 = vpop.xlane.xlu0 %1358 }
 0x407   : > { %vm1375_vm7 = vcmp.eq.f32.partialorder %v1372_v11, %v9699_v28  ;;  %vm1360_vm8 = vcmp.eq.f32.partialorder %v1357_v31, %v9701_v47  ;;  %v1431_v11 = vcvt.s32.f32 %v1429_v36  ;;  %v1416_v31 = vcvt.s32.f32 %v1414_v18 }
 0x408   : > { %v1376_v4 = vsel %vm1375_vm7, %v1371_v49, inf  ;;  %v1361_v60 = vsel %vm1360_vm8, %v1356_v29, inf  ;;  %v1380_v37 = vcvt.f32.s32 %v9699_v28  ;;  %v1365_v38 = vcvt.f32.s32 %v9701_v47 }
 0x409   : > { %1377 = vmin.xlane.f32.xlu1 %v1376_v4  ;;  %1362 = vmin.xlane.f32.xlu0 %v1361_v60 }
 0x40a   : > { %v9705_v27 = vpop.xlane.xlu1 %1403  ;;  %v9707_v40 = vpop.xlane.xlu0 %1388 }
 0x40b   : > { %vm1405_vm9 = vcmp.eq.f32.partialorder %v1402_v24, %v9705_v27  ;;  %vm1390_vm10 = vcmp.eq.f32.partialorder %v1387_v2, %v9707_v40  ;;  %v1350_v24 = vcvt.f32.s32 %v1344_v8  ;;  %v1335_v2 = vcvt.f32.s32 %v1329_v17 }
 0x40c   : > { %v1406_v43 = vsel %vm1405_vm9, %v1401_v22, inf  ;;  %v1391_v63 = vsel %vm1390_vm10, %v1386_v33, inf  ;;  %v1410_v21 = vcvt.f32.s32 %v9705_v27  ;;  %v1395_v13 = vcvt.f32.s32 %v9707_v40 }
 0x40d   : > { %1407 = vmin.xlane.f32.xlu1 %v1406_v43  ;;  %1392 = vmin.xlane.f32.xlu0 %v1391_v63  ;;  %v1351_v0 = vshll.u32 %v1350_v24, 16  ;;  %v1336_v6 = vshll.u32 %v1335_v2, 16  ;;  %v1381_v27 = vshll.u32 %v1380_v37, 16  ;;  %v1366_v40 = vshll.u32 %v1365_v38, 16 }
 0x40e   : > { %v1434_v1 = vpop.xlane.xlu1 %1433  ;;  %v1419_v10 = vpop.xlane.xlu0 %1418 }
 0x40f   : > { %vm1435_vm11 = vcmp.eq.f32.partialorder %v1432_v12, %v1434_v1  ;;  %vm1420_vm12 = vcmp.eq.f32.partialorder %v1417_v26, %v1419_v10  ;;  %v1440_v30 = vcvt.f32.s32 %v1434_v1  ;;  %v1425_v23 = vcvt.f32.s32 %v1419_v10 }
 0x410   : > { %v1436_v34 = vsel %vm1435_vm11, %v1431_v11, inf  ;;  %v1421_v50 = vsel %vm1420_vm12, %v1416_v31, inf  ;;  %v1411_v1 = vshll.u32 %v1410_v21, 16  ;;  %v1396_v10 = vshll.u32 %v1395_v13, 16 }
 0x411   : > { %1437 = vmin.xlane.f32.xlu1 %v1436_v34  ;;  %1422 = vmin.xlane.f32.xlu0 %v1421_v50  ;;  %v1441_v11 = vshll.u32 %v1440_v30, 16  ;;  %v1426_v31 = vshll.u32 %v1425_v23, 16 }
 0x449   : > { %v9711_v51 = vpop.f32.mrb[10].mxu0 }
 0x44a   : > { %v9713_v57 = vpop.f32.mrb[11].mxu0 }
 0x44e   : > { %v9715_v55 = vpop.f32.mrb[8].mxu1 }
 0x44f   : > { %v9717_v44 = vpop.f32.mrb[9].mxu1 }
 0x48e   : > { %v1348_v3 = vpop.xlane.xlu1 %1347  ;;  %v1333_v15 = vpop.xlane.xlu0 %1332 }
 0x48f   : > { %v1349_v12 = vcvt.f32.s32 %v1348_v3  ;;  %v1334_v26 = vcvt.f32.s32 %v1333_v15 }
 0x491   : > { %v1352_v5 = vadd.s32 %v1351_v0, %v1349_v12  ;;  %v1337_v16 = vadd.s32 %v1336_v6, %v1334_v26 }
 0x493   : > { %vm1444_vm13 = vcmp.eq.s32.totalorder %v9577_v41, %v1352_v5  ;;  %vm1443_vm14 = vcmp.eq.s32.totalorder %v9580_v42, %v1337_v16 }
 0x494   : > { %v7442_v8 = vsel %vm1444_vm13, 1.0, %v9175_v32  ;;  %v7441_v17 = vsel %vm1443_vm14, 1.0, %v9175_v32  ;;  %v9728_v39 = vsel %vm1444_vm13, 2147483647, %v9577_v41  ;;  %v9731_v20 = vsel %vm1443_vm14, 2147483647, %v9580_v42 }
 0x495   : > { %v1468_v28 = vsub.f32 %v7442_v8, %v9436_v46  ;;  %v1467_v47 = vsub.f32 %v7441_v17, %v9431_v45  ;;  %v9737_v49 = vsel %vm986_vm5, %v9728_v39, 2147483647  ;;  %v9741_v29 = vsel %vm986_vm5, %v9731_v20, 2147483647 }
 0x496   : > { %v1378_v4 = vpop.xlane.xlu1 %1377  ;;  %v1363_v41 = vpop.xlane.xlu0 %1362  ;;  %v1508_v60 = vshra.s32 %v9737_v49, 16  ;;  %v1493_v42 = vshra.s32 %v9741_v29, 16 }
 0x497   : > { %1476 = vst.msk [vmem:[#allocation2 + $0x28] sm:$0xff] %vm986_vm5, %v1468_v28  ;;  %1475 = vst.msk [vmem:[#allocation2 + $0x20] sm:$0xff] %vm986_vm5, %v1467_v47  ;;  %v1379_v22 = vcvt.f32.s32 %v1378_v4  ;;  %v1364_v33 = vcvt.f32.s32 %v1363_v41 }
 0x498   : > { %v9747_v36 = vcvt.s32.f32 %v1508_v60  ;;  %v9749_v18 = vcvt.s32.f32 %v1493_v42 }
 0x499   : > { %v1382_v43 = vadd.s32 %v1381_v27, %v1379_v22  ;;  %v1367_v63 = vadd.s32 %v1366_v40, %v1364_v33 }
 0x49a   : > { %v1408_v34 = vpop.xlane.xlu1 %1407  ;;  %v1393_v50 = vpop.xlane.xlu0 %1392  ;;  %1511 = vmin.xlane.f32.xlu1 %v9747_v36  ;;  %1496 = vmin.xlane.f32.xlu0 %v9749_v18 }
 0x49b   : > { %vm1446_vm15 = vcmp.eq.s32.totalorder %v9617_v52, %v1382_v43  ;;  %vm1445_vm1 = vcmp.eq.s32.totalorder %v9622_v19, %v1367_v63  ;;  %v1409_v24 = vcvt.f32.s32 %v1408_v34  ;;  %v1394_v2 = vcvt.f32.s32 %v1393_v50 }
 0x49c   : > { %v7444_v3 = vsel %vm1446_vm15, 1.0, %v9175_v32  ;;  %v7443_v15 = vsel %vm1445_vm1, 1.0, %v9175_v32  ;;  %v9758_v0 = vsel %vm1446_vm15, 2147483647, %v9617_v52  ;;  %v9761_v6 = vsel %vm1445_vm1, 2147483647, %v9622_v19 }
 0x49d   : > { %v1470_v12 = vsub.f32 %v7444_v3, %v9436_v46  ;;  %v1469_v26 = vsub.f32 %v7443_v15, %v9431_v45  ;;  %v1412_v5 = vadd.s32 %v1411_v1, %v1409_v24  ;;  %v1397_v16 = vadd.s32 %v1396_v10, %v1394_v2 }
 0x49e   : > { %v1438_v37 = vpop.xlane.xlu1 %1437  ;;  %v1423_v38 = vpop.xlane.xlu0 %1422  ;;  %v9767_v21 = vsel %vm986_vm5, %v9758_v0, 2147483647  ;;  %v9771_v13 = vsel %vm986_vm5, %v9761_v6, 2147483647  ;;  %v1655_v52 = vld [vmem:[#allocation2 + $0x20] sm:$0xff]  ;;  %v1656_v8 = vld [vmem:[#allocation2 + $0x28] sm:$0xff] }
 0x49f   : > { %1478 = vst.msk [vmem:[#allocation2 + $0x68] sm:$0xff] %vm986_vm5, %v1470_v12  ;;  %1477 = vst.msk [vmem:[#allocation2 + $0x60] sm:$0xff] %vm986_vm5, %v1469_v26  ;;  %vm1448_vm6 = vcmp.eq.s32.totalorder %v9650_v58, %v1412_v5  ;;  %vm1447_vm7 = vcmp.eq.s32.totalorder %v9655_v54, %v1397_v16  ;;  %v1439_v19 = vcvt.f32.s32 %v1438_v37  ;;  %v1424_v17 = vcvt.f32.s32 %v1423_v38  ;;  %8284 = vmatprep.mubr.msk.f32.mxu0 %vm986_vm5, %v1655_v52 }
 0x4a0   : > { %v7446_v28 = vsel %vm1448_vm6, 1.0, %v9175_v32  ;;  %v7445_v47 = vsel %vm1447_vm7, 1.0, %v9175_v32  ;;  %v1538_v30 = vshra.s32 %v9767_v21, 16  ;;  %v1523_v23 = vshra.s32 %v9771_v13, 16  ;;  %8285 = vmatmul.mubr.msk.f32.gmra.mrb[12].mxu0 %vm986_vm5, %v1656_v8 }
 0x4a1   : > { %v1472_v4 = vsub.f32 %v7446_v28, %v9436_v46  ;;  %v1471_v41 = vsub.f32 %v7445_v47, %v9431_v45  ;;  %v1442_v60 = vadd.s32 %v1441_v11, %v1439_v19  ;;  %v1427_v42 = vadd.s32 %v1426_v31, %v1424_v17 }
 0x4a2   : > { %v1540_v27 = vcvt.s32.f32 %v1538_v30  ;;  %v1525_v40 = vcvt.s32.f32 %v1523_v23  ;;  %v9792_v22 = vsel %vm1448_vm6, 2147483647, %v9650_v58  ;;  %v9797_v33 = vsel %vm1447_vm7, 2147483647, %v9655_v54 }
 0x4a3   : > { %1480 = vst.msk [vmem:[#allocation2 + $0xa8] sm:$0xff] %vm986_vm5, %v1472_v4  ;;  %1479 = vst.msk [vmem:[#allocation2 + $0xa0] sm:$0xff] %vm986_vm5, %v1471_v41  ;;  %vm1450_vm8 = vcmp.eq.s32.totalorder %v9677_v56, %v1442_v60  ;;  %vm1449_vm9 = vcmp.eq.s32.totalorder %v9682_v59, %v1427_v42  ;;  %v1566_v43 = vsel %vm986_vm5, %v9792_v22, 2147483647  ;;  %v1551_v58 = vsel %vm986_vm5, %v9797_v33, 2147483647 }
 0x4a4   : > { %v7448_v63 = vsel %vm1450_vm8, 1.0, %v9175_v32  ;;  %v7447_v1 = vsel %vm1449_vm9, 1.0, %v9175_v32  ;;  %1541 = vmin.xlane.f32.xlu1 %v1540_v27  ;;  %1526 = vmin.xlane.f32.xlu0 %v1525_v40  ;;  %v1568_v54 = vshra.s32 %v1566_v43, 16  ;;  %v1553_v10 = vshra.s32 %v1551_v58, 16 }
 0x4a5   : > { %v1474_v11 = vsub.f32 %v7448_v63, %v9436_v46  ;;  %v1473_v31 = vsub.f32 %v7447_v1, %v9431_v45  ;;  %v9812_v34 = vsel %vm1450_vm8, 2147483647, %v9677_v56  ;;  %v9815_v50 = vsel %vm1449_vm9, 2147483647, %v9682_v59 }
 0x4a6   : > { %v1570_v24 = vcvt.s32.f32 %v1568_v54  ;;  %v1555_v2 = vcvt.s32.f32 %v1553_v10  ;;  %v1663_v3 = vld [vmem:[#allocation2 + $0x60] sm:$0xff]  ;;  %v1664_v15 = vld [vmem:[#allocation2 + $0x68] sm:$0xff]  ;;  %v1596_v12 = vsel %vm986_vm5, %v9812_v34, 2147483647  ;;  %v1581_v26 = vsel %vm986_vm5, %v9815_v50, 2147483647 }
 0x4a7   : > { %1482 = vst.msk [vmem:[#allocation2 + $0xe8] sm:$0xff] %vm986_vm5, %v1474_v11  ;;  %1481 = vst.msk [vmem:[#allocation2 + $0xe0] sm:$0xff] %vm986_vm5, %v1473_v31  ;;  %8300 = vmatprep.mubr.msk.f32.mxu1 %vm986_vm5, %v1663_v3  ;;  %v1598_v56 = vshra.s32 %v1596_v12, 16  ;;  %v1583_v5 = vshra.s32 %v1581_v26, 16  ;;  %v1507_v37 = vand.u32 65535, %v9737_v49  ;;  %v1492_v38 = vand.u32 65535, %v9741_v29 }
 0x4a8   : > { %1571 = vmin.xlane.f32.xlu1 %v1570_v24  ;;  %1556 = vmin.xlane.f32.xlu0 %v1555_v2  ;;  %v1537_v30 = vand.u32 65535, %v9767_v21  ;;  %v1522_v23 = vand.u32 65535, %v9771_v13  ;;  %v1567_v60 = vand.u32 65535, %v1566_v43  ;;  %v1552_v42 = vand.u32 65535, %v1551_v58 }
 0x4a9   : > { %8301 = vmatmul.mubr.msk.f32.gmra.mrb[10].mxu1 %vm986_vm5, %v1664_v15  ;;  %v1600_v59 = vcvt.s32.f32 %v1598_v56  ;;  %v1585_v16 = vcvt.s32.f32 %v1583_v5  ;;  %v1509_v19 = vcvt.s32.f32 %v1507_v37  ;;  %v1494_v17 = vcvt.s32.f32 %v1492_v38 }
 0x4aa   : > { %v1539_v29 = vcvt.s32.f32 %v1537_v30  ;;  %v1524_v41 = vcvt.s32.f32 %v1522_v23  ;;  %v1569_v1 = vcvt.s32.f32 %v1567_v60  ;;  %v1554_v13 = vcvt.s32.f32 %v1552_v42 }
 0x4ab   : > { %v1597_v54 = vand.u32 65535, %v1596_v12  ;;  %v1582_v10 = vand.u32 65535, %v1581_v26  ;;  %vm2203_vm7 = vcmask 1043456  }
 0x4ac   : > { %1601 = vmin.xlane.f32.xlu1 %v1600_v59  ;;  %1586 = vmin.xlane.f32.xlu0 %v1585_v16 }
 0x4ad   : > { %v1584_v58 = vcvt.s32.f32 %v1582_v10 }
 0x527   : > { %v1512_v52 = vpop.xlane.xlu1 %1511  ;;  %v1497_v8 = vpop.xlane.xlu0 %1496 }
 0x528   : > { %vm1513_vm10 = vcmp.eq.f32.partialorder %v9747_v36, %v1512_v52  ;;  %vm1498_vm11 = vcmp.eq.f32.partialorder %v9749_v18, %v1497_v8  ;;  %v1518_v5 = vcvt.f32.s32 %v1512_v52 }
 0x529   : > { %v1514_v28 = vsel %vm1513_vm10, %v1509_v19, inf  ;;  %v1499_v47 = vsel %vm1498_vm11, %v1494_v17, inf }
 0x52a   : > { %1515 = vmin.xlane.f32.xlu1 %v1514_v28  ;;  %1500 = vmin.xlane.f32.xlu0 %v1499_v47  ;;  %v1519_v38 = vshll.u32 %v1518_v5, 16 }
 0x531   : > { %v9831_v4 = vpop.xlane.xlu1 %1541  ;;  %v9833_v49 = vpop.xlane.xlu0 %1526 }
 0x532   : > { %vm1543_vm12 = vcmp.eq.f32.partialorder %v1540_v27, %v9831_v4  ;;  %vm1528_vm13 = vcmp.eq.f32.partialorder %v1525_v40, %v9833_v49  ;;  %v1599_v40 = vcvt.s32.f32 %v1597_v54  ;;  %v1533_v52 = vcvt.f32.s32 %v9833_v49 }
 0x533   : > { %v1544_v36 = vsel %vm1543_vm12, %v1539_v29, inf  ;;  %v1529_v18 = vsel %vm1528_vm13, %v1524_v41, inf  ;;  %v1548_v41 = vcvt.f32.s32 %v9831_v4 }
 0x534   : > { %1545 = vmin.xlane.f32.xlu1 %v1544_v36  ;;  %1530 = vmin.xlane.f32.xlu0 %v1529_v18 }
 0x535   : > { %v1572_v63 = vpop.xlane.xlu1 %1571  ;;  %v1557_v21 = vpop.xlane.xlu0 %1556  ;;  %v1549_v18 = vshll.u32 %v1548_v41, 16 }
 0x536   : > { %vm1573_vm14 = vcmp.eq.f32.partialorder %v1570_v24, %v1572_v63  ;;  %vm1558_vm15 = vcmp.eq.f32.partialorder %v1555_v2, %v1557_v21  ;;  %v9846_v24 = vld [vmem:[%s11183_s1 + $0x8] sm:$0xff]  ;;  %v1578_v42 = vcvt.f32.s32 %v1572_v63 }
 0x537   : > { %v1574_v11 = vsel %vm1573_vm14, %v1569_v1, inf  ;;  %v1559_v31 = vsel %vm1558_vm15, %v1554_v13, inf  ;;  %8352 = vmatprep.subr.msk.mxu1 %vm2203_vm7, %v9846_v24  ;;  %v1534_v1 = vshll.u32 %v1533_v52, 16 }
 0x538   : > { %1575 = vmin.xlane.f32.xlu1 %v1574_v11  ;;  %1560 = vmin.xlane.f32.xlu0 %v1559_v31  ;;  %v1579_v11 = vshll.u32 %v1578_v42, 16  ;;  %v1660_v42 = vld [vmem:[#allocation2 + $0x48] sm:$0xff] }
 0x539   : > { %v9837_v43 = vpop.xlane.xlu1 %1601  ;;  %v9839_v27 = vpop.xlane.xlu0 %1586 }
 0x53a   : > { %vm1603_vm1 = vcmp.eq.f32.partialorder %v1600_v59, %v9837_v43  ;;  %vm1588_vm6 = vcmp.eq.f32.partialorder %v1585_v16, %v9839_v27  ;;  %v1503_v59 = vcvt.f32.s32 %v1497_v8  ;;  %v1608_v31 = vcvt.f32.s32 %v9837_v43 }
 0x53b   : > { %v1604_v3 = vsel %vm1603_vm1, %v1599_v40, inf  ;;  %v1589_v15 = vsel %vm1588_vm6, %v1584_v58, inf  ;;  %v1593_v40 = vcvt.f32.s32 %v9839_v27 }
 0x53c   : > { %1605 = vmin.xlane.f32.xlu1 %v1604_v3  ;;  %1590 = vmin.xlane.f32.xlu0 %v1589_v15  ;;  %v1504_v19 = vshll.u32 %v1503_v59, 16 }
 0x573   : > { %v9850_v2 = vpop.f32.mrb[12].mxu0 }
 0x574   : > { %v9852_v12 = vpop.f32.mrb[13].mxu0 }
 0x57c   : > { %v9854_v26 = vpop.f32.mrb[10].mxu1 }
 0x57d   : > { %v9856_v56 = vpop.f32.mrb[11].mxu1 }
 0x5b7   : > { %v1516_v16 = vpop.xlane.xlu1 %1515  ;;  %v1501_v37 = vpop.xlane.xlu0 %1500 }
 0x5b8   : > { %v1517_v17 = vcvt.f32.s32 %v1516_v16  ;;  %v1502_v28 = vcvt.f32.s32 %v1501_v37 }
 0x5ba   : > { %v1520_v47 = vadd.s32 %v1519_v38, %v1517_v17  ;;  %v1505_v30 = vadd.s32 %v1504_v19, %v1502_v28  ;;  %v1609_v19 = vshll.u32 %v1608_v31, 16  ;;  %v1659_v28 = vld [vmem:[#allocation2 + $0x40] sm:$0xff] }
 0x5bc   : > { %vm1612_vm8 = vcmp.eq.s32.totalorder %v9728_v39, %v1520_v47  ;;  %vm1611_vm9 = vcmp.eq.s32.totalorder %v9731_v20, %v1505_v30  ;;  %v1563_v39 = vcvt.f32.s32 %v1557_v21 }
 0x5bd   : > { %v7450_v23 = vsel %vm1612_vm8, 1.0, %v9175_v32  ;;  %v7449_v29 = vsel %vm1611_vm9, 1.0, %v9175_v32 }
 0x5be   : > { %v1636_v8 = vsub.f32 %v7450_v23, %v9436_v46  ;;  %v1635_v60 = vsub.f32 %v7449_v29, %v9431_v45  ;;  %v1564_v49 = vshll.u32 %v1563_v39, 16 }
 0x5c0   : > { %1644 = vst.msk [vmem:[#allocation2 + $0x38] sm:$0xff] %vm986_vm5, %v1636_v8  ;;  %1643 = vst.msk [vmem:[#allocation2 + $0x30] sm:$0xff] %vm986_vm5, %v1635_v60 }
 0x5c1   : > { %v1546_v36 = vpop.xlane.xlu1 %1545  ;;  %v1531_v20 = vpop.xlane.xlu0 %1530 }
 0x5c2   : > { %v1547_v13 = vcvt.f32.s32 %v1546_v36  ;;  %v1532_v54 = vcvt.f32.s32 %v1531_v20 }
 0x5c4   : > { %v1550_v10 = vadd.s32 %v1549_v18, %v1547_v13  ;;  %v1535_v4 = vadd.s32 %v1534_v1, %v1532_v54  ;;  %v1668_v1 = vld [vmem:[#allocation2 + $0x88] sm:$0xff] }
 0x5c5   : > { %v1576_v58 = vpop.xlane.xlu1 %1575  ;;  %v1561_v3 = vpop.xlane.xlu0 %1560 }
 0x5c6   : > { %vm1614_vm10 = vcmp.eq.s32.totalorder %v9758_v0, %v1550_v10  ;;  %vm1613_vm11 = vcmp.eq.s32.totalorder %v9761_v6, %v1535_v4  ;;  %v1577_v63 = vcvt.f32.s32 %v1576_v58  ;;  %v1562_v21 = vcvt.f32.s32 %v1561_v3  ;;  %v1671_v10 = vld [vmem:[#allocation2 + $0xa0] sm:$0xff]  ;;  %v1676_v4 = vld [vmem:[#allocation2 + $0xc8] sm:$0xff] }
 0x5c7   : > { %v7452_v15 = vsel %vm1614_vm10, 1.0, %v9175_v32  ;;  %v7451_v5 = vsel %vm1613_vm11, 1.0, %v9175_v32  ;;  %v1657_v59 = vld [vmem:[#allocation2 + $0x30] sm:$0xff]  ;;  %v1658_v16 = vld [vmem:[#allocation2 + $0x38] sm:$0xff]  ;;  %v1594_v0 = vshll.u32 %v1593_v40, 16  ;;  %v1679_v58 = vld [vmem:[#allocation2 + $0xe0] sm:$0xff] }
 0x5c8   : > { %v1638_v37 = vsub.f32 %v7452_v15, %v9436_v46  ;;  %v1637_v43 = vsub.f32 %v7451_v5, %v9431_v45  ;;  %v1580_v38 = vadd.s32 %v1579_v11, %v1577_v63  ;;  %v1565_v27 = vadd.s32 %v1564_v49, %v1562_v21  ;;  %8287 = vmatprep.mubr.msk.f32.mxu0 %vm986_vm5, %v1657_v59  ;;  %v1677_v11 = vld [vmem:[#allocation2 + $0xd0] sm:$0xff]  ;;  %v1672_v49 = vld [vmem:[#allocation2 + $0xa8] sm:$0xff]  ;;  %v1678_v40 = vld [vmem:[#allocation2 + $0xd8] sm:$0xff] }
 0x5c9   : > { %v1606_v17 = vpop.xlane.xlu1 %1605  ;;  %v1591_v6 = vpop.xlane.xlu0 %1590  ;;  %8288 = vmatmul.mubr.msk.f32.gmra.mrb[14].mxu0 %vm986_vm5, %v1658_v16  ;;  %v1680_v63 = vld [vmem:[#allocation2 + $0xe8] sm:$0xff]  ;;  %v9103_v59 = vld [vmem:[%s9256_s5 + $0x10] sm:$0xff]  ;;  %v9104_v16 = vld [vmem:[%s9256_s5 + $0x18] sm:$0xff] }
 0x5ca   : > { %1646 = vst.msk [vmem:[#allocation2 + $0x78] sm:$0xff] %vm986_vm5, %v1638_v37  ;;  %1645 = vst.msk [vmem:[#allocation2 + $0x70] sm:$0xff] %vm986_vm5, %v1637_v43  ;;  %vm1616_vm12 = vcmp.eq.s32.totalorder %v9792_v22, %v1580_v38  ;;  %vm1615_vm13 = vcmp.eq.s32.totalorder %v9797_v33, %v1565_v27  ;;  %v1607_v47 = vcvt.f32.s32 %v1606_v17  ;;  %v1592_v30 = vcvt.f32.s32 %v1591_v6  ;;  %8294 = vmatprep.mubr.msk.f32.mxu0 %vm986_vm5, %v1659_v28  ;;  %v209_v22 = vld [vmem:[%s11183_s1] sm:$0xff]  ;;  %v9102_v15 = vld [vmem:[%s9256_s5 + $0x8] sm:$0xff] }
 0x5cb   : > { %v7454_v23 = vsel %vm1616_vm12, 1.0, %v9175_v32  ;;  %v7453_v29 = vsel %vm1615_vm13, 1.0, %v9175_v32  ;;  %v1667_v33 = vld [vmem:[#allocation2 + $0x80] sm:$0xff]  ;;  %v9106_v43 = vld [vmem:[%s9256_s5 + $0x28] sm:$0xff]  ;;  %v9107_v38 = vld [vmem:[%s9256_s5 + $0x30] sm:$0xff] }
 0x5cc   : > { %v1640_v41 = vsub.f32 %v7454_v23, %v9436_v46  ;;  %v1639_v52 = vsub.f32 %v7453_v29, %v9431_v45  ;;  %v1610_v8 = vadd.s32 %v1609_v19, %v1607_v47  ;;  %v1595_v60 = vadd.s32 %v1594_v0, %v1592_v30  ;;  %v9105_v37 = vld [vmem:[%s9256_s5 + $0x20] sm:$0xff] }
 0x5cd   : > { %8295 = vmatmul.mubr.msk.f32.vlgmr.msra.gmra.mrb[16].mxu0 %vm986_vm5, %v1660_v42 }
 0x5ce   : > { %1648 = vst.msk [vmem:[#allocation2 + $0xb8] sm:$0xff] %vm986_vm5, %v1640_v41  ;;  %1647 = vst.msk [vmem:[#allocation2 + $0xb0] sm:$0xff] %vm986_vm5, %v1639_v52  ;;  %vm1618_vm14 = vcmp.eq.s32.totalorder %v9812_v34, %v1610_v8  ;;  %vm1617_vm15 = vcmp.eq.s32.totalorder %v9815_v50, %v1595_v60  ;;  %8932 = vmatpush3.bf16.msra.mxu0 %v9276_v9  ;;  %8310 = vmatprep.mubr.msk.f32.mxu0 %vm986_vm5, %v1667_v33  ;;  %v1669_v34 = vld [vmem:[#allocation2 + $0x90] sm:$0xff]  ;;  %v1675_v9 = vld [vmem:[#allocation2 + $0xc0] sm:$0xff] }
 0x5cf   : > { %v7456_v39 = vsel %vm1618_vm14, 1.0, %v9175_v32  ;;  %v7455_v36 = vsel %vm1617_vm15, 1.0, %v9175_v32  ;;  %8338 = vmatprep.subr.msk.mxu0 %vm2203_vm7, %v209_v22  ;;  %v1670_v50 = vld [vmem:[#allocation2 + $0x98] sm:$0xff] }
 0x5d0   : > { %v1642_v20 = vsub.f32 %v7456_v39, %v9436_v46  ;;  %v1641_v18 = vsub.f32 %v7455_v36, %v9431_v45 }
 0x5d1   : > { %v1665_v13 = vld [vmem:[#allocation2 + $0x70] sm:$0xff]  ;;  %v1666_v54 = vld [vmem:[#allocation2 + $0x78] sm:$0xff]  ;;  %8311 = vmatmul.mubr.msk.f32.vlgmr.msra.gmra.mrb[18].mxu0 %vm986_vm5, %v1668_v1 }
 0x5d2   : > { %1650 = vst.msk [vmem:[#allocation2 + $0xf8] sm:$0xff] %vm986_vm5, %v1642_v20  ;;  %1649 = vst.msk [vmem:[#allocation2 + $0xf0] sm:$0xff] %vm986_vm5, %v1641_v18  ;;  %8303 = vmatprep.mubr.msk.f32.mxu1 %vm986_vm5, %v1665_v13  ;;  %8313 = vmatprep.mubr.msk.f32.mxu0 %vm986_vm5, %v1669_v34 }
 0x5d3   : > { %8304 = vmatmul.mubr.msk.f32.gmra.mrb[12].mxu1 %vm986_vm5, %v1666_v54  ;;  %8339 = vmatpush3.msk.msra.mxu0 %vm2203_vm7, %v209_v22 }
 0x5d4   : > { %8326 = vmatprep.mubr.msk.f32.mxu1 %vm986_vm5, %v1675_v9 }
 0x5d5   : > { %8314 = vmatmul.mubr.msk.f32.gmra.mrb[20].mxu0 %vm986_vm5, %v1670_v50  ;;  %v1673_v31 = vld [vmem:[#allocation2 + $0xb0] sm:$0xff]  ;;  %v1674_v3 = vld [vmem:[#allocation2 + $0xb8] sm:$0xff] }
 0x5d6   : > { %8316 = vmatprep.mubr.msk.f32.mxu0 %vm986_vm5, %v1671_v10 }
 0x5d7   : > { %8327 = vmatmul.mubr.msk.f32.vlgmr.msra.gmra.mrb[14].mxu1 %vm986_vm5, %v1676_v4 }
 0x5d8   : > { %8329 = vmatprep.mubr.msk.f32.mxu1 %vm986_vm5, %v1677_v11  ;;  %8353 = vmatpush3.msk.msra.mxu1 %vm2203_vm7, %v9846_v24  ;;  %v9101_v24 = vld [vmem:[%s9256_s5] sm:$0xff] }
 0x5d9   : > { %8317 = vmatmul.mubr.msk.f32.gmra.mrb[22].mxu0 %vm986_vm5, %v1672_v49  ;;  %v1681_v21 = vld [vmem:[#allocation2 + $0xf0] sm:$0xff]  ;;  %v1682_v5 = vld [vmem:[#allocation2 + $0xf8] sm:$0xff] }
 0x5da   : > { %8319 = vmatprep.mubr.msk.f32.mxu0 %vm986_vm5, %v1673_v31 }
 0x5db   : > { %8330 = vmatmul.mubr.msk.f32.gmra.mrb[16].mxu1 %vm986_vm5, %v1678_v40 }
 0x5dc   : > { %8332 = vmatprep.mubr.msk.f32.mxu1 %vm986_vm5, %v1679_v58 }
 0x5dd   : > { %8320 = vmatmul.mubr.msk.f32.gmra.mrb[24].mxu0 %vm986_vm5, %v1674_v3 }
 0x5de   : > { %8340 = vmatprep.mubr.msk.f32.mxu0 %vm229_vm0, %v9101_v24 }
 0x5df   : > { %8333 = vmatmul.mubr.msk.f32.gmra.mrb[18].mxu1 %vm986_vm5, %v1680_v63 }
 0x5e0   : > { %8335 = vmatprep.mubr.msk.f32.mxu1 %vm986_vm5, %v1681_v21 }
 0x5e1   : > { %8341 = vmatmul.mubr.msk.f32.vlgmr.msra.gmra.mrb[26].mxu0 %vm229_vm0, %v9102_v15 }
 0x5e2   : > { %8343 = vmatprep.mubr.msk.f32.mxu0 %vm229_vm0, %v9103_v59 }
 0x5e3   : > { %8336 = vmatmul.mubr.msk.f32.gmra.mrb[20].mxu1 %vm986_vm5, %v1682_v5 }
 0x5e4   : > { %8354 = vmatprep.mubr.msk.f32.mxu1 %vm229_vm0, %v9570_v62  ;;  %v9108_v62 = vld [vmem:[%s9256_s5 + $0x38] sm:$0xff]  ;;  %s9113_s5 = sshll.u32 %s9178_s19, 4  ;;  %s9114_s5 = int_to_ptr.vmem [resolvable:$false] %s9113_s5 }
 0x5e5   : > { %8344 = vmatmul.mubr.msk.f32.gmra.mrb[28].mxu0 %vm229_vm0, %v9104_v16  ;;  %s9115_s6 = scalar_lea.vmem %s9114_s5, 128  ;;  %p9116_p0 = scmp.lt.s32.totalorder %s11142_s22, %s9114_s5 }
 0x5e6   : > { %8346 = vmatprep.mubr.msk.f32.mxu0 %vm229_vm0, %v9105_v37  ;;  %p9117_p1 = scmp.lt.s32.totalorder %s9115_s6, %s9109_s30 }
 0x5e7   : > { %8355 = vmatmul.mubr.msk.f32.vlgmr.msra.gmra.mrb[22].mxu1 %vm229_vm0, %v9568_v61  ;;  %v212_v61 = vld [vmem:[%s11183_s1 + $0x18] sm:$0xff] }
 0x5e8   : > { %8357 = vmatprep.mubr.msk.f32.mxu1 %vm229_vm0, %v9713_v57  ;;  %v213_v57 = vld [vmem:[%s11183_s1 + $0x20] sm:$0xff]  ;;  %p9118_p2 = por %p9117_p1, %p9116_p0 }
 0x5e9   : > { %8347 = vmatmul.mubr.msk.f32.gmra.mrb[30].mxu0 %vm229_vm0, %v9106_v43  ;;  %v8937_v27 = vpack.c.bf16 %v213_v57, %v212_v61  ;;  %v215_v61 = vld [vmem:[%s11183_s1 + $0x30] sm:$0xff]  ;;  %v216_v57 = vld [vmem:[%s11183_s1 + $0x38] sm:$0xff] }
 0x5ea   : > { %8349 = vmatprep.mubr.msk.f32.mxu0 %vm229_vm0, %v9107_v38  ;;  %p9119_p3 = pnand %p9118_p2, %p9112_p13 }
 0x5eb   : > { %8358 = vmatmul.mubr.msk.f32.gmra.mrb[24].mxu1 %vm229_vm0, %v9711_v51  ;;  %8938 = vmatprep.subr.bf16.mxu0 %v8937_v27 }
 0x5ec   : > { %8360 = vmatprep.mubr.msk.f32.mxu1 %vm229_vm0, %v9852_v12  ;;  %8940 = vmatpush3.bf16.msra.mxu0 %v8937_v27  ;;  %v8941_v27 = vpack.c.bf16 %v216_v57, %v215_v61 }
 0x5ed   : > { %8350 = vmatmul.mubr.msk.f32.gmra.mrb[32].mxu0 %vm229_vm0, %v9108_v62 }
 0x5ee   : > { %8942 = vmatprep.subr.bf16.mxu1 %v8941_v27 }
 0x5ef   : > { %8361 = vmatmul.mubr.msk.f32.gmra.mrb[26].mxu1 %vm229_vm0, %v9850_v2 }
 0x5f0   : > { %8944 = vmatpush3.bf16.msra.mxu1 %v8941_v27 }
 0x5f1   : > { %8977 = vmatprep.subr.bf16.mxu1 %v9173_v25 }
 0x69c   : > { %v8289_v51 = vpop.f32.mrb[14].mxu0 }
 0x69d   : > { %v1803_v19 = vpop.f32.mrb[15].mxu0 }
 0x69e   : > { %8363 = vmatprep.mubr.msk.f32.mxu1 %vm229_vm0, %v1803_v19 }
 0x69f   : > { %8364 = vmatmul.mubr.msk.f32.gmra.mrb[28].mxu1 %vm229_vm0, %v8289_v51 }
 0x6a0   : > { %v8296_v12 = vpop.f32.mrb[16].mxu0 }
 0x6a1   : > { %v1902_v0 = vpop.f32.mrb[17].mxu0 }
 0x6a2   : > { %8366 = vmatprep.mubr.msk.f32.mxu1 %vm229_vm0, %v1902_v0 }
 0x6a3   : > { %8367 = vmatmul.mubr.msk.f32.gmra.mrb[30].mxu1 %vm229_vm0, %v8296_v12 }
 0x6a4   : > { %v8312_v2 = vpop.f32.mrb[18].mxu0  ;;  %8369 = vmatprep.mubr.msk.f32.mxu1 %vm229_vm0, %v9717_v44 }
 0x6a5   : > { %v2031_v17 = vpop.f32.mrb[19].mxu0 }
 0x6a6   : > { %v8305_v6 = vpop.f32.mrb[12].mxu1 }
 0x6a7   : > { %v1932_v28 = vpop.f32.mrb[13].mxu1  ;;  %8370 = vmatmul.mubr.msk.f32.gmra.mrb[32].mxu1 %vm229_vm0, %v9715_v55  ;;  %v211_v55 = vld [vmem:[%s11183_s1 + $0x10] sm:$0xff] }
 0x6a8   : > { %v8315_v47 = vpop.f32.mrb[20].mxu0  ;;  %8372 = vmatprep.mubr.msk.f32.mxu1 %vm229_vm0, %v9856_v56 }
 0x6a9   : > { %v2041_v30 = vpop.f32.mrb[21].mxu0 }
 0x6aa   : > { %v8328_v23 = vpop.f32.mrb[14].mxu1 }
 0x6ab   : > { %v2160_v29 = vpop.f32.mrb[15].mxu1  ;;  %8373 = vmatmul.mubr.msk.f32.gmra.mrb[34].mxu1 %vm229_vm0, %v9854_v26  ;;  %v9978_v26 = vrot.slane %v211_v55, %v9354_v48 }
 0x6ac   : > { %v8318_v41 = vpop.f32.mrb[22].mxu0  ;;  %8375 = vmatprep.mubr.msk.f32.mxu1 %vm229_vm0, %v1932_v28 }
 0x6ad   : > { %v2051_v44 = vpop.f32.mrb[23].mxu0 }
 0x6ae   : > { %v8331_v52 = vpop.f32.mrb[16].mxu1 }
 0x6af   : > { %v2170_v8 = vpop.f32.mrb[17].mxu1  ;;  %8376 = vmatmul.mubr.msk.f32.gmra.mrb[36].mxu1 %vm229_vm0, %v8305_v6 }
 0x6b0   : > { %v8321_v60 = vpop.f32.mrb[24].mxu0  ;;  %8378 = vmatprep.mubr.msk.f32.mxu1 %vm229_vm0, %v2031_v17 }
 0x6b1   : > { %v2061_v56 = vpop.f32.mrb[25].mxu0 }
 0x6b2   : > { %v8334_v42 = vpop.f32.mrb[18].mxu1 }
 0x6b3   : > { %v2180_v22 = vpop.f32.mrb[19].mxu1  ;;  %8379 = vmatmul.mubr.msk.f32.gmra.mrb[38].mxu1 %vm229_vm0, %v8312_v2 }
 0x6b4   : > { %v8342_v33 = vpop.f32.mrb[26].mxu0  ;;  %8381 = vmatprep.mubr.msk.f32.mxu1 %vm229_vm0, %v2041_v30 }
 0x6b5   : > { %v2273_v39 = vpop.f32.mrb[27].mxu0  ;;  %v2279_v18 = vadd.f32 %v8342_v33, %v9978_v26 }
 0x6b6   : > { %v8337_v36 = vpop.f32.mrb[20].mxu1  ;;  %v2274_v1 = vadd.f32 %v2273_v39, %v9978_v26 }
 0x6b7   : > { %v2190_v20 = vpop.f32.mrb[21].mxu1  ;;  %8382 = vmatmul.mubr.msk.f32.gmra.mrb[40].mxu1 %vm229_vm0, %v8315_v47 }
 0x6b8   : > { %8384 = vmatprep.mubr.msk.f32.mxu1 %vm229_vm0, %v2051_v44  ;;  %v8345_v59 = vpop.f32.mrb[28].mxu0 }
 0x6b9   : > { %v2283_v16 = vpop.f32.mrb[29].mxu0  ;;  %v2289_v12 = vadd.f32 %v8345_v59, %v9978_v26 }
 0x6ba   : > { %v8356_v13 = vpop.f32.mrb[22].mxu1  ;;  %v2284_v17 = vadd.f32 %v2283_v16, %v9978_v26  ;;  %v214_v16 = vld [vmem:[%s11183_s1 + $0x28] sm:$0xff] }
 0x6bb   : > { %v2637_v54 = vadd.f32 %v8356_v13, %v2279_v18  ;;  %v2477_v34 = vpop.f32.mrb[23].mxu1  ;;  %8385 = vmatmul.mubr.msk.f32.gmra.mrb[42].mxu1 %vm229_vm0, %v8318_v41  ;;  %v10034_v27 = vrot.slane %v214_v16, %v9354_v48 }
 0x6bc   : > { %v2636_v9 = vadd.f32 %v2477_v34, %v2274_v1  ;;  %8387 = vmatprep.mubr.msk.f32.mxu1 %vm229_vm0, %v2061_v56  ;;  %v8348_v37 = vpop.f32.mrb[30].mxu0 }
 0x6bd   : > { %v2669_v4 = vmax.f32 %v2637_v54, 0.0  ;;  %v2293_v43 = vpop.f32.mrb[31].mxu0  ;;  %v2299_v34 = vadd.f32 %v8348_v37, %v9978_v26 }
 0x6be   : > { %v2668_v50 = vmax.f32 %v2636_v9, 0.0  ;;  %v8359_v10 = vpop.f32.mrb[24].mxu1 }
 0x6bf   : > { %v2639_v11 = vadd.f32 %v8359_v10, %v2279_v18  ;;  %v2487_v49 = vpop.f32.mrb[25].mxu1  ;;  %8388 = vmatmul.mubr.msk.f32.gmra.mrb[44].mxu1 %vm229_vm0, %v8321_v60 }
 0x6c0   : > { %v2638_v31 = vadd.f32 %v2487_v49, %v2274_v1  ;;  %8406 = vmatprep.mubr.msk.f32.mxu0 %vm986_vm5, %v2668_v50  ;;  %8390 = vmatprep.mubr.msk.f32.mxu1 %vm229_vm0, %v2160_v29  ;;  %v10002_v38 = vpop.f32.mrb[32].mxu0  ;;  %v2294_v50 = vadd.f32 %v2293_v43, %v9978_v26 }
 0x6c1   : > { %8407 = vmatmul.mubr.msk.f32.vlgmr.msra.gmra.mrb[34].mxu0 %vm986_vm5, %v2669_v4  ;;  %v2671_v3 = vmax.f32 %v2639_v11, 0.0  ;;  %v10004_v62 = vpop.f32.mrb[33].mxu0 }
 0x6c2   : > { %v2670_v40 = vmax.f32 %v2638_v31, 0.0  ;;  %v8362_v58 = vpop.f32.mrb[26].mxu1 }
 0x6c3   : > { %v2641_v63 = vadd.f32 %v8362_v58, %v2279_v18  ;;  %v2497_v24 = vpop.f32.mrb[27].mxu1  ;;  %8391 = vmatmul.mubr.msk.f32.gmra.mrb[46].mxu1 %vm229_vm0, %v8328_v23 }
 0x6c4   : > { %v2640_v21 = vadd.f32 %v2497_v24, %v2274_v1  ;;  %8409 = vmatprep.mubr.msk.f32.mxu0 %vm986_vm5, %v2670_v40  ;;  %8393 = vmatprep.mubr.msk.f32.mxu1 %vm229_vm0, %v2170_v8 }
 0x6c5   : > { %8410 = vmatmul.mubr.msk.f32.gmra.mrb[36].mxu0 %vm986_vm5, %v2671_v3  ;;  %v2673_v5 = vmax.f32 %v2641_v63, 0.0 }
 0x6c6   : > { %v2672_v15 = vmax.f32 %v2640_v21, 0.0 }
 0x6c7   : > { %8394 = vmatmul.mubr.msk.f32.gmra.mrb[48].mxu1 %vm229_vm0, %v8331_v52 }
 0x6c8   : > { %8412 = vmatprep.mubr.msk.f32.mxu0 %vm986_vm5, %v2672_v15  ;;  %8396 = vmatprep.mubr.msk.f32.mxu1 %vm229_vm0, %v2180_v22 }
 0x6c9   : > { %8413 = vmatmul.mubr.msk.f32.gmra.mrb[38].mxu0 %vm986_vm5, %v2673_v5 }
 0x6cb   : > { %8397 = vmatmul.mubr.msk.f32.gmra.mrb[50].mxu1 %vm229_vm0, %v8334_v42 }
 0x6cc   : > { %8399 = vmatprep.mubr.msk.f32.mxu1 %vm229_vm0, %v2190_v20 }
 0x6cf   : > { %8400 = vmatmul.mubr.msk.f32.gmra.mrb[52].mxu1 %vm229_vm0, %v8337_v36  ;;  %vm10185_vm0 = vmpackc.low %vm986_vm5, %vm986_vm5 }
 0x772   : > { %v8365_v51 = vpop.f32.mrb[28].mxu1 }
 0x773   : > { %v2643_v19 = vadd.f32 %v8365_v51, %v2279_v18  ;;  %v2507_v0 = vpop.f32.mrb[29].mxu1 }
 0x774   : > { %v2642_v2 = vadd.f32 %v2507_v0, %v2274_v1 }
 0x775   : > { %v2675_v47 = vmax.f32 %v2643_v19, 0.0 }
 0x776   : > { %v2674_v6 = vmax.f32 %v2642_v2, 0.0  ;;  %v8368_v28 = vpop.f32.mrb[30].mxu1 }
 0x777   : > { %v2645_v30 = vadd.f32 %v8368_v28, %v2289_v12  ;;  %v2517_v23 = vpop.f32.mrb[31].mxu1 }
 0x778   : > { %v2644_v29 = vadd.f32 %v2517_v23, %v2284_v17  ;;  %8415 = vmatprep.mubr.msk.f32.mxu0 %vm986_vm5, %v2674_v6  ;;  %v2304_v6 = vadd.f32 %v10004_v62, %v9978_v26 }
 0x779   : > { %8416 = vmatmul.mubr.msk.f32.gmra.mrb[40].mxu0 %vm986_vm5, %v2675_v47  ;;  %v2677_v52 = vmax.f32 %v2645_v30, 0.0 }
 0x77a   : > { %v2676_v41 = vmax.f32 %v2644_v29, 0.0  ;;  %v8371_v44 = vpop.f32.mrb[32].mxu1 }
 0x77b   : > { %v2647_v8 = vadd.f32 %v8371_v44, %v2289_v12  ;;  %v2527_v60 = vpop.f32.mrb[33].mxu1 }
 0x77c   : > { %v2646_v55 = vadd.f32 %v2527_v60, %v2284_v17  ;;  %8418 = vmatprep.mubr.msk.f32.mxu0 %vm986_vm5, %v2676_v41 }
 0x77d   : > { %8419 = vmatmul.mubr.msk.f32.gmra.mrb[42].mxu0 %vm986_vm5, %v2677_v52  ;;  %v2679_v22 = vmax.f32 %v2647_v8, 0.0 }
 0x77e   : > { %v2678_v56 = vmax.f32 %v2646_v55, 0.0  ;;  %v8374_v42 = vpop.f32.mrb[34].mxu1 }
 0x77f   : > { %v2649_v33 = vadd.f32 %v8374_v42, %v2289_v12  ;;  %v2537_v39 = vpop.f32.mrb[35].mxu1 }
 0x780   : > { %v2648_v36 = vadd.f32 %v2537_v39, %v2284_v17  ;;  %8421 = vmatprep.mubr.msk.f32.mxu0 %vm986_vm5, %v2678_v56 }
 0x781   : > { %8422 = vmatmul.mubr.msk.f32.gmra.mrb[44].mxu0 %vm986_vm5, %v2679_v22  ;;  %v2681_v1 = vmax.f32 %v2649_v33, 0.0 }
 0x782   : > { %v2680_v20 = vmax.f32 %v2648_v36, 0.0  ;;  %v8377_v18 = vpop.f32.mrb[36].mxu1 }
 0x783   : > { %v2651_v13 = vadd.f32 %v8377_v18, %v2289_v12  ;;  %v2547_v54 = vpop.f32.mrb[37].mxu1  ;;  %v2309_v12 = vadd.f32 %v10002_v38, %v9978_v26 }
 0x784   : > { %v2650_v9 = vadd.f32 %v2547_v54, %v2284_v17  ;;  %8424 = vmatprep.mubr.msk.f32.mxu0 %vm986_vm5, %v2680_v20 }
 0x785   : > { %8425 = vmatmul.mubr.msk.f32.gmra.mrb[46].mxu0 %vm986_vm5, %v2681_v1  ;;  %v2683_v11 = vmax.f32 %v2651_v13, 0.0 }
 0x786   : > { %v2682_v10 = vmax.f32 %v2650_v9, 0.0  ;;  %v8380_v4 = vpop.f32.mrb[38].mxu1 }
 0x787   : > { %v2653_v49 = vadd.f32 %v8380_v4, %v2299_v34  ;;  %v2557_v31 = vpop.f32.mrb[39].mxu1 }
 0x788   : > { %v2652_v40 = vadd.f32 %v2557_v31, %v2294_v50  ;;  %8427 = vmatprep.mubr.msk.f32.mxu0 %vm986_vm5, %v2682_v10 }
 0x789   : > { %8428 = vmatmul.mubr.msk.f32.gmra.mrb[48].mxu0 %vm986_vm5, %v2683_v11  ;;  %v2685_v63 = vmax.f32 %v2653_v49, 0.0 }
 0x78a   : > { %v2684_v58 = vmax.f32 %v2652_v40, 0.0  ;;  %v8383_v3 = vpop.f32.mrb[40].mxu1 }
 0x78b   : > { %v2655_v24 = vadd.f32 %v8383_v3, %v2299_v34  ;;  %v2567_v21 = vpop.f32.mrb[41].mxu1 }
 0x78c   : > { %v2654_v15 = vadd.f32 %v2567_v21, %v2294_v50  ;;  %8430 = vmatprep.mubr.msk.f32.mxu0 %vm986_vm5, %v2684_v58 }
 0x78d   : > { %8431 = vmatmul.mubr.msk.f32.gmra.mrb[50].mxu0 %vm986_vm5, %v2685_v63  ;;  %v2687_v37 = vmax.f32 %v2655_v24, 0.0 }
 0x78e   : > { %v2686_v5 = vmax.f32 %v2654_v15, 0.0  ;;  %v8386_v59 = vpop.f32.mrb[42].mxu1 }
 0x78f   : > { %v2657_v43 = vadd.f32 %v8386_v59, %v2299_v34  ;;  %v2577_v61 = vpop.f32.mrb[43].mxu1 }
 0x790   : > { %v2656_v57 = vadd.f32 %v2577_v61, %v2294_v50  ;;  %8433 = vmatprep.mubr.msk.f32.mxu0 %vm986_vm5, %v2686_v5  ;;  %v218_v61 = vld [vmem:[%s11183_s1 + $0x48] sm:$0xff] }
 0x791   : > { %8434 = vmatmul.mubr.msk.f32.gmra.mrb[52].mxu0 %vm986_vm5, %v2687_v37  ;;  %v2689_v0 = vmax.f32 %v2657_v43, 0.0 }
 0x792   : > { %v2688_v51 = vmax.f32 %v2656_v57, 0.0  ;;  %v8389_v19 = vpop.f32.mrb[44].mxu1  ;;  %v219_v57 = vld [vmem:[%s11183_s1 + $0x50] sm:$0xff] }
 0x793   : > { %v2659_v2 = vadd.f32 %v8389_v19, %v2299_v34  ;;  %v2587_v17 = vpop.f32.mrb[45].mxu1 }
 0x794   : > { %v8408_v28 = vpop.f32.mrb[34].mxu0  ;;  %v2658_v47 = vadd.f32 %v2587_v17, %v2294_v50  ;;  %8436 = vmatprep.mubr.msk.f32.mxu0 %vm986_vm5, %v2688_v51  ;;  %v8945_v51 = vpack.c.bf16 %v219_v57, %v218_v61 }
 0x795   : > { %v2872_v30 = vadd.f32 %v8408_v28, %v10034_v27  ;;  %v2866_v23 = vpop.f32.mrb[35].mxu0  ;;  %8437 = vmatmul.mubr.msk.f32.gmra.mrb[54].mxu0 %vm986_vm5, %v2689_v0  ;;  %v2691_v38 = vmax.f32 %v2659_v2, 0.0 }
 0x796   : > { %v2867_v29 = vadd.f32 %v2866_v23, %v10034_v27  ;;  %v2690_v41 = vmax.f32 %v2658_v47, 0.0  ;;  %v8392_v44 = vpop.f32.mrb[46].mxu1  ;;  %8946 = vmatprep.subr.bf16.mxu0 %v8945_v51 }
 0x797   : > { %v2661_v52 = vadd.f32 %v8392_v44, %v2309_v12  ;;  %v2597_v8 = vpop.f32.mrb[47].mxu1  ;;  %v3026_v26 = vmax.f32 %v2872_v30, 0.0  ;;  %8948 = vmatpush3.bf16.msra.mxu0 %v8945_v51 }
 0x798   : > { %v3025_v60 = vmax.f32 %v2867_v29, 0.0  ;;  %v8411_v55 = vpop.f32.mrb[36].mxu0  ;;  %v2660_v56 = vadd.f32 %v2597_v8, %v2304_v6  ;;  %8439 = vmatprep.mubr.msk.f32.mxu0 %vm986_vm5, %v2690_v41 }
 0x799   : > { %v2882_v62 = vadd.f32 %v8411_v55, %v10034_v27  ;;  %v2876_v42 = vpop.f32.mrb[37].mxu0  ;;  %8440 = vmatmul.mubr.msk.f32.gmra.mrb[56].mxu0 %vm986_vm5, %v2691_v38  ;;  %v2693_v36 = vmax.f32 %v2661_v52, 0.0 }
 0x79a   : > { %v2877_v22 = vadd.f32 %v2876_v42, %v10034_v27  ;;  %8458 = vmatprep.mubr.msk.f32.mxu1 %vm986_vm5, %v3025_v60  ;;  %v2692_v33 = vmax.f32 %v2660_v56, 0.0  ;;  %v8395_v39 = vpop.f32.mrb[48].mxu1 }
 0x79b   : > { %8459 = vmatmul.mubr.msk.f32.vlgmr.msra.gmra.mrb[54].mxu1 %vm986_vm5, %v3026_v26  ;;  %v2663_v20 = vadd.f32 %v8395_v39, %v2309_v12  ;;  %v2607_v18 = vpop.f32.mrb[49].mxu1  ;;  %v3028_v34 = vmax.f32 %v2882_v62, 0.0 }
 0x79c   : > { %v3027_v1 = vmax.f32 %v2877_v22, 0.0  ;;  %v8414_v13 = vpop.f32.mrb[38].mxu0  ;;  %v2662_v54 = vadd.f32 %v2607_v18, %v2304_v6  ;;  %8442 = vmatprep.mubr.msk.f32.mxu0 %vm986_vm5, %v2692_v33 }
 0x79d   : > { %v2892_v9 = vadd.f32 %v8414_v13, %v10034_v27  ;;  %v2886_v50 = vpop.f32.mrb[39].mxu0  ;;  %8443 = vmatmul.mubr.msk.f32.gmra.mrb[58].mxu0 %vm986_vm5, %v2693_v36  ;;  %v2695_v49 = vmax.f32 %v2663_v20, 0.0 }
 0x79e   : > { %v2887_v10 = vadd.f32 %v2886_v50, %v10034_v27  ;;  %8461 = vmatprep.mubr.msk.f32.mxu1 %vm986_vm5, %v3027_v1  ;;  %v2694_v4 = vmax.f32 %v2662_v54, 0.0  ;;  %v8398_v11 = vpop.f32.mrb[50].mxu1 }
 0x79f   : > { %8462 = vmatmul.mubr.msk.f32.gmra.mrb[56].mxu1 %vm986_vm5, %v3028_v34  ;;  %v2665_v31 = vadd.f32 %v8398_v11, %v2309_v12  ;;  %v2617_v40 = vpop.f32.mrb[51].mxu1  ;;  %v3030_v63 = vmax.f32 %v2892_v9, 0.0 }
 0x7a0   : > { %v3029_v58 = vmax.f32 %v2887_v10, 0.0  ;;  %v2664_v3 = vadd.f32 %v2617_v40, %v2304_v6  ;;  %8445 = vmatprep.mubr.msk.f32.mxu0 %vm986_vm5, %v2694_v4 }
 0x7a1   : > { %8446 = vmatmul.mubr.msk.f32.gmra.mrb[60].mxu0 %vm986_vm5, %v2695_v49  ;;  %v2697_v15 = vmax.f32 %v2665_v31, 0.0 }
 0x7a2   : > { %8464 = vmatprep.mubr.msk.f32.mxu1 %vm986_vm5, %v3029_v58  ;;  %v2696_v24 = vmax.f32 %v2664_v3, 0.0  ;;  %v8401_v21 = vpop.f32.mrb[52].mxu1 }
 0x7a3   : > { %8465 = vmatmul.mubr.msk.f32.gmra.mrb[58].mxu1 %vm986_vm5, %v3030_v63  ;;  %v2667_v5 = vadd.f32 %v8401_v21, %v2309_v12  ;;  %v2627_v59 = vpop.f32.mrb[53].mxu1 }
 0x7a4   : > { %v2666_v16 = vadd.f32 %v2627_v59, %v2304_v6  ;;  %8448 = vmatprep.mubr.msk.f32.mxu0 %vm986_vm5, %v2696_v24 }
 0x7a5   : > { %8449 = vmatmul.mubr.msk.f32.gmra.mrb[62].mxu0 %vm986_vm5, %v2697_v15  ;;  %v2699_v43 = vmax.f32 %v2667_v5, 0.0  ;;  %v217_v5 = vld [vmem:[%s11183_s1 + $0x40] sm:$0xff] }
 0x7a6   : > { %v2698_v37 = vmax.f32 %v2666_v16, 0.0 }
 0x7a8   : > { %8451 = vmatprep.mubr.msk.f32.mxu0 %vm986_vm5, %v2698_v37 }
 0x7a9   : > { %8452 = vmatmul.mubr.msk.f32.gmra.mrb[64].mxu0 %vm986_vm5, %v2699_v43  ;;  %v10105_v43 = vrot.slane %v217_v5, %v9354_v48 }
 0x84c   : > { %v8417_v19 = vpop.f32.mrb[40].mxu0 }
 0x84d   : > { %v2902_v12 = vadd.f32 %v8417_v19, %v10034_v27  ;;  %v2896_v0 = vpop.f32.mrb[41].mxu0 }
 0x84e   : > { %v2897_v2 = vadd.f32 %v2896_v0, %v10034_v27 }
 0x84f   : > { %v3032_v28 = vmax.f32 %v2902_v12, 0.0 }
 0x850   : > { %v3031_v17 = vmax.f32 %v2897_v2, 0.0  ;;  %v8420_v6 = vpop.f32.mrb[42].mxu0 }
 0x851   : > { %v2912_v47 = vadd.f32 %v8420_v6, %v10034_v27  ;;  %v2906_v30 = vpop.f32.mrb[43].mxu0 }
 0x852   : > { %v2907_v23 = vadd.f32 %v2906_v30, %v10034_v27  ;;  %8467 = vmatprep.mubr.msk.f32.mxu1 %vm986_vm5, %v3031_v17 }
 0x853   : > { %8468 = vmatmul.mubr.msk.f32.gmra.mrb[60].mxu1 %vm986_vm5, %v3032_v28  ;;  %v3034_v44 = vmax.f32 %v2912_v47, 0.0 }
 0x854   : > { %v3033_v29 = vmax.f32 %v2907_v23, 0.0  ;;  %v8423_v41 = vpop.f32.mrb[44].mxu0 }
 0x855   : > { %v2922_v38 = vadd.f32 %v8423_v41, %v10034_v27  ;;  %v2916_v52 = vpop.f32.mrb[45].mxu0 }
 0x856   : > { %v2917_v8 = vadd.f32 %v2916_v52, %v10034_v27  ;;  %8470 = vmatprep.mubr.msk.f32.mxu1 %vm986_vm5, %v3033_v29 }
 0x857   : > { %8471 = vmatmul.mubr.msk.f32.gmra.mrb[62].mxu1 %vm986_vm5, %v3034_v44  ;;  %v3036_v56 = vmax.f32 %v2922_v38, 0.0 }
 0x858   : > { %v3035_v60 = vmax.f32 %v2917_v8, 0.0  ;;  %v8426_v55 = vpop.f32.mrb[46].mxu0 }
 0x859   : > { %v2932_v26 = vadd.f32 %v8426_v55, %v10034_v27  ;;  %v2926_v62 = vpop.f32.mrb[47].mxu0 }
 0x85a   : > { %v2927_v42 = vadd.f32 %v2926_v62, %v10034_v27  ;;  %8473 = vmatprep.mubr.msk.f32.mxu1 %vm986_vm5, %v3035_v60 }
 0x85b   : > { %8474 = vmatmul.mubr.msk.f32.gmra.mrb[64].mxu1 %vm986_vm5, %v3036_v56  ;;  %v3038_v39 = vmax.f32 %v2932_v26, 0.0 }
 0x85c   : > { %v3037_v22 = vmax.f32 %v2927_v42, 0.0  ;;  %v8429_v33 = vpop.f32.mrb[48].mxu0 }
 0x85d   : > { %v2942_v36 = vadd.f32 %v8429_v33, %v10034_v27  ;;  %v2936_v20 = vpop.f32.mrb[49].mxu0 }
 0x85e   : > { %v2937_v18 = vadd.f32 %v2936_v20, %v10034_v27  ;;  %8476 = vmatprep.mubr.msk.f32.mxu1 %vm986_vm5, %v3037_v22 }
 0x85f   : > { %8477 = vmatmul.mubr.msk.f32.gmra.mrb[66].mxu1 %vm986_vm5, %v3038_v39  ;;  %v3040_v54 = vmax.f32 %v2942_v36, 0.0 }
 0x860   : > { %v3039_v1 = vmax.f32 %v2937_v18, 0.0  ;;  %v8432_v13 = vpop.f32.mrb[50].mxu0 }
 0x861   : > { %v2952_v34 = vadd.f32 %v8432_v13, %v10034_v27  ;;  %v2946_v9 = vpop.f32.mrb[51].mxu0 }
 0x862   : > { %v2947_v50 = vadd.f32 %v2946_v9, %v10034_v27  ;;  %8479 = vmatprep.mubr.msk.f32.mxu1 %vm986_vm5, %v3039_v1 }
 0x863   : > { %8480 = vmatmul.mubr.msk.f32.gmra.mrb[68].mxu1 %vm986_vm5, %v3040_v54  ;;  %v3042_v11 = vmax.f32 %v2952_v34, 0.0 }
 0x864   : > { %v3041_v10 = vmax.f32 %v2947_v50, 0.0  ;;  %v8435_v4 = vpop.f32.mrb[52].mxu0 }
 0x865   : > { %v2962_v49 = vadd.f32 %v8435_v4, %v10034_v27  ;;  %v2956_v31 = vpop.f32.mrb[53].mxu0 }
 0x866   : > { %v2957_v40 = vadd.f32 %v2956_v31, %v10034_v27  ;;  %8482 = vmatprep.mubr.msk.f32.mxu1 %vm986_vm5, %v3041_v10 }
 0x867   : > { %8483 = vmatmul.mubr.msk.f32.gmra.mrb[70].mxu1 %vm986_vm5, %v3042_v11  ;;  %v3044_v63 = vmax.f32 %v2962_v49, 0.0 }
 0x868   : > { %v3043_v58 = vmax.f32 %v2957_v40, 0.0  ;;  %v8438_v3 = vpop.f32.mrb[54].mxu0 }
 0x869   : > { %v2972_v24 = vadd.f32 %v8438_v3, %v10034_v27  ;;  %v2966_v21 = vpop.f32.mrb[55].mxu0 }
 0x86a   : > { %v2967_v15 = vadd.f32 %v2966_v21, %v10034_v27  ;;  %8485 = vmatprep.mubr.msk.f32.mxu1 %vm986_vm5, %v3043_v58 }
 0x86b   : > { %8486 = vmatmul.mubr.msk.f32.gmra.mrb[72].mxu1 %vm986_vm5, %v3044_v63  ;;  %v3046_v37 = vmax.f32 %v2972_v24, 0.0 }
 0x86c   : > { %v3045_v59 = vmax.f32 %v2967_v15, 0.0  ;;  %v8441_v16 = vpop.f32.mrb[56].mxu0 }
 0x86d   : > { %v2982_v61 = vadd.f32 %v8441_v16, %v10034_v27  ;;  %v2976_v57 = vpop.f32.mrb[57].mxu0 }
 0x86e   : > { %v8460_v51 = vpop.f32.mrb[54].mxu1  ;;  %v2977_v19 = vadd.f32 %v2976_v57, %v10034_v27  ;;  %8488 = vmatprep.mubr.msk.f32.mxu1 %vm986_vm5, %v3045_v59 }
 0x86f   : > { %v3223_v12 = vpop.f32.mrb[55].mxu1  ;;  %8489 = vmatmul.mubr.msk.f32.gmra.mrb[74].mxu1 %vm986_vm5, %v3046_v37  ;;  %v3229_v17 = vadd.f32 %v8460_v51, %v10105_v43  ;;  %v3048_v6 = vmax.f32 %v2982_v61, 0.0 }
 0x870   : > { %v3047_v0 = vmax.f32 %v2977_v19, 0.0  ;;  %v8444_v2 = vpop.f32.mrb[58].mxu0  ;;  %v3224_v30 = vadd.f32 %v3223_v12, %v10105_v43 }
 0x871   : > { %v2992_v28 = vadd.f32 %v8444_v2, %v10034_v27  ;;  %v2986_v47 = vpop.f32.mrb[59].mxu0  ;;  %v3383_v60 = vmax.f32 %v3229_v17, 0.0 }
 0x872   : > { %v8463_v23 = vpop.f32.mrb[56].mxu1  ;;  %v2987_v29 = vadd.f32 %v2986_v47, %v10034_v27  ;;  %8491 = vmatprep.mubr.msk.f32.mxu1 %vm986_vm5, %v3047_v0  ;;  %v3382_v42 = vmax.f32 %v3224_v30, 0.0 }
 0x873   : > { %v3239_v41 = vadd.f32 %v8463_v23, %v10105_v43  ;;  %v3233_v44 = vpop.f32.mrb[57].mxu1  ;;  %8492 = vmatmul.mubr.msk.f32.gmra.mrb[76].mxu1 %vm986_vm5, %v3048_v6  ;;  %v3050_v56 = vmax.f32 %v2992_v28, 0.0 }
 0x874   : > { %v3234_v38 = vadd.f32 %v3233_v44, %v10105_v43  ;;  %v3049_v52 = vmax.f32 %v2987_v29, 0.0  ;;  %v8447_v8 = vpop.f32.mrb[60].mxu0 }
 0x875   : > { %v3385_v55 = vmax.f32 %v3239_v41, 0.0  ;;  %v3002_v26 = vadd.f32 %v8447_v8, %v10034_v27  ;;  %v2996_v62 = vpop.f32.mrb[61].mxu0 }
 0x876   : > { %v3384_v22 = vmax.f32 %v3234_v38, 0.0  ;;  %v8466_v33 = vpop.f32.mrb[58].mxu1  ;;  %v2997_v39 = vadd.f32 %v2996_v62, %v10034_v27  ;;  %8494 = vmatprep.mubr.msk.f32.mxu1 %vm986_vm5, %v3049_v52 }
 0x877   : > { %v3415_v36 = vadd.f32 %v3385_v55, %v3383_v60  ;;  %v3249_v20 = vadd.f32 %v8466_v33, %v10105_v43  ;;  %v3243_v18 = vpop.f32.mrb[59].mxu1  ;;  %8495 = vmatmul.mubr.msk.f32.gmra.mrb[78].mxu1 %vm986_vm5, %v3050_v56  ;;  %v3052_v50 = vmax.f32 %v3002_v26, 0.0 }
 0x878   : > { %v3414_v1 = vadd.f32 %v3384_v22, %v3382_v42  ;;  %v3244_v13 = vadd.f32 %v3243_v18, %v10105_v43  ;;  %v3051_v54 = vmax.f32 %v2997_v39, 0.0  ;;  %v8450_v34 = vpop.f32.mrb[62].mxu0 }
 0x879   : > { %v3387_v9 = vmax.f32 %v3249_v20, 0.0  ;;  %v3012_v10 = vadd.f32 %v8450_v34, %v10034_v27  ;;  %v3006_v4 = vpop.f32.mrb[63].mxu0 }
 0x87a   : > { %v3386_v11 = vmax.f32 %v3244_v13, 0.0  ;;  %v3007_v49 = vadd.f32 %v3006_v4, %v10034_v27  ;;  %8497 = vmatprep.mubr.msk.f32.mxu1 %vm986_vm5, %v3051_v54 }
 0x87b   : > { %v3423_v31 = vadd.f32 %v3415_v36, %v3387_v9  ;;  %8498 = vmatmul.mubr.msk.f32.gmra.mrb[80].mxu1 %vm986_vm5, %v3052_v50  ;;  %v3054_v63 = vmax.f32 %v3012_v10, 0.0 }
 0x87c   : > { %v3422_v40 = vadd.f32 %v3414_v1, %v3386_v11  ;;  %v3053_v58 = vmax.f32 %v3007_v49, 0.0  ;;  %v8453_v3 = vpop.f32.mrb[64].mxu0 }
 0x87d   : > { %v3022_v24 = vadd.f32 %v8453_v3, %v10034_v27  ;;  %v3016_v21 = vpop.f32.mrb[65].mxu0 }
 0x87e   : > { %v3017_v15 = vadd.f32 %v3016_v21, %v10034_v27  ;;  %8500 = vmatprep.mubr.msk.f32.mxu1 %vm986_vm5, %v3053_v58 }
 0x87f   : > { %8501 = vmatmul.mubr.msk.f32.gmra.mrb[82].mxu1 %vm986_vm5, %v3054_v63  ;;  %v3056_v59 = vmax.f32 %v3022_v24, 0.0 }
 0x880   : > { %v3055_v5 = vmax.f32 %v3017_v15, 0.0 }
 0x882   : > { %8503 = vmatprep.mubr.msk.f32.mxu1 %vm986_vm5, %v3055_v5 }
 0x883   : > { %8504 = vmatmul.mubr.msk.f32.gmra.mrb[84].mxu1 %vm986_vm5, %v3056_v59 }
 0x884   : > { %8561 = vmatprep.mubr.msk.f32.mxu1 %vm9174_vm2, %v9175_v32 }
 0x926   : > { %v8469_v16 = vpop.f32.mrb[60].mxu1 }
 0x927   : > { %v3259_v37 = vadd.f32 %v8469_v16, %v10105_v43  ;;  %v3253_v61 = vpop.f32.mrb[61].mxu1 }
 0x928   : > { %v3254_v57 = vadd.f32 %v3253_v61, %v10105_v43 }
 0x929   : > { %v3389_v27 = vmax.f32 %v3259_v37, 0.0 }
 0x92a   : > { %v3388_v51 = vmax.f32 %v3254_v57, 0.0  ;;  %v8472_v19 = vpop.f32.mrb[62].mxu1 }
 0x92b   : > { %v3431_v12 = vadd.f32 %v3423_v31, %v3389_v27  ;;  %v3263_v0 = vpop.f32.mrb[63].mxu1  ;;  %v3269_v17 = vadd.f32 %v8472_v19, %v10105_v43 }
 0x92c   : > { %v3430_v2 = vadd.f32 %v3422_v40, %v3388_v51  ;;  %v3264_v28 = vadd.f32 %v3263_v0, %v10105_v43 }
 0x92d   : > { %v3439_v30 = vmul.f32 0.25, %v3431_v12  ;;  %v3391_v44 = vmax.f32 %v3269_v17, 0.0 }
 0x92e   : > { %v3438_v6 = vmul.f32 0.25, %v3430_v2  ;;  %v8475_v47 = vpop.f32.mrb[64].mxu1  ;;  %v3390_v52 = vmax.f32 %v3264_v28, 0.0 }
 0x92f   : > { %v3279_v23 = vadd.f32 %v8475_v47, %v10105_v43  ;;  %v3273_v29 = vpop.f32.mrb[65].mxu1 }
 0x930   : > { %v3274_v41 = vadd.f32 %v3273_v29, %v10105_v43  ;;  %8510 = vmatprep.mubr.msk.f32.mxu0 %vm986_vm5, %v3438_v6 }
 0x931   : > { %v3393_v38 = vmax.f32 %v3279_v23, 0.0  ;;  %8511 = vmatmul.mubr.msk.f32.vlgmr.msra.gmra.mrb[66].mxu0 %vm986_vm5, %v3439_v30 }
 0x932   : > { %v3392_v8 = vmax.f32 %v3274_v41, 0.0  ;;  %v8478_v60 = vpop.f32.mrb[66].mxu1 }
 0x933   : > { %v3417_v55 = vadd.f32 %v3393_v38, %v3391_v44  ;;  %v3289_v56 = vadd.f32 %v8478_v60, %v10105_v43  ;;  %v3283_v26 = vpop.f32.mrb[67].mxu1 }
 0x934   : > { %v3416_v62 = vadd.f32 %v3392_v8, %v3390_v52  ;;  %v3284_v42 = vadd.f32 %v3283_v26, %v10105_v43 }
 0x935   : > { %v3395_v22 = vmax.f32 %v3289_v56, 0.0 }
 0x936   : > { %v3394_v33 = vmax.f32 %v3284_v42, 0.0  ;;  %v8481_v39 = vpop.f32.mrb[68].mxu1 }
 0x937   : > { %v3425_v36 = vadd.f32 %v3417_v55, %v3395_v22  ;;  %v3299_v20 = vadd.f32 %v8481_v39, %v10105_v43  ;;  %v3293_v18 = vpop.f32.mrb[69].mxu1 }
 0x938   : > { %v3424_v1 = vadd.f32 %v3416_v62, %v3394_v33  ;;  %v3294_v13 = vadd.f32 %v3293_v18, %v10105_v43 }
 0x939   : > { %v3397_v54 = vmax.f32 %v3299_v20, 0.0 }
 0x93a   : > { %v3396_v34 = vmax.f32 %v3294_v13, 0.0  ;;  %v8484_v9 = vpop.f32.mrb[70].mxu1 }
 0x93b   : > { %v3433_v50 = vadd.f32 %v3425_v36, %v3397_v54  ;;  %v3303_v10 = vpop.f32.mrb[71].mxu1  ;;  %v3309_v11 = vadd.f32 %v8484_v9, %v10105_v43 }
 0x93c   : > { %v3432_v4 = vadd.f32 %v3424_v1, %v3396_v34  ;;  %v3304_v31 = vadd.f32 %v3303_v10, %v10105_v43 }
 0x93d   : > { %v3441_v58 = vmul.f32 0.25, %v3433_v50  ;;  %v3399_v21 = vmax.f32 %v3309_v11, 0.0 }
 0x93e   : > { %v3440_v49 = vmul.f32 0.25, %v3432_v4  ;;  %v8487_v40 = vpop.f32.mrb[72].mxu1  ;;  %v3398_v5 = vmax.f32 %v3304_v31, 0.0 }
 0x93f   : > { %v3319_v3 = vadd.f32 %v8487_v40, %v10105_v43  ;;  %v3313_v63 = vpop.f32.mrb[73].mxu1 }
 0x940   : > { %v3314_v24 = vadd.f32 %v3313_v63, %v10105_v43  ;;  %8513 = vmatprep.mubr.msk.f32.mxu0 %vm986_vm5, %v3440_v49 }
 0x941   : > { %v3401_v15 = vmax.f32 %v3319_v3, 0.0  ;;  %8514 = vmatmul.mubr.msk.f32.gmra.mrb[68].mxu0 %vm986_vm5, %v3441_v58 }
 0x942   : > { %v3400_v59 = vmax.f32 %v3314_v24, 0.0  ;;  %v8490_v16 = vpop.f32.mrb[74].mxu1 }
 0x943   : > { %v3419_v37 = vadd.f32 %v3401_v15, %v3399_v21  ;;  %v3329_v61 = vadd.f32 %v8490_v16, %v10105_v43  ;;  %v3323_v57 = vpop.f32.mrb[75].mxu1 }
 0x944   : > { %v3418_v27 = vadd.f32 %v3400_v59, %v3398_v5  ;;  %v3324_v51 = vadd.f32 %v3323_v57, %v10105_v43  ;;  %v220_v5 = vld [vmem:[%s11183_s1 + $0x58] sm:$0xff] }
 0x945   : > { %v3403_v19 = vmax.f32 %v3329_v61, 0.0  ;;  %v3449_v59 = vrot.slane %v220_v5, %v9354_v48 }
 0x946   : > { %v3402_v12 = vmax.f32 %v3324_v51, 0.0  ;;  %v8493_v0 = vpop.f32.mrb[76].mxu1 }
 0x947   : > { %v3427_v2 = vadd.f32 %v3419_v37, %v3403_v19  ;;  %v3339_v17 = vadd.f32 %v8493_v0, %v10105_v43  ;;  %v3333_v6 = vpop.f32.mrb[77].mxu1 }
 0x948   : > { %v3426_v28 = vadd.f32 %v3418_v27, %v3402_v12  ;;  %v3334_v47 = vadd.f32 %v3333_v6, %v10105_v43 }
 0x949   : > { %v3405_v30 = vmax.f32 %v3339_v17, 0.0 }
 0x94a   : > { %v3404_v23 = vmax.f32 %v3334_v47, 0.0  ;;  %v8496_v29 = vpop.f32.mrb[78].mxu1 }
 0x94b   : > { %v3435_v41 = vadd.f32 %v3427_v2, %v3405_v30  ;;  %v3343_v44 = vpop.f32.mrb[79].mxu1  ;;  %v3349_v52 = vadd.f32 %v8496_v29, %v10105_v43 }
 0x94c   : > { %v3434_v38 = vadd.f32 %v3426_v28, %v3404_v23  ;;  %v3344_v60 = vadd.f32 %v3343_v44, %v10105_v43 }
 0x94d   : > { %v3443_v56 = vmul.f32 0.25, %v3435_v41  ;;  %v3407_v22 = vmax.f32 %v3349_v52, 0.0 }
 0x94e   : > { %v3442_v8 = vmul.f32 0.25, %v3434_v38  ;;  %v8499_v55 = vpop.f32.mrb[80].mxu1  ;;  %v3406_v39 = vmax.f32 %v3344_v60, 0.0 }
 0x94f   : > { %v3359_v26 = vadd.f32 %v8499_v55, %v10105_v43  ;;  %v3353_v62 = vpop.f32.mrb[81].mxu1 }
 0x950   : > { %v3354_v42 = vadd.f32 %v3353_v62, %v10105_v43  ;;  %8516 = vmatprep.mubr.msk.f32.mxu0 %vm986_vm5, %v3442_v8 }
 0x951   : > { %v3409_v33 = vmax.f32 %v3359_v26, 0.0  ;;  %8517 = vmatmul.mubr.msk.f32.gmra.mrb[70].mxu0 %vm986_vm5, %v3443_v56 }
 0x952   : > { %v3408_v36 = vmax.f32 %v3354_v42, 0.0  ;;  %v8502_v20 = vpop.f32.mrb[82].mxu1 }
 0x953   : > { %v3421_v18 = vadd.f32 %v3409_v33, %v3407_v22  ;;  %v3369_v1 = vadd.f32 %v8502_v20, %v10105_v43  ;;  %v3363_v13 = vpop.f32.mrb[83].mxu1 }
 0x954   : > { %v3420_v54 = vadd.f32 %v3408_v36, %v3406_v39  ;;  %v3364_v34 = vadd.f32 %v3363_v13, %v10105_v43 }
 0x955   : > { %v3411_v9 = vmax.f32 %v3369_v1, 0.0 }
 0x956   : > { %v3410_v50 = vmax.f32 %v3364_v34, 0.0  ;;  %v8505_v10 = vpop.f32.mrb[84].mxu1 }
 0x957   : > { %v3429_v4 = vadd.f32 %v3421_v18, %v3411_v9  ;;  %v3379_v11 = vadd.f32 %v8505_v10, %v10105_v43  ;;  %v3373_v49 = vpop.f32.mrb[85].mxu1 }
 0x958   : > { %v3428_v31 = vadd.f32 %v3420_v54, %v3410_v50  ;;  %v3374_v40 = vadd.f32 %v3373_v49, %v10105_v43 }
 0x959   : > { %v3413_v58 = vmax.f32 %v3379_v11, 0.0 }
 0x95a   : > { %v3412_v3 = vmax.f32 %v3374_v40, 0.0 }
 0x95b   : > { %v3437_v63 = vadd.f32 %v3429_v4, %v3413_v58 }
 0x95c   : > { %v3436_v24 = vadd.f32 %v3428_v31, %v3412_v3 }
 0x95d   : > { %v3445_v15 = vmul.f32 0.25, %v3437_v63 }
 0x95e   : > { %v3444_v21 = vmul.f32 0.25, %v3436_v24 }
 0x960   : > { %8519 = vmatprep.mubr.msk.f32.mxu0 %vm986_vm5, %v3444_v21 }
 0x961   : > { %8520 = vmatmul.mubr.msk.f32.gmra.mrb[72].mxu0 %vm986_vm5, %v3445_v15 }
 0xa04   : > { %v8512_v16 = vpop.f32.mrb[66].mxu0 }
 0xa05   : > { %v10175_v37 = vadd.f32 %v8512_v16, %v3449_v59  ;;  %v3540_v43 = vpop.f32.mrb[67].mxu0 }
 0xa06   : > { %v10177_v61 = vadd.f32 %v3540_v43, %v3449_v59 }
 0xa07   : > { %v10181_v57 = vmul.f32 %v10175_v37, %v10175_v37 }
 0xa08   : > { %8526 = vmatprep.mubr.msk.f32.mxu0 %vm986_vm5, %v10177_v61  ;;  %v10193_v51 = vpack.c.bf16 %v10175_v37, %v10177_v61  ;;  %v10197_v19 = vmul.f32 %v10177_v61, %v10177_v61 }
 0xa09   : > { %v3934_v12 = vsel %vm986_vm5, %v10181_v57, 0.0 }
 0xa0a   : > { %3935 = vadd.xlane.f32.xlu1 %v3934_v12  ;;  %8951 = vmatprep.subr.msk.bf16.mxu0 %vm10185_vm0, %v10193_v51  ;;  %v3931_v0 = vsel %vm986_vm5, %v10197_v19, 0.0  ;;  %v8974_v9 = vpack.c.bf16 %v10181_v57, %v10197_v19 }
 0xa0b   : > { %8954 = vmatpush3.bf16.xpose.msk.msra.mxu0 %vm10185_vm0, %v10193_v51  ;;  %3932 = vadd.xlane.f32.xlu0 %v3931_v0 }
 0xa12   : > { %8527 = vmatmul.mubr.msk.f32.vlgmr.msra.gmra.mrb[74].mxu0 %vm986_vm5, %v10175_v37 }
 0xa14   : > { %v8515_v2 = vpop.f32.mrb[68].mxu0 }
 0xa15   : > { %v10211_v17 = vadd.f32 %v8515_v2, %v3449_v59  ;;  %v3550_v6 = vpop.f32.mrb[69].mxu0 }
 0xa16   : > { %v10213_v28 = vadd.f32 %v3550_v6, %v3449_v59 }
 0xa17   : > { %v3602_v47 = vmul.f32 %v10211_v17, %v10211_v17 }
 0xa18   : > { %8533 = vmatprep.mubr.msk.f32.mxu0 %vm986_vm5, %v10213_v28  ;;  %v8955_v30 = vpack.c.bf16 %v10211_v17, %v10213_v28  ;;  %v3601_v23 = vmul.f32 %v10213_v28, %v10213_v28 }
 0xa19   : > { %v3940_v29 = vsel %vm986_vm5, %v3602_v47, 0.0 }
 0xa1a   : > { %3941 = vadd.xlane.f32.xlu1 %v3940_v29  ;;  %8957 = vmatprep.subr.msk.bf16.mxu0 %vm10185_vm0, %v8955_v30  ;;  %v3937_v41 = vsel %vm986_vm5, %v3601_v23, 0.0  ;;  %v8978_v44 = vpack.c.bf16 %v3602_v47, %v3601_v23 }
 0xa1b   : > { %3938 = vadd.xlane.f32.xlu0 %v3937_v41  ;;  %8960 = vmatpush3.bf16.xpose.msk.msra.mxu0 %vm10185_vm0, %v8955_v30 }
 0xa1c   : > { %8980 = vmatpush3.bf16.xpose.msk.msra.mxu1 %vm10185_vm0, %v8978_v44 }
 0xa1d   : > { %8985 = vmatprep.subr.bf16.mxu1 %v9173_v25 }
 0xa22   : > { %8534 = vmatmul.mubr.msk.f32.vlgmr.msra.gmra.mrb[76].mxu0 %vm986_vm5, %v10211_v17 }
 0xa23   : > { %8562 = vmatmul.mubr.msk.f32.vlgmr.msra.gmra.mrb[86].mxu1 %vm986_vm5, %v9176_v35 }
 0xa24   : > { %v8518_v38 = vpop.f32.mrb[70].mxu0  ;;  %8575 = vmatprep.mubr.msk.f32.mxu1 %vm9174_vm2, %v9175_v32 }
 0xa25   : > { %v10238_v52 = vadd.f32 %v8518_v38, %v3449_v59  ;;  %v3560_v8 = vpop.f32.mrb[71].mxu0 }
 0xa26   : > { %v10240_v60 = vadd.f32 %v3560_v8, %v3449_v59 }
 0xa27   : > { %v3604_v55 = vmul.f32 %v10238_v52, %v10238_v52 }
 0xa28   : > { %8540 = vmatprep.mubr.msk.f32.mxu0 %vm986_vm5, %v10240_v60  ;;  %v10248_v56 = vpack.c.bf16 %v10238_v52, %v10240_v60  ;;  %v3603_v26 = vmul.f32 %v10240_v60, %v10240_v60 }
 0xa29   : > { %v3946_v62 = vsel %vm986_vm5, %v3604_v55, 0.0 }
 0xa2a   : > { %3947 = vadd.xlane.f32.xlu1 %v3946_v62  ;;  %8963 = vmatprep.subr.msk.bf16.mxu0 %vm10185_vm0, %v10248_v56  ;;  %v3943_v42 = vsel %vm986_vm5, %v3603_v26, 0.0  ;;  %v8982_v50 = vpack.c.bf16 %v3604_v55, %v3603_v26 }
 0xa2b   : > { %3944 = vadd.xlane.f32.xlu0 %v3943_v42  ;;  %8966 = vmatpush3.bf16.xpose.msk.msra.mxu0 %vm10185_vm0, %v10248_v56 }
 0xa32   : > { %8541 = vmatmul.mubr.msk.f32.vlgmr.msra.gmra.mrb[78].mxu0 %vm986_vm5, %v10238_v52 }
 0xa34   : > { %v8521_v22 = vpop.f32.mrb[72].mxu0 }
 0xa35   : > { %v10262_v33 = vadd.f32 %v8521_v22, %v3449_v59  ;;  %v3570_v39 = vpop.f32.mrb[73].mxu0 }
 0xa36   : > { %v10264_v36 = vadd.f32 %v3570_v39, %v3449_v59 }
 0xa37   : > { %v3606_v20 = vmul.f32 %v10262_v33, %v10262_v33 }
 0xa38   : > { %8547 = vmatprep.mubr.msk.f32.mxu0 %vm986_vm5, %v10264_v36  ;;  %v10272_v18 = vpack.c.bf16 %v10262_v33, %v10264_v36  ;;  %v3605_v1 = vmul.f32 %v10264_v36, %v10264_v36 }
 0xa39   : > { %v3952_v13 = vsel %vm986_vm5, %v3606_v20, 0.0 }
 0xa3a   : > { %3953 = vadd.xlane.f32.xlu1 %v3952_v13  ;;  %8969 = vmatprep.subr.msk.bf16.mxu0 %vm10185_vm0, %v10272_v18  ;;  %v3949_v54 = vsel %vm986_vm5, %v3605_v1, 0.0  ;;  %v8986_v34 = vpack.c.bf16 %v3606_v20, %v3605_v1 }
 0xa3b   : > { %8972 = vmatpush3.bf16.xpose.msk.msra.mxu0 %vm10185_vm0, %v10272_v18  ;;  %3950 = vadd.xlane.f32.xlu0 %v3949_v54 }
 0xa3c   : > { %8988 = vmatpush3.bf16.xpose.msk.msra.mxu1 %vm10185_vm0, %v8986_v34  ;;  %8973 = vmatprep.subr.bf16.mxu0 %v9173_v25 }
 0xa3d   : > { %8994 = vmatprep.subr.bf16.mxu1 %v8955_v30 }
 0xa42   : > { %8548 = vmatmul.mubr.msk.f32.vlgmr.msra.gmra.mrb[80].mxu0 %vm986_vm5, %v10262_v33 }
 0xa43   : > { %8976 = vmatpush3.bf16.xpose.msk.msra.mxu0 %vm10185_vm0, %v8974_v9  ;;  %8576 = vmatmul.mubr.msk.f32.vlgmr.msra.gmra.mrb[88].mxu1 %vm986_vm5, %v9176_v35 }
 0xa44   : > { %8996 = vmatpush3.bf16.msra.mxu1 %v8955_v30  ;;  %8554 = vmatprep.mubr.msk.f32.mxu0 %vm9174_vm2, %v9175_v32 }
 0xa45   : > { %9002 = vmatprep.subr.bf16.mxu1 %v10272_v18  ;;  %8981 = vmatprep.subr.bf16.mxu0 %v9173_v25 }
 0xa4a   : > { %8555 = vmatmul.mubr.msk.f32.vlgmr.msra.gmra.mrb[82].mxu0 %vm986_vm5, %v9176_v35 }
 0xa4b   : > { %8984 = vmatpush3.bf16.xpose.msk.msra.mxu0 %vm10185_vm0, %v8982_v50  ;;  %8568 = vmatprep.mubr.msk.f32.mxu0 %vm9174_vm2, %v9175_v32 }
 0xa4c   : > { %8990 = vmatprep.subr.bf16.mxu0 %v10193_v51 }
 0xa52   : > { %8569 = vmatmul.mubr.msk.f32.vlgmr.msra.gmra.mrb[84].mxu0 %vm986_vm5, %v9176_v35 }
 0xa53   : > { %8992 = vmatpush3.bf16.msra.mxu0 %v10193_v51 }
 0xa54   : > { %8998 = vmatprep.subr.bf16.mxu0 %v10248_v56 }
 0xa97   : > { %v3936_v11 = vpop.xlane.xlu1 %3935 }
 0xa98   : > { %v3933_v49 = vpop.xlane.xlu0 %3932 }
 0xaa7   : > { %v3942_v24 = vpop.xlane.xlu1 %3941 }
 0xaa8   : > { %v3939_v21 = vpop.xlane.xlu0 %3938 }
 0xab7   : > { %v3948_v51 = vpop.xlane.xlu1 %3947 }
 0xab8   : > { %v3945_v19 = vpop.xlane.xlu0 %3944 }
 0xac7   : > { %v3954_v23 = vpop.xlane.xlu1 %3953 }
 0xac8   : > { %v3951_v29 = vpop.xlane.xlu0 %3950 }
 0xae5   : > { %v8528_v10 = vpop.f32.mrb[74].mxu0 }
 0xae6   : > { %v3679_v4 = vpop.f32.mrb[75].mxu0  ;;  %v4286_v54 = vmul.f32 2.0, %v8528_v10 }
 0xae7   : > { %v4285_v9 = vmul.f32 2.0, %v3679_v4 }
 0xaf5   : > { %v8535_v31 = vpop.f32.mrb[76].mxu0 }
 0xaf6   : > { %v3760_v40 = vpop.f32.mrb[77].mxu0  ;;  %v4105_v58 = vpop.f32.mrb[86].mxu1  ;;  %v4288_v15 = vmul.f32 2.0, %v8535_v31 }
 0xaf7   : > { %v4268_v3 = vrot.slane %v4105_v58, %v9354_v48  ;;  %v8563_v63 = vpop.f32.mrb[87].mxu1  ;;  %v4287_v5 = vmul.f32 2.0, %v3760_v40 }
 0xaf9   : > { %v4279_v59 = vadd.f32 %v4268_v3, %v3939_v21  ;;  %v4280_v35 = vadd.f32 %v4268_v3, %v3942_v24 }
 0xafb   : > { %v4295_v16 = vsub.f32 %v4279_v59, %v4287_v5  ;;  %v4296_v43 = vsub.f32 %v4280_v35, %v4288_v15 }
 0xafd   : > { %v4304_v0 = vmax.f32 %v4296_v43, 0.0  ;;  %v4303_v41 = vmax.f32 %v4295_v16, 0.0 }
 0xaff   : > { %v4312_v26 = vadd.f32 1.0, %v4304_v0  ;;  %v4311_v22 = vadd.f32 1.0, %v4303_v41 }
 0xb01   : > { %v4320_v20 = vsel %vm9366_vm4, 0.0, %v4312_v26  ;;  %v4319_v50 = vsel %vm9361_vm3, 0.0, %v4311_v22 }
 0xb02   : > { %v4336_v58 = vand.u32 4294967280, %v4320_v20  ;;  %v4335_v21 = vand.u32 4294967280, %v4319_v50 }
 0xb04   : > { %v10318_v16 = vor.u32 %v4336_v58, %v9357_v53 }
 0xb05   : > { %v8542_v57 = vpop.f32.mrb[78].mxu0 }
 0xb06   : > { %v3841_v27 = vpop.f32.mrb[79].mxu0 }
 0xb15   : > { %v8549_v12 = vpop.f32.mrb[80].mxu0 }
 0xb16   : > { %v3922_v2 = vpop.f32.mrb[81].mxu0  ;;  %v4257_v6 = vpop.f32.mrb[88].mxu1  ;;  %v4292_v44 = vmul.f32 2.0, %v8549_v12 }
 0xb17   : > { %v4276_v47 = vrot.slane %v4257_v6, %v9354_v48  ;;  %v8577_v30 = vpop.f32.mrb[89].mxu1  ;;  %v4291_v38 = vmul.f32 2.0, %v3922_v2  ;;  %v10324_v6 = vor.u32 %v4335_v21, %v9357_v53 }
 0xb19   : > { %v4283_v8 = vadd.f32 %v4276_v47, %v3951_v29  ;;  %v4284_v55 = vadd.f32 %v4276_v47, %v3954_v23 }
 0xb1b   : > { %v4299_v62 = vsub.f32 %v4283_v8, %v4291_v38  ;;  %v4300_v42 = vsub.f32 %v4284_v55, %v4292_v44 }
 0xb1d   : > { %v4029_v39 = vpop.f32.mrb[82].mxu0  ;;  %v4308_v34 = vmax.f32 %v4300_v42, 0.0  ;;  %v4307_v3 = vmax.f32 %v4299_v62, 0.0 }
 0xb1e   : > { %v4264_v1 = vrot.slane %v4029_v39, %v9354_v48  ;;  %v8556_v13 = vpop.f32.mrb[83].mxu0 }
 0xb1f   : > { %v4316_v15 = vadd.f32 1.0, %v4308_v34  ;;  %v4315_v10 = vadd.f32 1.0, %v4307_v3 }
 0xb20   : > { %v4277_v31 = vadd.f32 %v4264_v1, %v3933_v49  ;;  %v4278_v40 = vadd.f32 %v4264_v1, %v3936_v11  ;;  %v4290_v49 = vmul.f32 2.0, %v8542_v57  ;;  %v4289_v11 = vmul.f32 2.0, %v3841_v27 }
 0xb21   : > { %v4324_v2 = vsel %vm9366_vm4, 0.0, %v4316_v15  ;;  %v4323_v57 = vsel %vm9361_vm3, 0.0, %v4315_v10 }
 0xb22   : > { %v4293_v63 = vsub.f32 %v4277_v31, %v4285_v9  ;;  %v4294_v24 = vsub.f32 %v4278_v40, %v4286_v54  ;;  %v4340_v8 = vand.u32 4294967280, %v4324_v2  ;;  %v4339_v22 = vand.u32 4294967280, %v4323_v57 }
 0xb24   : > { %v4301_v5 = vmax.f32 %v4293_v63, 0.0  ;;  %v4302_v59 = vmax.f32 %v4294_v24, 0.0  ;;  %v10347_v31 = vor.u32 %v4340_v8, %v9357_v53  ;;  %v10354_v15 = vor.u32 %v4339_v22, %v9357_v53 }
 0xb25   : > { %v4181_v35 = vpop.f32.mrb[84].mxu0 }
 0xb26   : > { %v4309_v43 = vadd.f32 1.0, %v4301_v5  ;;  %v4310_v4 = vadd.f32 1.0, %v4302_v59  ;;  %v4272_v12 = vrot.slane %v4181_v35, %v9354_v48  ;;  %v8570_v0 = vpop.f32.mrb[85].mxu0  ;;  %v4454_v14 = vsel %vm986_vm5, %v10347_v31, 2147483647 }
 0xb28   : > { %v4317_v47 = vsel %vm9361_vm3, 0.0, %v4309_v43  ;;  %v4318_v30 = vsel %vm9366_vm4, 0.0, %v4310_v4  ;;  %v4281_v23 = vadd.f32 %v4272_v12, %v3945_v19  ;;  %v4282_v29 = vadd.f32 %v4272_v12, %v3948_v51 }
 0xb29   : > { %v4333_v41 = vand.u32 4294967280, %v4317_v47  ;;  %v4334_v44 = vand.u32 4294967280, %v4318_v30  ;;  %v4394_v19 = vsel %vm986_vm5, %v10318_v16, 2147483647  ;;  %v4379_v51 = vsel %vm986_vm5, %v10324_v6, 2147483647 }
 0xb2a   : > { %v4297_v27 = vsub.f32 %v4281_v23, %v4289_v11  ;;  %v4298_v38 = vsub.f32 %v4282_v29, %v4290_v49  ;;  %v4396_v9 = vshra.s32 %v4394_v19, 16  ;;  %v4381_v50 = vshra.s32 %v4379_v51, 16 }
 0xb2b   : > { %v10333_v55 = vor.u32 %v4334_v44, %v9357_v53  ;;  %v10336_v26 = vor.u32 %v4333_v41, %v9357_v53  ;;  %v4439_v4 = vsel %vm986_vm5, %v10354_v15, 2147483647  ;;  %v4456_v11 = vshra.s32 %v4454_v14, 16 }
 0xb2c   : > { %v4305_v62 = vmax.f32 %v4297_v27, 0.0  ;;  %v4306_v42 = vmax.f32 %v4298_v38, 0.0  ;;  %v4398_v7 = vcvt.s32.f32 %v4396_v9  ;;  %v4383_v35 = vcvt.s32.f32 %v4381_v50 }
 0xb2d   : > { %v4364_v39 = vsel %vm986_vm5, %v10333_v55, 2147483647  ;;  %v4349_v20 = vsel %vm986_vm5, %v10336_v26, 2147483647  ;;  %v4441_v2 = vshra.s32 %v4439_v4, 16  ;;  %v4458_v47 = vcvt.s32.f32 %v4456_v11 }
 0xb2e   : > { %v4313_v1 = vadd.f32 1.0, %v4305_v62  ;;  %v4314_v13 = vadd.f32 1.0, %v4306_v42  ;;  %v4366_v54 = vshra.s32 %v4364_v39, 16  ;;  %v4351_v34 = vshra.s32 %v4349_v20, 16 }
 0xb2f   : > { %v4443_v30 = vcvt.s32.f32 %v4441_v2  ;;  %v4365_v23 = vand.u32 65535, %v4364_v39  ;;  %v4350_v29 = vand.u32 65535, %v4349_v20  ;;  %v4395_v38 = vand.u32 65535, %v4394_v19 }
 0xb30   : > { %v4321_v40 = vsel %vm9361_vm3, 0.0, %v4313_v1  ;;  %v4322_v58 = vsel %vm9366_vm4, 0.0, %v4314_v13  ;;  %v4368_v3 = vcvt.s32.f32 %v4366_v54  ;;  %v4353_v63 = vcvt.s32.f32 %v4351_v34 }
 0xb31   : > { %v4337_v24 = vand.u32 4294967280, %v4321_v40  ;;  %v4338_v21 = vand.u32 4294967280, %v4322_v58  ;;  %v4367_v57 = vcvt.s32.f32 %v4365_v23  ;;  %v4352_v27 = vcvt.s32.f32 %v4350_v29 }
 0xb32   : > { %4369 = vmin.xlane.f32.xlu1 %v4368_v3  ;;  %4354 = vmin.xlane.f32.xlu0 %v4353_v63  ;;  %v4380_v8 = vand.u32 65535, %v4379_v51  ;;  %v4397_v13 = vcvt.s32.f32 %v4395_v38  ;;  %v4455_v58 = vand.u32 65535, %v4454_v14 }
 0xb33   : > { %v10357_v5 = vor.u32 %v4338_v21, %v9357_v53  ;;  %v10360_v59 = vor.u32 %v4337_v24, %v9357_v53 }
 0xb34   : > { %v4382_v54 = vcvt.s32.f32 %v4380_v8 }
 0xb35   : > { %v4424_v10 = vsel %vm986_vm5, %v10357_v5, 2147483647  ;;  %v4409_v43 = vsel %vm986_vm5, %v10360_v59, 2147483647 }
 0xb36   : > { %4399 = vmin.xlane.f32.xlu1 %v4398_v7  ;;  %4384 = vmin.xlane.f32.xlu0 %v4383_v35  ;;  %v4426_v12 = vshra.s32 %v4424_v10, 16  ;;  %v4411_v0 = vshra.s32 %v4409_v43, 16  ;;  %v4425_v34 = vand.u32 65535, %v4424_v10  ;;  %v4410_v9 = vand.u32 65535, %v4409_v43 }
 0xb38   : > { %v4428_v53 = vcvt.s32.f32 %v4426_v12  ;;  %v4413_v49 = vcvt.s32.f32 %v4411_v0  ;;  %v4427_v50 = vcvt.s32.f32 %v4425_v34  ;;  %v4412_v40 = vcvt.s32.f32 %v4410_v9 }
 0xb3a   : > { %4429 = vmin.xlane.f32.xlu1 %v4428_v53  ;;  %4414 = vmin.xlane.f32.xlu0 %v4413_v49 }
 0xb3e   : > { %4459 = vmin.xlane.f32.xlu1 %v4458_v47  ;;  %4444 = vmin.xlane.f32.xlu0 %v4443_v30 }
 0xbbf   : > { %v4370_v41 = vpop.xlane.xlu1 %4369  ;;  %v4355_v44 = vpop.xlane.xlu0 %4354 }
 0xbc0   : > { %vm4371_vm3 = vcmp.eq.f32.partialorder %v4368_v3, %v4370_v41  ;;  %vm4356_vm4 = vcmp.eq.f32.partialorder %v4353_v63, %v4355_v44  ;;  %v4440_v3 = vand.u32 65535, %v4439_v4  ;;  %v4376_v0 = vcvt.f32.s32 %v4370_v41 }
 0xbc1   : > { %v4372_v62 = vsel %vm4371_vm3, %v4367_v57, inf  ;;  %v4357_v42 = vsel %vm4356_vm4, %v4352_v27, inf  ;;  %v4361_v11 = vcvt.f32.s32 %v4355_v44 }
 0xbc2   : > { %4373 = vmin.xlane.f32.xlu1 %v4372_v62  ;;  %4358 = vmin.xlane.f32.xlu0 %v4357_v42  ;;  %v4377_v2 = vshll.u32 %v4376_v0, 16 }
 0xbc3   : > { %v4400_v22 = vpop.xlane.xlu1 %4399  ;;  %v4385_v1 = vpop.xlane.xlu0 %4384  ;;  %v4362_v23 = vshll.u32 %v4361_v11, 16 }
 0xbc4   : > { %vm4401_vm1 = vcmp.eq.f32.partialorder %v4398_v7, %v4400_v22  ;;  %vm4386_vm6 = vcmp.eq.f32.partialorder %v4383_v35, %v4385_v1  ;;  %v4457_v7 = vcvt.s32.f32 %v4455_v58  ;;  %v4442_v35 = vcvt.s32.f32 %v4440_v3 }
 0xbc5   : > { %v4402_v39 = vsel %vm4401_vm1, %v4397_v13, inf  ;;  %v4387_v20 = vsel %vm4386_vm6, %v4382_v54, inf  ;;  %v4406_v14 = vcvt.f32.s32 %v4400_v22  ;;  %v4391_v4 = vcvt.f32.s32 %v4385_v1 }
 0xbc6   : > { %4403 = vmin.xlane.f32.xlu1 %v4402_v39  ;;  %4388 = vmin.xlane.f32.xlu0 %v4387_v20 }
 0xbc7   : > { %v4430_v19 = vpop.xlane.xlu1 %4429  ;;  %v4415_v51 = vpop.xlane.xlu0 %4414  ;;  %v4407_v27 = vshll.u32 %v4406_v14, 16  ;;  %v4392_v38 = vshll.u32 %v4391_v4, 16 }
 0xbc8   : > { %vm4431_vm7 = vcmp.eq.f32.partialorder %v4428_v53, %v4430_v19  ;;  %vm4416_vm8 = vcmp.eq.f32.partialorder %v4413_v49, %v4415_v51 }
 0xbc9   : > { %v4432_v63 = vsel %vm4431_vm7, %v4427_v50, inf  ;;  %v4417_v24 = vsel %vm4416_vm8, %v4412_v40, inf }
 0xbca   : > { %4433 = vmin.xlane.f32.xlu1 %v4432_v63  ;;  %4418 = vmin.xlane.f32.xlu0 %v4417_v24 }
 0xbcb   : > { %v4460_v21 = vpop.xlane.xlu1 %4459  ;;  %v4445_v10 = vpop.xlane.xlu0 %4444 }
 0xbcc   : > { %vm4461_vm9 = vcmp.eq.f32.partialorder %v4458_v47, %v4460_v21  ;;  %vm4446_vm10 = vcmp.eq.f32.partialorder %v4443_v30, %v4445_v10  ;;  %v4436_v47 = vcvt.f32.s32 %v4430_v19  ;;  %v4421_v30 = vcvt.f32.s32 %v4415_v51 }
 0xbcd   : > { %v4462_v43 = vsel %vm4461_vm9, %v4457_v7, inf  ;;  %v4447_v12 = vsel %vm4446_vm10, %v4442_v35, inf  ;;  %v4466_v42 = vcvt.f32.s32 %v4460_v21  ;;  %v4451_v13 = vcvt.f32.s32 %v4445_v10 }
 0xbce   : > { %4463 = vmin.xlane.f32.xlu1 %v4462_v43  ;;  %4448 = vmin.xlane.f32.xlu0 %v4447_v12  ;;  %v4437_v40 = vshll.u32 %v4436_v47, 16  ;;  %v4422_v58 = vshll.u32 %v4421_v30, 16 }
 0xbcf   : > { %v4467_v10 = vshll.u32 %v4466_v42, 16  ;;  %v4452_v7 = vshll.u32 %v4451_v13, 16 }
 0xc4f   : > { %v4374_v53 = vpop.xlane.xlu1 %4373  ;;  %v4359_v49 = vpop.xlane.xlu0 %4358 }
 0xc50   : > { %v4375_v29 = vcvt.f32.s32 %v4374_v53  ;;  %v4360_v57 = vcvt.f32.s32 %v4359_v49 }
 0xc52   : > { %v4378_v8 = vadd.s32 %v4377_v2, %v4375_v29  ;;  %v4363_v62 = vadd.s32 %v4362_v23, %v4360_v57 }
 0xc53   : > { %v4404_v54 = vpop.xlane.xlu1 %4403  ;;  %v4389_v34 = vpop.xlane.xlu0 %4388 }
 0xc54   : > { %vm4470_vm11 = vcmp.eq.s32.totalorder %v10333_v55, %v4378_v8  ;;  %vm4469_vm12 = vcmp.eq.s32.totalorder %v10336_v26, %v4363_v62  ;;  %v4405_v41 = vcvt.f32.s32 %v4404_v54  ;;  %v4390_v44 = vcvt.f32.s32 %v4389_v34 }
 0xc55   : > { %v7632_v22 = vsel %vm4470_vm11, 1.0, %v9175_v32  ;;  %v7631_v1 = vsel %vm4469_vm12, 1.0, %v9175_v32  ;;  %v10375_v9 = vsel %vm4470_vm11, 2147483647, %v10333_v55  ;;  %v10378_v39 = vsel %vm4469_vm12, 2147483647, %v10336_v26 }
 0xc56   : > { %v4494_v20 = vsub.f32 %v7632_v22, %v9436_v46  ;;  %v4493_v19 = vsub.f32 %v7631_v1, %v9431_v45  ;;  %v4408_v51 = vadd.s32 %v4407_v27, %v4405_v41  ;;  %v4393_v50 = vadd.s32 %v4392_v38, %v4390_v44 }
 0xc57   : > { %v4434_v3 = vpop.xlane.xlu1 %4433  ;;  %v4419_v63 = vpop.xlane.xlu0 %4418  ;;  %v10384_v24 = vsel %vm986_vm5, %v10375_v9, 2147483647  ;;  %v10388_v55 = vsel %vm986_vm5, %v10378_v39, 2147483647 }
 0xc58   : > { %4502 = vst.msk [vmem:[#allocation2 + $0x8] sm:$0xff] %vm986_vm5, %v4494_v20  ;;  %4501 = vst.msk [vmem:[#allocation2] sm:$0xff] %vm986_vm5, %v4493_v19  ;;  %vm4472_vm13 = vcmp.eq.s32.totalorder %v10318_v16, %v4408_v51  ;;  %vm4471_vm14 = vcmp.eq.s32.totalorder %v10324_v6, %v4393_v50  ;;  %v4435_v26 = vcvt.f32.s32 %v4434_v3  ;;  %v4420_v21 = vcvt.f32.s32 %v4419_v63 }
 0xc59   : > { %v7634_v35 = vsel %vm4472_vm13, 1.0, %v9175_v32  ;;  %v7633_v43 = vsel %vm4471_vm14, 1.0, %v9175_v32  ;;  %v10399_v4 = vsel %vm4472_vm13, 2147483647, %v10318_v16  ;;  %v10402_v53 = vsel %vm4471_vm14, 2147483647, %v10324_v6 }
 0xc5a   : > { %v4496_v12 = vsub.f32 %v7634_v35, %v9436_v46  ;;  %v4495_v0 = vsub.f32 %v7633_v43, %v9431_v45  ;;  %v4438_v11 = vadd.s32 %v4437_v40, %v4435_v26  ;;  %v4423_v14 = vadd.s32 %v4422_v58, %v4420_v21 }
 0xc5b   : > { %v4534_v49 = vshra.s32 %v10384_v24, 16  ;;  %v4464_v2 = vpop.xlane.xlu1 %4463  ;;  %v4519_v23 = vshra.s32 %v10388_v55, 16  ;;  %v4449_v29 = vpop.xlane.xlu0 %4448  ;;  %v10426_v34 = vsel %vm986_vm5, %v10399_v4, 2147483647 }
 0xc5c   : > { %4504 = vst.msk [vmem:[#allocation2 + $0x48] sm:$0xff] %vm986_vm5, %v4496_v12  ;;  %4503 = vst.msk [vmem:[#allocation2 + $0x40] sm:$0xff] %vm986_vm5, %v4495_v0  ;;  %vm4474_vm15 = vcmp.eq.s32.totalorder %v10357_v5, %v4438_v11  ;;  %vm4473_vm0 = vcmp.eq.s32.totalorder %v10360_v59, %v4423_v14  ;;  %v4465_v57 = vcvt.f32.s32 %v4464_v2  ;;  %v4450_v16 = vcvt.f32.s32 %v4449_v29 }
 0xc5d   : > { %v7636_v27 = vsel %vm4474_vm15, 1.0, %v9175_v32  ;;  %v10412_v6 = vsel %vm4474_vm15, 2147483647, %v10357_v5  ;;  %v7635_v38 = vsel %vm4473_vm0, 1.0, %v9175_v32  ;;  %v10416_v8 = vsel %vm4473_vm0, 2147483647, %v10360_v59 }
 0xc5e   : > { %v4498_v62 = vsub.f32 %v7636_v27, %v9436_v46  ;;  %v4497_v47 = vsub.f32 %v7635_v38, %v9431_v45  ;;  %v10420_v30 = vcvt.s32.f32 %v4534_v49  ;;  %v4468_v42 = vadd.s32 %v4467_v10, %v4465_v57 }
 0xc5f   : > { %v10422_v13 = vcvt.s32.f32 %v4519_v23  ;;  %v4453_v54 = vadd.s32 %v4452_v7, %v4450_v16  ;;  %v10430_v5 = vsel %vm986_vm5, %v10402_v53, 2147483647  ;;  %v5013_v59 = vld [vmem:[#allocation2] sm:$0xff]  ;;  %v5014_v41 = vld [vmem:[#allocation2 + $0x8] sm:$0xff]  ;;  %v4564_v44 = vshra.s32 %v10426_v34, 16 }
 0xc60   : > { %4506 = vst.msk [vmem:[#allocation2 + $0x88] sm:$0xff] %vm986_vm5, %v4498_v62  ;;  %4505 = vst.msk [vmem:[#allocation2 + $0x80] sm:$0xff] %vm986_vm5, %v4497_v47  ;;  %4537 = vmin.xlane.f32.xlu1 %v10420_v30  ;;  %vm4476_vm3 = vcmp.eq.s32.totalorder %v10347_v31, %v4468_v42  ;;  %v4549_v22 = vshra.s32 %v10430_v5, 16  ;;  %8582 = vmatprep.mubr.msk.f32.mxu0 %vm986_vm5, %v5013_v59  ;;  %v10441_v1 = vsel %vm986_vm5, %v10412_v6, 2147483647  ;;  %v4533_v49 = vand.u32 65535, %v10384_v24 }
 0xc61   : > { %v7638_v20 = vsel %vm4476_vm3, 1.0, %v9175_v32  ;;  %v10445_v19 = vsel %vm4476_vm3, 2147483647, %v10347_v31  ;;  %4522 = vmin.xlane.f32.xlu0 %v10422_v13  ;;  %vm4475_vm4 = vcmp.eq.s32.totalorder %v10354_v15, %v4453_v54  ;;  %8583 = vmatmul.mubr.msk.f32.vlgmr.msra.gmra.mrb[86].mxu0 %vm986_vm5, %v5014_v41  ;;  %v4594_v51 = vshra.s32 %v10441_v1, 16 }
 0xc62   : > { %v4500_v50 = vsub.f32 %v7638_v20, %v9436_v46  ;;  %v7637_v40 = vsel %vm4475_vm4, 1.0, %v9175_v32  ;;  %v10454_v58 = vsel %vm4475_vm4, 2147483647, %v10354_v15  ;;  %v4566_v3 = vcvt.s32.f32 %v4564_v44  ;;  %9000 = vmatpush3.bf16.msra.mxu0 %v10248_v56 }
 0xc63   : > { %v4499_v31 = vsub.f32 %v7637_v40, %v9431_v45  ;;  %v4551_v63 = vcvt.s32.f32 %v4549_v22  ;;  %v4577_v26 = vsel %vm986_vm5, %v10416_v8, 2147483647  ;;  %v5021_v21 = vld [vmem:[#allocation2 + $0x40] sm:$0xff]  ;;  %v5022_v10 = vld [vmem:[#allocation2 + $0x48] sm:$0xff]  ;;  %v4596_v7 = vcvt.s32.f32 %v4594_v51 }
 0xc64   : > { %4508 = vst.msk [vmem:[#allocation2 + $0xc8] sm:$0xff] %vm986_vm5, %v4500_v50  ;;  %4567 = vmin.xlane.f32.xlu1 %v4566_v3  ;;  %v4579_v35 = vshra.s32 %v4577_v26, 16  ;;  %8598 = vmatprep.mubr.msk.f32.mxu1 %vm986_vm5, %v5021_v21  ;;  %v4622_v15 = vsel %vm986_vm5, %v10445_v19, 2147483647  ;;  %v4607_v56 = vsel %vm986_vm5, %v10454_v58, 2147483647  ;;  %v4535_v29 = vcvt.s32.f32 %v4533_v49 }
 0xc65   : > { %4507 = vst.msk [vmem:[#allocation2 + $0xc0] sm:$0xff] %vm986_vm5, %v4499_v31  ;;  %4552 = vmin.xlane.f32.xlu0 %v4551_v63  ;;  %8599 = vmatmul.mubr.msk.f32.vlgmr.msra.gmra.mrb[90].mxu1 %vm986_vm5, %v5022_v10  ;;  %v4624_v43 = vshra.s32 %v4622_v15, 16  ;;  %v4609_v12 = vshra.s32 %v4607_v56, 16  ;;  %v4518_v2 = vand.u32 65535, %v10388_v55  ;;  %v4563_v57 = vand.u32 65535, %v10426_v34 }
 0xc66   : > { %v4581_v0 = vcvt.s32.f32 %v4579_v35  ;;  %9004 = vmatpush3.bf16.msra.mxu1 %v10272_v18  ;;  %v4548_v18 = vand.u32 65535, %v10430_v5  ;;  %v4593_v55 = vand.u32 65535, %v10441_v1  ;;  %v4578_v34 = vand.u32 65535, %v4577_v26 }
 0xc67   : > { %v4626_v11 = vcvt.s32.f32 %v4624_v43  ;;  %v4611_v14 = vcvt.s32.f32 %v4609_v12  ;;  %v4520_v27 = vcvt.s32.f32 %v4518_v2  ;;  %v4565_v24 = vcvt.s32.f32 %v4563_v57 }
 0xc68   : > { %4597 = vmin.xlane.f32.xlu1 %v4596_v7  ;;  %v4550_v54 = vcvt.s32.f32 %v4548_v18  ;;  %v4595_v41 = vcvt.s32.f32 %v4593_v55  ;;  %v4580_v22 = vcvt.s32.f32 %v4578_v34  ;;  %v4608_v20 = vand.u32 65535, %v4607_v56 }
 0xc69   : > { %4582 = vmin.xlane.f32.xlu0 %v4581_v0 }
 0xc6a   : > { %v4610_v31 = vcvt.s32.f32 %v4608_v20 }
 0xc6c   : > { %4627 = vmin.xlane.f32.xlu1 %v4626_v11 }
 0xc6d   : > { %4612 = vmin.xlane.f32.xlu0 %v4611_v14 }
 0xced   : > { %v4538_v23 = vpop.xlane.xlu1 %4537 }
 0xcee   : > { %vm4539_vm1 = vcmp.eq.f32.partialorder %v10420_v30, %v4538_v23  ;;  %v4523_v16 = vpop.xlane.xlu0 %4522 }
 0xcef   : > { %vm4524_vm6 = vcmp.eq.f32.partialorder %v10422_v13, %v4523_v16  ;;  %v4540_v38 = vsel %vm4539_vm1, %v4535_v29, inf  ;;  %v4623_v13 = vand.u32 65535, %v4622_v15  ;;  %v4544_v15 = vcvt.f32.s32 %v4538_v23 }
 0xcf0   : > { %4541 = vmin.xlane.f32.xlu1 %v4540_v38  ;;  %v4525_v62 = vsel %vm4524_vm6, %v4520_v27, inf  ;;  %v4529_v56 = vcvt.f32.s32 %v4523_v16 }
 0xcf1   : > { %4526 = vmin.xlane.f32.xlu0 %v4525_v62  ;;  %v4568_v47 = vpop.xlane.xlu1 %4567  ;;  %v4625_v40 = vcvt.s32.f32 %v4623_v13 }
 0xcf2   : > { %vm4569_vm7 = vcmp.eq.f32.partialorder %v4566_v3, %v4568_v47  ;;  %v4553_v42 = vpop.xlane.xlu0 %4552  ;;  %v4574_v43 = vcvt.f32.s32 %v4568_v47  ;;  %v4530_v18 = vshll.u32 %v4529_v56, 16 }
 0xcf3   : > { %vm4554_vm8 = vcmp.eq.f32.partialorder %v4551_v63, %v4553_v42  ;;  %v4570_v30 = vsel %vm4569_vm7, %v4565_v24, inf  ;;  %v4559_v12 = vcvt.f32.s32 %v4553_v42 }
 0xcf4   : > { %4571 = vmin.xlane.f32.xlu1 %v4570_v30  ;;  %v4555_v59 = vsel %vm4554_vm8, %v4550_v54, inf  ;;  %v4575_v62 = vshll.u32 %v4574_v43, 16 }
 0xcf5   : > { %4556 = vmin.xlane.f32.xlu0 %v4555_v59  ;;  %v4598_v5 = vpop.xlane.xlu1 %4597  ;;  %v4560_v55 = vshll.u32 %v4559_v12, 16 }
 0xcf6   : > { %vm4599_vm9 = vcmp.eq.f32.partialorder %v4596_v7, %v4598_v5  ;;  %v4583_v44 = vpop.xlane.xlu0 %4582 }
 0xcf7   : > { %vm4584_vm10 = vcmp.eq.f32.partialorder %v4581_v0, %v4583_v44  ;;  %v4600_v51 = vsel %vm4599_vm9, %v4595_v41, inf  ;;  %v4604_v0 = vcvt.f32.s32 %v4598_v5 }
 0xcf8   : > { %4601 = vmin.xlane.f32.xlu1 %v4600_v51  ;;  %v4585_v1 = vsel %vm4584_vm10, %v4580_v22, inf }
 0xcf9   : > { %4586 = vmin.xlane.f32.xlu0 %v4585_v1  ;;  %v4628_v50 = vpop.xlane.xlu1 %4627  ;;  %v4605_v54 = vshll.u32 %v4604_v0, 16 }
 0xcfa   : > { %vm4629_vm11 = vcmp.eq.f32.partialorder %v4626_v11, %v4628_v50  ;;  %v4613_v3 = vpop.xlane.xlu0 %4612  ;;  %v4589_v11 = vcvt.f32.s32 %v4583_v44  ;;  %v4634_v2 = vcvt.f32.s32 %v4628_v50 }
 0xcfb   : > { %vm4614_vm12 = vcmp.eq.f32.partialorder %v4611_v14, %v4613_v3  ;;  %v4630_v63 = vsel %vm4629_vm11, %v4625_v40, inf  ;;  %v4545_v14 = vshll.u32 %v4544_v15, 16  ;;  %v4619_v29 = vcvt.f32.s32 %v4613_v3 }
 0xcfc   : > { %4631 = vmin.xlane.f32.xlu1 %v4630_v63  ;;  %v4615_v26 = vsel %vm4614_vm12, %v4610_v31, inf  ;;  %v4590_v34 = vshll.u32 %v4589_v11, 16  ;;  %v4635_v16 = vshll.u32 %v4634_v2, 16 }
 0xcfd   : > { %4616 = vmin.xlane.f32.xlu0 %v4615_v26  ;;  %v4620_v47 = vshll.u32 %v4619_v29, 16 }
 0xd34   : > { %v10476_v21 = vpop.f32.mrb[86].mxu0 }
 0xd35   : > { %v10478_v10 = vpop.f32.mrb[87].mxu0 }
 0xd38   : > { %v10480_v7 = vpop.f32.mrb[90].mxu1 }
 0xd39   : > { %v10482_v35 = vpop.f32.mrb[91].mxu1 }
 0xd7d   : > { %v4542_v49 = vpop.xlane.xlu1 %4541 }
 0xd7e   : > { %v4543_v57 = vcvt.f32.s32 %v4542_v49  ;;  %v4527_v27 = vpop.xlane.xlu0 %4526 }
 0xd7f   : > { %v4528_v38 = vcvt.f32.s32 %v4527_v27 }
 0xd80   : > { %v4546_v24 = vadd.s32 %v4545_v14, %v4543_v57 }
 0xd81   : > { %v4531_v30 = vadd.s32 %v4530_v18, %v4528_v38  ;;  %v4572_v23 = vpop.xlane.xlu1 %4571 }
 0xd82   : > { %vm4638_vm13 = vcmp.eq.s32.totalorder %v10375_v9, %v4546_v24  ;;  %v4573_v42 = vcvt.f32.s32 %v4572_v23  ;;  %v4557_v59 = vpop.xlane.xlu0 %4556 }
 0xd83   : > { %v7640_v5 = vsel %vm4638_vm13, 1.0, %v9175_v32  ;;  %v10487_v41 = vsel %vm4638_vm13, 2147483647, %v10375_v9  ;;  %vm4637_vm14 = vcmp.eq.s32.totalorder %v10378_v39, %v4531_v30  ;;  %v4558_v13 = vcvt.f32.s32 %v4557_v59 }
 0xd84   : > { %v4662_v44 = vsub.f32 %v7640_v5, %v9436_v46  ;;  %v7639_v22 = vsel %vm4637_vm14, 1.0, %v9175_v32  ;;  %v10493_v20 = vsel %vm4637_vm14, 2147483647, %v10378_v39  ;;  %v4576_v51 = vadd.s32 %v4575_v62, %v4573_v42 }
 0xd85   : > { %v4661_v1 = vsub.f32 %v7639_v22, %v9431_v45  ;;  %v4561_v50 = vadd.s32 %v4560_v55, %v4558_v13  ;;  %v4602_v40 = vpop.xlane.xlu1 %4601  ;;  %v10498_v3 = vsel %vm986_vm5, %v10487_v41, 2147483647  ;;  %v10502_v9 = vsel %vm986_vm5, %v10493_v20, 2147483647 }
 0xd86   : > { %4670 = vst.msk [vmem:[#allocation2 + $0x18] sm:$0xff] %vm986_vm5, %v4662_v44  ;;  %vm4640_vm15 = vcmp.eq.s32.totalorder %v10399_v4, %v4576_v51  ;;  %v4603_v31 = vcvt.f32.s32 %v4602_v40  ;;  %v4587_v39 = vpop.xlane.xlu0 %4586  ;;  %v4702_v63 = vshra.s32 %v10498_v3, 16  ;;  %v4687_v26 = vshra.s32 %v10502_v9, 16 }
 0xd87   : > { %4669 = vst.msk [vmem:[#allocation2 + $0x10] sm:$0xff] %vm986_vm5, %v4661_v1  ;;  %v7642_v15 = vsel %vm4640_vm15, 1.0, %v9175_v32  ;;  %v10511_v56 = vsel %vm4640_vm15, 2147483647, %v10399_v4  ;;  %vm4639_vm0 = vcmp.eq.s32.totalorder %v10402_v53, %v4561_v50  ;;  %v4588_v43 = vcvt.f32.s32 %v4587_v39 }
 0xd88   : > { %v4664_v12 = vsub.f32 %v7642_v15, %v9436_v46  ;;  %v7641_v0 = vsel %vm4639_vm0, 1.0, %v9175_v32  ;;  %v10517_v11 = vsel %vm4639_vm0, 2147483647, %v10402_v53  ;;  %v4606_v49 = vadd.s32 %v4605_v54, %v4603_v31 }
 0xd89   : > { %v4663_v14 = vsub.f32 %v7641_v0, %v9431_v45  ;;  %v4591_v2 = vadd.s32 %v4590_v34, %v4588_v43  ;;  %v10520_v29 = vcvt.s32.f32 %v4702_v63  ;;  %v4632_v57 = vpop.xlane.xlu1 %4631  ;;  %v10522_v27 = vcvt.s32.f32 %v4687_v26 }
 0xd8a   : > { %4672 = vst.msk [vmem:[#allocation2 + $0x58] sm:$0xff] %vm986_vm5, %v4664_v12  ;;  %vm4642_vm3 = vcmp.eq.s32.totalorder %v10412_v6, %v4606_v49  ;;  %v4633_v4 = vcvt.f32.s32 %v4632_v57  ;;  %v4617_v18 = vpop.xlane.xlu0 %4616  ;;  %v10528_v38 = vsel %vm986_vm5, %v10511_v56, 2147483647  ;;  %v10532_v53 = vsel %vm986_vm5, %v10517_v11, 2147483647 }
 0xd8b   : > { %4671 = vst.msk [vmem:[#allocation2 + $0x50] sm:$0xff] %vm986_vm5, %v4663_v14  ;;  %v7644_v62 = vsel %vm4642_vm3, 1.0, %v9175_v32  ;;  %v10537_v24 = vsel %vm4642_vm3, 2147483647, %v10412_v6  ;;  %vm4641_vm4 = vcmp.eq.s32.totalorder %v10416_v8, %v4591_v2  ;;  %4705 = vmin.xlane.f32.xlu1 %v10520_v29  ;;  %4690 = vmin.xlane.f32.xlu0 %v10522_v27  ;;  %v4618_v55 = vcvt.f32.s32 %v4617_v18 }
 0xd8c   : > { %v4666_v54 = vsub.f32 %v7644_v62, %v9436_v46  ;;  %v7643_v34 = vsel %vm4641_vm4, 1.0, %v9175_v32  ;;  %v10545_v30 = vsel %vm4641_vm4, 2147483647, %v10416_v8  ;;  %v4636_v23 = vadd.s32 %v4635_v16, %v4633_v4 }
 0xd8d   : > { %v4665_v42 = vsub.f32 %v7643_v34, %v9431_v45  ;;  %v4621_v59 = vadd.s32 %v4620_v47, %v4618_v55  ;;  %v4732_v6 = vshra.s32 %v10528_v38, 16  ;;  %v4717_v5 = vshra.s32 %v10532_v53, 16  ;;  %v5016_v13 = vld [vmem:[#allocation2 + $0x18] sm:$0xff] }
 0xd8e   : > { %4674 = vst.msk [vmem:[#allocation2 + $0x98] sm:$0xff] %vm986_vm5, %v4666_v54  ;;  %vm4644_vm1 = vcmp.eq.s32.totalorder %v10445_v19, %v4636_v23  ;;  %v5015_v44 = vld [vmem:[#allocation2 + $0x10] sm:$0xff]  ;;  %v10554_v22 = vsel %vm986_vm5, %v10537_v24, 2147483647  ;;  %v10558_v8 = vsel %vm986_vm5, %v10545_v30, 2147483647 }
 0xd8f   : > { %4673 = vst.msk [vmem:[#allocation2 + $0x90] sm:$0xff] %vm986_vm5, %v4665_v42  ;;  %v7646_v16 = vsel %vm4644_vm1, 1.0, %v9175_v32  ;;  %v10563_v47 = vsel %vm4644_vm1, 2147483647, %v10445_v19  ;;  %vm4643_vm6 = vcmp.eq.s32.totalorder %v10454_v58, %v4621_v59  ;;  %v4734_v51 = vcvt.s32.f32 %v4732_v6  ;;  %8585 = vmatprep.mubr.msk.f32.mxu0 %vm986_vm5, %v5015_v44 }
 0xd90   : > { %v4668_v1 = vsub.f32 %v7646_v16, %v9436_v46  ;;  %v7645_v50 = vsel %vm4643_vm6, 1.0, %v9175_v32  ;;  %v10570_v40 = vsel %vm4643_vm6, 2147483647, %v10454_v58  ;;  %v4719_v31 = vcvt.s32.f32 %v4717_v5  ;;  %8586 = vmatmul.mubr.msk.f32.gmra.mrb[88].mxu0 %vm986_vm5, %v5016_v13 }
 0xd91   : > { %v4667_v39 = vsub.f32 %v7645_v50, %v9431_v45  ;;  %4735 = vmin.xlane.f32.xlu1 %v4734_v51  ;;  %v4762_v19 = vshra.s32 %v10554_v22, 16  ;;  %v4747_v63 = vshra.s32 %v10558_v8, 16  ;;  %v5024_v26 = vld [vmem:[#allocation2 + $0x58] sm:$0xff]  ;;  %v4790_v15 = vsel %vm986_vm5, %v10563_v47, 2147483647 }
 0xd92   : > { %4676 = vst.msk [vmem:[#allocation2 + $0xd8] sm:$0xff] %vm986_vm5, %v4668_v1  ;;  %4720 = vmin.xlane.f32.xlu0 %v4719_v31  ;;  %v5023_v43 = vld [vmem:[#allocation2 + $0x50] sm:$0xff]  ;;  %v4792_v58 = vshra.s32 %v4790_v15, 16  ;;  %v4775_v12 = vsel %vm986_vm5, %v10570_v40, 2147483647  ;;  %v4701_v4 = vand.u32 65535, %v10498_v3 }
 0xd93   : > { %4675 = vst.msk [vmem:[#allocation2 + $0xd0] sm:$0xff] %vm986_vm5, %v4667_v39  ;;  %v4764_v0 = vcvt.s32.f32 %v4762_v19  ;;  %v4749_v49 = vcvt.s32.f32 %v4747_v63  ;;  %8601 = vmatprep.mubr.msk.f32.mxu1 %vm986_vm5, %v5023_v43  ;;  %v4777_v14 = vshra.s32 %v4775_v12, 16  ;;  %v4686_v18 = vand.u32 65535, %v10502_v9 }
 0xd94   : > { %8602 = vmatmul.mubr.msk.f32.gmra.mrb[92].mxu1 %vm986_vm5, %v5024_v26  ;;  %v4794_v2 = vcvt.s32.f32 %v4792_v58  ;;  %v4703_v54 = vcvt.s32.f32 %v4701_v4  ;;  %v4731_v59 = vand.u32 65535, %v10528_v38  ;;  %v4716_v6 = vand.u32 65535, %v10532_v53 }
 0xd95   : > { %4765 = vmin.xlane.f32.xlu1 %v4764_v0  ;;  %v4779_v57 = vcvt.s32.f32 %v4777_v14  ;;  %v4688_v34 = vcvt.s32.f32 %v4686_v18  ;;  %v4761_v9 = vand.u32 65535, %v10554_v22  ;;  %v4791_v50 = vand.u32 65535, %v4790_v15 }
 0xd96   : > { %4750 = vmin.xlane.f32.xlu0 %v4749_v49  ;;  %v4733_v3 = vcvt.s32.f32 %v4731_v59  ;;  %v4718_v44 = vcvt.s32.f32 %v4716_v6  ;;  %v4776_v19 = vand.u32 65535, %v4775_v12 }
 0xd97   : > { %v4763_v1 = vcvt.s32.f32 %v4761_v9 }
 0xd98   : > { %v4778_v26 = vcvt.s32.f32 %v4776_v19 }
 0xd99   : > { %4795 = vmin.xlane.f32.xlu1 %v4794_v2 }
 0xd9a   : > { %4780 = vmin.xlane.f32.xlu0 %v4779_v57 }
 0xe18   : > { %v4706_v62 = vpop.xlane.xlu1 %4705  ;;  %v4691_v55 = vpop.xlane.xlu0 %4690 }
 0xe19   : > { %vm4707_vm7 = vcmp.eq.f32.partialorder %v10520_v29, %v4706_v62  ;;  %vm4692_vm8 = vcmp.eq.f32.partialorder %v10522_v27, %v4691_v55  ;;  %v4746_v29 = vand.u32 65535, %v10558_v8  ;;  %v4793_v8 = vcvt.s32.f32 %v4791_v50 }
 0xe1a   : > { %v4708_v23 = vsel %vm4707_vm7, %v4703_v54, inf  ;;  %v4693_v42 = vsel %vm4692_vm8, %v4688_v34, inf  ;;  %v4712_v14 = vcvt.f32.s32 %v4706_v62  ;;  %v4697_v4 = vcvt.f32.s32 %v4691_v55 }
 0xe1b   : > { %4709 = vmin.xlane.f32.xlu1 %v4708_v23  ;;  %4694 = vmin.xlane.f32.xlu0 %v4693_v42  ;;  %v4748_v39 = vcvt.s32.f32 %v4746_v29 }
 0xe1c   : > { %v4713_v34 = vshll.u32 %v4712_v14, 16  ;;  %v4698_v23 = vshll.u32 %v4697_v4, 16 }
 0xe1e   : > { %v4736_v5 = vpop.xlane.xlu1 %4735 }
 0xe1f   : > { %vm4737_vm9 = vcmp.eq.f32.partialorder %v4734_v51, %v4736_v5  ;;  %v10591_v13 = vpop.xlane.xlu0 %4720  ;;  %v4742_v18 = vcvt.f32.s32 %v4736_v5 }
 0xe20   : > { %vm4722_vm10 = vcmp.eq.f32.partialorder %v4719_v31, %v10591_v13  ;;  %v4738_v27 = vsel %vm4737_vm9, %v4733_v3, inf  ;;  %v4727_v9 = vcvt.f32.s32 %v10591_v13 }
 0xe21   : > { %4739 = vmin.xlane.f32.xlu1 %v4738_v27  ;;  %v4723_v16 = vsel %vm4722_vm10, %v4718_v44, inf  ;;  %v4743_v3 = vshll.u32 %v4742_v18, 16 }
 0xe22   : > { %4724 = vmin.xlane.f32.xlu0 %v4723_v16  ;;  %v4766_v38 = vpop.xlane.xlu1 %4765 }
 0xe23   : > { %vm4767_vm11 = vcmp.eq.f32.partialorder %v4764_v0, %v4766_v38  ;;  %v4751_v53 = vpop.xlane.xlu0 %4750  ;;  %v4772_v44 = vcvt.f32.s32 %v4766_v38 }
 0xe24   : > { %vm4752_vm12 = vcmp.eq.f32.partialorder %v4749_v49, %v4751_v53  ;;  %v4768_v22 = vsel %vm4767_vm11, %v4763_v1, inf  ;;  %v4757_v29 = vcvt.f32.s32 %v4751_v53 }
 0xe25   : > { %4769 = vmin.xlane.f32.xlu1 %v4768_v22  ;;  %v4753_v51 = vsel %vm4752_vm12, %v4748_v39, inf  ;;  %v4728_v22 = vshll.u32 %v4727_v9, 16 }
 0xe26   : > { %4754 = vmin.xlane.f32.xlu0 %v4753_v51  ;;  %v4796_v63 = vpop.xlane.xlu1 %4795 }
 0xe27   : > { %vm4797_vm13 = vcmp.eq.f32.partialorder %v4794_v2, %v4796_v63  ;;  %v4781_v31 = vpop.xlane.xlu0 %4780  ;;  %v4802_v27 = vcvt.f32.s32 %v4796_v63 }
 0xe28   : > { %vm4782_vm14 = vcmp.eq.f32.partialorder %v4779_v57, %v4781_v31  ;;  %v4798_v43 = vsel %vm4797_vm13, %v4793_v8, inf  ;;  %v4787_v16 = vcvt.f32.s32 %v4781_v31 }
 0xe29   : > { %4799 = vmin.xlane.f32.xlu1 %v4798_v43  ;;  %v4783_v58 = vsel %vm4782_vm14, %v4778_v26, inf  ;;  %v4758_v26 = vshll.u32 %v4757_v29, 16  ;;  %v4803_v43 = vshll.u32 %v4802_v27, 16 }
 0xe2a   : > { %4784 = vmin.xlane.f32.xlu0 %v4783_v58  ;;  %v4788_v18 = vshll.u32 %v4787_v16, 16 }
 0xe63   : > { %v10595_v15 = vpop.f32.mrb[88].mxu0 }
 0xe64   : > { %v10597_v0 = vpop.f32.mrb[89].mxu0 }
 0xe67   : > { %v10599_v12 = vpop.f32.mrb[92].mxu1 }
 0xe68   : > { %v10601_v49 = vpop.f32.mrb[93].mxu1 }
 0xea8   : > { %v4710_v54 = vpop.xlane.xlu1 %4709  ;;  %v4695_v2 = vpop.xlane.xlu0 %4694 }
 0xea9   : > { %v4711_v57 = vcvt.f32.s32 %v4710_v54  ;;  %v4696_v42 = vcvt.f32.s32 %v4695_v2 }
 0xeab   : > { %v4714_v59 = vadd.s32 %v4713_v34, %v4711_v57  ;;  %v4699_v6 = vadd.s32 %v4698_v23, %v4696_v42 }
 0xead   : > { %vm4806_vm15 = vcmp.eq.s32.totalorder %v10487_v41, %v4714_v59  ;;  %vm4805_vm0 = vcmp.eq.s32.totalorder %v10493_v20, %v4699_v6 }
 0xeae   : > { %v7648_v62 = vsel %vm4806_vm15, 1.0, %v9175_v32  ;;  %v10608_v55 = vsel %vm4806_vm15, 2147483647, %v10487_v41  ;;  %v7647_v5 = vsel %vm4805_vm0, 1.0, %v9175_v32  ;;  %v10612_v1 = vsel %vm4805_vm0, 2147483647, %v10493_v20  ;;  %v4740_v50 = vpop.xlane.xlu1 %4739 }
 0xeaf   : > { %v4830_v13 = vsub.f32 %v7648_v62, %v9436_v46  ;;  %v4829_v38 = vsub.f32 %v7647_v5, %v9431_v45  ;;  %v4741_v53 = vcvt.f32.s32 %v4740_v50  ;;  %v4725_v39 = vpop.xlane.xlu0 %4724  ;;  %v10618_v19 = vsel %vm986_vm5, %v10608_v55, 2147483647 }
 0xeb0   : > { %v4726_v51 = vcvt.f32.s32 %v4725_v39  ;;  %v4870_v41 = vshra.s32 %v10618_v19, 16  ;;  %v10623_v63 = vsel %vm986_vm5, %v10612_v1, 2147483647  ;;  %v4773_v20 = vshll.u32 %v4772_v44, 16 }
 0xeb1   : > { %4838 = vst.msk [vmem:[#allocation2 + $0x28] sm:$0xff] %vm986_vm5, %v4830_v13  ;;  %4837 = vst.msk [vmem:[#allocation2 + $0x20] sm:$0xff] %vm986_vm5, %v4829_v38  ;;  %v4744_v8 = vadd.s32 %v4743_v3, %v4741_v53  ;;  %v4855_v31 = vshra.s32 %v10623_v63, 16 }
 0xeb2   : > { %v4729_v58 = vadd.s32 %v4728_v22, %v4726_v51  ;;  %v4770_v14 = vpop.xlane.xlu1 %4769  ;;  %v10628_v4 = vcvt.s32.f32 %v4870_v41 }
 0xeb3   : > { %vm4808_vm3 = vcmp.eq.s32.totalorder %v10511_v56, %v4744_v8  ;;  %v4771_v54 = vcvt.f32.s32 %v4770_v14  ;;  %v4755_v2 = vpop.xlane.xlu0 %4754  ;;  %v10631_v34 = vcvt.s32.f32 %v4855_v31 }
 0xeb4   : > { %v7650_v23 = vsel %vm4808_vm3, 1.0, %v9175_v32  ;;  %v10635_v57 = vsel %vm4808_vm3, 2147483647, %v10511_v56  ;;  %vm4807_vm4 = vcmp.eq.s32.totalorder %v10517_v11, %v4729_v58  ;;  %v4756_v42 = vcvt.f32.s32 %v4755_v2  ;;  %4873 = vmin.xlane.f32.xlu1 %v10628_v4 }
 0xeb5   : > { %v4832_v59 = vsub.f32 %v7650_v23, %v9436_v46  ;;  %v7649_v6 = vsel %vm4807_vm4, 1.0, %v9175_v32  ;;  %v10642_v3 = vsel %vm4807_vm4, 2147483647, %v10517_v11  ;;  %v4774_v9 = vadd.s32 %v4773_v20, %v4771_v54  ;;  %4858 = vmin.xlane.f32.xlu0 %v10631_v34 }
 0xeb6   : > { %v4831_v44 = vsub.f32 %v7649_v6, %v9431_v45  ;;  %v4759_v29 = vadd.s32 %v4758_v26, %v4756_v42  ;;  %v4800_v56 = vpop.xlane.xlu1 %4799  ;;  %v10648_v27 = vsel %vm986_vm5, %v10635_v57, 2147483647  ;;  %v10652_v16 = vsel %vm986_vm5, %v10642_v3, 2147483647 }
 0xeb7   : > { %4840 = vst.msk [vmem:[#allocation2 + $0x68] sm:$0xff] %vm986_vm5, %v4832_v59  ;;  %vm4810_vm1 = vcmp.eq.s32.totalorder %v10537_v24, %v4774_v9  ;;  %v4801_v11 = vcvt.f32.s32 %v4800_v56  ;;  %v4785_v62 = vpop.xlane.xlu0 %4784  ;;  %v4900_v5 = vshra.s32 %v10648_v27, 16  ;;  %v4885_v50 = vshra.s32 %v10652_v16, 16 }
 0xeb8   : > { %4839 = vst.msk [vmem:[#allocation2 + $0x60] sm:$0xff] %vm986_vm5, %v4831_v44  ;;  %v7652_v13 = vsel %vm4810_vm1, 1.0, %v9175_v32  ;;  %v10661_v38 = vsel %vm4810_vm1, 2147483647, %v10537_v24  ;;  %vm4809_vm6 = vcmp.eq.s32.totalorder %v10545_v30, %v4759_v29  ;;  %v4786_v53 = vcvt.f32.s32 %v4785_v62  ;;  %v5017_v39 = vld [vmem:[#allocation2 + $0x20] sm:$0xff]  ;;  %v5018_v22 = vld [vmem:[#allocation2 + $0x28] sm:$0xff] }
 0xeb9   : > { %v4834_v51 = vsub.f32 %v7652_v13, %v9436_v46  ;;  %v7651_v41 = vsel %vm4809_vm6, 1.0, %v9175_v32  ;;  %v10667_v20 = vsel %vm4809_vm6, 2147483647, %v10545_v30  ;;  %v4804_v8 = vadd.s32 %v4803_v43, %v4801_v11  ;;  %8588 = vmatprep.mubr.msk.f32.mxu0 %vm986_vm5, %v5017_v39 }
 0xeba   : > { %v4833_v31 = vsub.f32 %v7651_v41, %v9431_v45  ;;  %v4789_v26 = vadd.s32 %v4788_v18, %v4786_v53  ;;  %v4902_v24 = vcvt.s32.f32 %v4900_v5  ;;  %v4887_v58 = vcvt.s32.f32 %v4885_v50  ;;  %8589 = vmatmul.mubr.msk.f32.gmra.mrb[90].mxu0 %vm986_vm5, %v5018_v22 }
 0xebb   : > { %4842 = vst.msk [vmem:[#allocation2 + $0xa8] sm:$0xff] %vm986_vm5, %v4834_v51  ;;  %vm4812_vm7 = vcmp.eq.s32.totalorder %v10563_v47, %v4804_v8  ;;  %v4928_v14 = vsel %vm986_vm5, %v10661_v38, 2147483647  ;;  %v4913_v30 = vsel %vm986_vm5, %v10667_v20, 2147483647  ;;  %v4869_v13 = vand.u32 65535, %v10618_v19 }
 0xebc   : > { %4841 = vst.msk [vmem:[#allocation2 + $0xa0] sm:$0xff] %vm986_vm5, %v4833_v31  ;;  %v7654_v43 = vsel %vm4812_vm7, 1.0, %v9175_v32  ;;  %v10681_v18 = vsel %vm4812_vm7, 2147483647, %v10563_v47  ;;  %vm4811_vm8 = vcmp.eq.s32.totalorder %v10570_v40, %v4789_v26  ;;  %4903 = vmin.xlane.f32.xlu1 %v4902_v24  ;;  %4888 = vmin.xlane.f32.xlu0 %v4887_v58  ;;  %v4930_v54 = vshra.s32 %v4928_v14, 16 }
 0xebd   : > { %v4836_v2 = vsub.f32 %v7654_v43, %v9436_v46  ;;  %v7653_v23 = vsel %vm4811_vm8, 1.0, %v9175_v32  ;;  %v10687_v42 = vsel %vm4811_vm8, 2147483647, %v10570_v40  ;;  %v4915_v59 = vshra.s32 %v4913_v30, 16 }
 0xebe   : > { %v4835_v6 = vsub.f32 %v7653_v23, %v9431_v45  ;;  %v4932_v9 = vcvt.s32.f32 %v4930_v54  ;;  %v5026_v44 = vld [vmem:[#allocation2 + $0x68] sm:$0xff]  ;;  %v4958_v47 = vsel %vm986_vm5, %v10681_v18, 2147483647  ;;  %v4943_v29 = vsel %vm986_vm5, %v10687_v42, 2147483647 }
 0xebf   : > { %4844 = vst.msk [vmem:[#allocation2 + $0xe8] sm:$0xff] %vm986_vm5, %v4836_v2  ;;  %v4917_v56 = vcvt.s32.f32 %v4915_v59  ;;  %v5025_v11 = vld [vmem:[#allocation2 + $0x60] sm:$0xff]  ;;  %v4960_v62 = vshra.s32 %v4958_v47, 16  ;;  %v4945_v5 = vshra.s32 %v4943_v29, 16  ;;  %v4854_v53 = vand.u32 65535, %v10623_v63 }
 0xec0   : > { %4843 = vst.msk [vmem:[#allocation2 + $0xe0] sm:$0xff] %vm986_vm5, %v4835_v6  ;;  %4933 = vmin.xlane.f32.xlu1 %v4932_v9  ;;  %8604 = vmatprep.mubr.msk.f32.mxu1 %vm986_vm5, %v5025_v11  ;;  %v4871_v22 = vcvt.s32.f32 %v4869_v13  ;;  %v4899_v26 = vand.u32 65535, %v10648_v27  ;;  %v4884_v43 = vand.u32 65535, %v10652_v16  ;;  %v4929_v23 = vand.u32 65535, %v4928_v14 }
 0xec1   : > { %4918 = vmin.xlane.f32.xlu0 %v4917_v56  ;;  %8605 = vmatmul.mubr.msk.f32.gmra.mrb[94].mxu1 %vm986_vm5, %v5026_v44  ;;  %v4962_v40 = vcvt.s32.f32 %v4960_v62  ;;  %v4947_v50 = vcvt.s32.f32 %v4945_v5  ;;  %v4856_v41 = vcvt.s32.f32 %v4854_v53  ;;  %v4959_v16 = vand.u32 65535, %v4958_v47 }
 0xec2   : > { %v4901_v63 = vcvt.s32.f32 %v4899_v26  ;;  %v4886_v2 = vcvt.s32.f32 %v4884_v43  ;;  %v4931_v27 = vcvt.s32.f32 %v4929_v23  ;;  %v4944_v62 = vand.u32 65535, %v4943_v29  ;;  %v3579_v29 = vld [vmem:[%s11184_s2] sm:$0xff] }
 0xec4   : > { %4963 = vmin.xlane.f32.xlu1 %v4962_v40  ;;  %v4946_v13 = vcvt.s32.f32 %v4944_v62 }
 0xec5   : > { %4948 = vmin.xlane.f32.xlu0 %v4947_v50 }
 0xf41   : > { %v4874_v39 = vpop.xlane.xlu1 %4873 }
 0xf42   : > { %vm4875_vm9 = vcmp.eq.f32.partialorder %v10628_v4, %v4874_v39  ;;  %v4859_v51 = vpop.xlane.xlu0 %4858  ;;  %v4914_v4 = vand.u32 65535, %v4913_v30  ;;  %v4961_v30 = vcvt.s32.f32 %v4959_v16  ;;  %v4880_v43 = vcvt.f32.s32 %v4874_v39 }
 0xf43   : > { %vm4860_vm10 = vcmp.eq.f32.partialorder %v10631_v34, %v4859_v51  ;;  %v4876_v8 = vsel %vm4875_vm9, %v4871_v22, inf }
 0xf44   : > { %4877 = vmin.xlane.f32.xlu1 %v4876_v8  ;;  %v4861_v31 = vsel %vm4860_vm10, %v4856_v41, inf  ;;  %v4916_v11 = vcvt.s32.f32 %v4914_v4  ;;  %v4881_v23 = vshll.u32 %v4880_v43, 16 }
 0xf45   : > { %4862 = vmin.xlane.f32.xlu0 %v4861_v31 }
 0xf49   : > { %v10704_v54 = vpop.xlane.xlu1 %4903  ;;  %v10706_v19 = vpop.xlane.xlu0 %4888 }
 0xf4a   : > { %vm4905_vm11 = vcmp.eq.f32.partialorder %v4902_v24, %v10704_v54  ;;  %vm4890_vm12 = vcmp.eq.f32.partialorder %v4887_v58, %v10706_v19  ;;  %v4910_v62 = vcvt.f32.s32 %v10704_v54 }
 0xf4b   : > { %v4906_v34 = vsel %vm4905_vm11, %v4901_v63, inf  ;;  %v4891_v59 = vsel %vm4890_vm12, %v4886_v2, inf  ;;  %v4865_v63 = vcvt.f32.s32 %v4859_v51  ;;  %vm6059_vm11 = vcmask 261120  }
 0xf4c   : > { %4907 = vmin.xlane.f32.xlu1 %v4906_v34  ;;  %4892 = vmin.xlane.f32.xlu0 %v4891_v59  ;;  %v4911_v54 = vshll.u32 %v4910_v62, 16  ;;  %vm7238_vm12 = vcmask 1043459  }
 0xf4d   : > { %v10710_v6 = vpop.xlane.xlu1 %4933  ;;  %v4866_v59 = vshll.u32 %v4865_v63, 16 }
 0xf4e   : > { %vm4935_vm13 = vcmp.eq.f32.partialorder %v4932_v9, %v10710_v6  ;;  %v4919_v44 = vpop.xlane.xlu0 %4918 }
 0xf4f   : > { %vm4920_vm14 = vcmp.eq.f32.partialorder %v4917_v56, %v4919_v44  ;;  %v4936_v14 = vsel %vm4935_vm13, %v4931_v27, inf  ;;  %v3580_v56 = vld [vmem:[%s11184_s2 + $0x8] sm:$0xff]  ;;  %vm7312_vm13 = vcmask 60416  }
 0xf50   : > { %4937 = vmin.xlane.f32.xlu1 %v4936_v14  ;;  %v4921_v24 = vsel %vm4920_vm14, %v4916_v11, inf  ;;  %v10725_v53 = vpack.c.bf16 %v3580_v56, %v3579_v29  ;;  %v4895_v14 = vcvt.f32.s32 %v10706_v19 }
 0xf51   : > { %4922 = vmin.xlane.f32.xlu0 %v4921_v24  ;;  %v10713_v58 = vpop.xlane.xlu1 %4963 }
 0xf52   : > { %vm4965_vm15 = vcmp.eq.f32.partialorder %v4962_v40, %v10713_v58  ;;  %v10716_v5 = vpop.xlane.xlu0 %4948  ;;  %9006 = vmatprep.subr.bf16.mxu0 %v10725_v53  ;;  %v3581_v40 = vld [vmem:[%s11184_s2 + $0x10] sm:$0xff]  ;;  %v4896_v56 = vshll.u32 %v4895_v14, 16 }
 0xf53   : > { %vm4950_vm0 = vcmp.eq.f32.partialorder %v4947_v50, %v10716_v5  ;;  %v4966_v47 = vsel %vm4965_vm15, %v4961_v30, inf  ;;  %v3582_v50 = vld [vmem:[%s11184_s2 + $0x18] sm:$0xff]  ;;  %v4940_v30 = vcvt.f32.s32 %v10710_v6  ;;  %v4970_v6 = vcvt.f32.s32 %v10713_v58 }
 0xf54   : > { %4967 = vmin.xlane.f32.xlu1 %v4966_v47  ;;  %v4951_v9 = vsel %vm4950_vm0, %v4946_v13, inf  ;;  %v10734_v22 = vpack.c.bf16 %v3582_v50, %v3581_v40  ;;  %v4925_v13 = vcvt.f32.s32 %v4919_v44 }
 0xf55   : > { %4952 = vmin.xlane.f32.xlu0 %v4951_v9  ;;  %v4941_v50 = vshll.u32 %v4940_v30, 16 }
 0xf56   : > { %9010 = vmatprep.subr.bf16.mxu1 %v10734_v22  ;;  %v4926_v43 = vshll.u32 %v4925_v13, 16 }
 0xf8d   : > { %v10737_v41 = vpop.f32.mrb[90].mxu0 }
 0xf8e   : > { %v10739_v8 = vpop.f32.mrb[91].mxu0 }
 0xf94   : > { %v10741_v31 = vpop.f32.mrb[94].mxu1 }
 0xf95   : > { %v10743_v26 = vpop.f32.mrb[95].mxu1 }
 0xfd1   : > { %v4878_v2 = vpop.xlane.xlu1 %4877 }
 0xfd2   : > { %v4879_v4 = vcvt.f32.s32 %v4878_v2  ;;  %v4863_v34 = vpop.xlane.xlu0 %4862 }
 0xfd3   : > { %v4864_v27 = vcvt.f32.s32 %v4863_v34 }
 0xfd4   : > { %v4882_v16 = vadd.s32 %v4881_v23, %v4879_v4  ;;  %v4955_v23 = vcvt.f32.s32 %v10716_v5 }
 0xfd5   : > { %v4867_v11 = vadd.s32 %v4866_v59, %v4864_v27 }
 0xfd6   : > { %vm4974_vm3 = vcmp.eq.s32.totalorder %v10608_v55, %v4882_v16 }
 0xfd7   : > { %v7656_v24 = vsel %vm4974_vm3, 1.0, %v9175_v32  ;;  %vm4973_vm4 = vcmp.eq.s32.totalorder %v10612_v1, %v4867_v11 }
 0xfd8   : > { %v4998_v39 = vsub.f32 %v7656_v24, %v9436_v46  ;;  %v7655_v51 = vsel %vm4973_vm4, 1.0, %v9175_v32 }
 0xfd9   : > { %v4997_v47 = vsub.f32 %v7655_v51, %v9431_v45  ;;  %v4908_v9 = vpop.xlane.xlu1 %4907  ;;  %v4893_v29 = vpop.xlane.xlu0 %4892 }
 0xfda   : > { %5006 = vst.msk [vmem:[#allocation2 + $0x38] sm:$0xff] %vm986_vm5, %v4998_v39  ;;  %v4909_v55 = vcvt.f32.s32 %v4908_v9  ;;  %v4894_v19 = vcvt.f32.s32 %v4893_v29  ;;  %v4956_v39 = vshll.u32 %v4955_v23, 16  ;;  %v5029_v29 = vld [vmem:[#allocation2 + $0x80] sm:$0xff] }
 0xfdb   : > { %5005 = vst.msk [vmem:[#allocation2 + $0x30] sm:$0xff] %vm986_vm5, %v4997_v47 }
 0xfdc   : > { %v4912_v1 = vadd.s32 %v4911_v54, %v4909_v55  ;;  %v4897_v40 = vadd.s32 %v4896_v56, %v4894_v19  ;;  %v5030_v56 = vld [vmem:[#allocation2 + $0x88] sm:$0xff] }
 0xfdd   : > { %v4938_v63 = vpop.xlane.xlu1 %4937 }
 0xfde   : > { %vm4976_vm1 = vcmp.eq.s32.totalorder %v10635_v57, %v4912_v1  ;;  %vm4975_vm6 = vcmp.eq.s32.totalorder %v10642_v3, %v4897_v40  ;;  %v4939_v44 = vcvt.f32.s32 %v4938_v63  ;;  %v4923_v2 = vpop.xlane.xlu0 %4922  ;;  %v4971_v57 = vshll.u32 %v4970_v6, 16  ;;  %v5031_v1 = vld [vmem:[#allocation2 + $0x90] sm:$0xff]  ;;  %v5034_v63 = vld [vmem:[#allocation2 + $0xa8] sm:$0xff] }
 0xfdf   : > { %v7658_v4 = vsel %vm4976_vm1, 1.0, %v9175_v32  ;;  %v7657_v34 = vsel %vm4975_vm6, 1.0, %v9175_v32  ;;  %v4924_v59 = vcvt.f32.s32 %v4923_v2  ;;  %v5041_v2 = vld [vmem:[#allocation2 + $0xe0] sm:$0xff] }
 0xfe0   : > { %v5000_v27 = vsub.f32 %v7658_v4, %v9436_v46  ;;  %v4999_v16 = vsub.f32 %v7657_v34, %v9431_v45  ;;  %v4942_v11 = vadd.s32 %v4941_v50, %v4939_v44  ;;  %v5040_v44 = vld [vmem:[#allocation2 + $0xd8] sm:$0xff]  ;;  %v5042_v4 = vld [vmem:[#allocation2 + $0xe8] sm:$0xff] }
 0xfe1   : > { %v4927_v62 = vadd.s32 %v4926_v43, %v4924_v59  ;;  %v4968_v58 = vpop.xlane.xlu1 %4967  ;;  %v5020_v14 = vld [vmem:[#allocation2 + $0x38] sm:$0xff] }
 0xfe2   : > { %5008 = vst.msk [vmem:[#allocation2 + $0x78] sm:$0xff] %vm986_vm5, %v5000_v27  ;;  %5007 = vst.msk [vmem:[#allocation2 + $0x70] sm:$0xff] %vm986_vm5, %v4999_v16  ;;  %vm4978_vm7 = vcmp.eq.s32.totalorder %v10661_v38, %v4942_v11  ;;  %v4969_v3 = vcvt.f32.s32 %v4968_v58  ;;  %v4953_v5 = vpop.xlane.xlu0 %4952  ;;  %v5019_v24 = vld [vmem:[#allocation2 + $0x30] sm:$0xff] }
 0xfe3   : > { %v7660_v51 = vsel %vm4978_vm7, 1.0, %v9175_v32  ;;  %vm4977_vm8 = vcmp.eq.s32.totalorder %v10667_v20, %v4927_v62  ;;  %v4954_v30 = vcvt.f32.s32 %v4953_v5  ;;  %8591 = vmatprep.mubr.msk.f32.mxu0 %vm986_vm5, %v5019_v24 }
 0xfe4   : > { %v5002_v13 = vsub.f32 %v7660_v51, %v9436_v46  ;;  %v7659_v47 = vsel %vm4977_vm8, 1.0, %v9175_v32  ;;  %v4972_v9 = vadd.s32 %v4971_v57, %v4969_v3  ;;  %8592 = vmatmul.mubr.msk.f32.gmra.mrb[92].mxu0 %vm986_vm5, %v5020_v14 }
 0xfe5   : > { %v5001_v38 = vsub.f32 %v7659_v47, %v9431_v45  ;;  %v4957_v54 = vadd.s32 %v4956_v39, %v4954_v30  ;;  %8614 = vmatprep.mubr.msk.f32.mxu0 %vm986_vm5, %v5029_v29 }
 0xfe6   : > { %5010 = vst.msk [vmem:[#allocation2 + $0xb8] sm:$0xff] %vm986_vm5, %v5002_v13  ;;  %vm4980_vm9 = vcmp.eq.s32.totalorder %v10681_v18, %v4972_v9  ;;  %v5032_v18 = vld [vmem:[#allocation2 + $0x98] sm:$0xff] }
 0xfe7   : > { %5009 = vst.msk [vmem:[#allocation2 + $0xb0] sm:$0xff] %vm986_vm5, %v5001_v38  ;;  %v7662_v20 = vsel %vm4980_vm9, 1.0, %v9175_v32  ;;  %vm4979_vm10 = vcmp.eq.s32.totalorder %v10687_v42, %v4957_v54  ;;  %v5038_v42 = vld [vmem:[#allocation2 + $0xc8] sm:$0xff] }
 0xfe8   : > { %v5004_v55 = vsub.f32 %v7662_v20, %v9436_v46  ;;  %v7661_v19 = vsel %vm4979_vm10, 1.0, %v9175_v32  ;;  %8615 = vmatmul.mubr.msk.f32.vlgmr.msra.gmra.mrb[94].mxu0 %vm986_vm5, %v5030_v56  ;;  %v5037_v46 = vld [vmem:[#allocation2 + $0xc0] sm:$0xff] }
 0xfe9   : > { %v5003_v40 = vsub.f32 %v7661_v19, %v9431_v45  ;;  %v5027_v50 = vld [vmem:[#allocation2 + $0x70] sm:$0xff]  ;;  %v5028_v43 = vld [vmem:[#allocation2 + $0x78] sm:$0xff]  ;;  %8617 = vmatprep.mubr.msk.f32.mxu0 %vm986_vm5, %v5031_v1  ;;  %9008 = vmatpush3.bf16.msra.mxu0 %v10725_v53  ;;  %v5033_v45 = vld [vmem:[#allocation2 + $0xa0] sm:$0xff] }
 0xfea   : > { %5012 = vst.msk [vmem:[#allocation2 + $0xf8] sm:$0xff] %vm986_vm5, %v5004_v55  ;;  %8607 = vmatprep.mubr.msk.f32.mxu1 %vm986_vm5, %v5027_v50  ;;  %v5039_v53 = vld [vmem:[#allocation2 + $0xd0] sm:$0xff] }
 0xfeb   : > { %5011 = vst.msk [vmem:[#allocation2 + $0xf0] sm:$0xff] %vm986_vm5, %v5003_v40  ;;  %8608 = vmatmul.mubr.msk.f32.gmra.mrb[96].mxu1 %vm986_vm5, %v5028_v43 }
 0xfec   : > { %8630 = vmatprep.mubr.msk.f32.mxu1 %vm986_vm5, %v5037_v46  ;;  %8618 = vmatmul.mubr.msk.f32.gmra.mrb[96].mxu0 %vm986_vm5, %v5032_v18 }
 0xfed   : > { %8620 = vmatprep.mubr.msk.f32.mxu0 %vm986_vm5, %v5033_v45  ;;  %v5036_v23 = vld [vmem:[#allocation2 + $0xb8] sm:$0xff] }
 0xfee   : > { %v5035_v6 = vld [vmem:[#allocation2 + $0xb0] sm:$0xff] }
 0xfef   : > { %8631 = vmatmul.mubr.msk.f32.vlgmr.msra.gmra.mrb[98].mxu1 %vm986_vm5, %v5038_v42 }
 0xff0   : > { %8633 = vmatprep.mubr.msk.f32.mxu1 %vm986_vm5, %v5039_v53  ;;  %8621 = vmatmul.mubr.msk.f32.gmra.mrb[98].mxu0 %vm986_vm5, %v5034_v63 }
 0xff1   : > { %8623 = vmatprep.mubr.msk.f32.mxu0 %vm986_vm5, %v5035_v6  ;;  %9012 = vmatpush3.bf16.msra.mxu1 %v10734_v22  ;;  %v5044_v22 = vld [vmem:[#allocation2 + $0xf8] sm:$0xff] }
 0xff2   : > { %v5043_v34 = vld [vmem:[#allocation2 + $0xf0] sm:$0xff] }
 0xff3   : > { %8634 = vmatmul.mubr.msk.f32.gmra.mrb[100].mxu1 %vm986_vm5, %v5040_v44 }
 0xff4   : > { %8636 = vmatprep.mubr.msk.f32.mxu1 %vm986_vm5, %v5041_v2  ;;  %8624 = vmatmul.mubr.msk.f32.gmra.mrb[100].mxu0 %vm986_vm5, %v5036_v23 }
 0xff5   : > { %8646 = vmatprep.mubr.msk.f32.mxu0 %vm986_vm5, %v10177_v61  ;;  %v3585_v61 = vld [vmem:[%s11184_s2 + $0x30] sm:$0xff] }
 0xff7   : > { %8637 = vmatmul.mubr.msk.f32.gmra.mrb[102].mxu1 %vm986_vm5, %v5042_v4 }
 0xff8   : > { %8639 = vmatprep.mubr.msk.f32.mxu1 %vm986_vm5, %v5043_v34  ;;  %8647 = vmatmul.mubr.msk.f32.vlgmr.msra.gmra.mrb[102].mxu0 %vm986_vm5, %v10175_v37  ;;  %v3584_v37 = vld [vmem:[%s11184_s2 + $0x28] sm:$0xff] }
 0xff9   : > { %8649 = vmatprep.mubr.msk.f32.mxu0 %vm986_vm5, %v10213_v28  ;;  %v3586_v28 = vld [vmem:[%s11184_s2 + $0x38] sm:$0xff] }
 0xffb   : > { %8640 = vmatmul.mubr.msk.f32.gmra.mrb[104].mxu1 %vm986_vm5, %v5044_v22 }
 0xffc   : > { %8662 = vmatprep.mubr.msk.f32.mxu1 %vm986_vm5, %v10478_v10  ;;  %8650 = vmatmul.mubr.msk.f32.gmra.mrb[104].mxu0 %vm986_vm5, %v10211_v17  ;;  %v9013_v17 = vpack.c.bf16 %v3585_v61, %v3584_v37  ;;  %v3589_v61 = vld [vmem:[%s11184_s2 + $0x50] sm:$0xff] }
 0xffd   : > { %8652 = vmatprep.mubr.msk.f32.mxu0 %vm986_vm5, %v10240_v60 }
 0xffe   : > { %9014 = vmatprep.subr.bf16.mxu0 %v9013_v17 }
 0xfff   : > { %8663 = vmatmul.mubr.msk.f32.vlgmr.msra.gmra.mrb[106].mxu1 %vm986_vm5, %v10476_v21  ;;  %9016 = vmatpush3.bf16.msra.mxu0 %v9013_v17  ;;  %v3590_v17 = vld [vmem:[%s11184_s2 + $0x58] sm:$0xff] }
0x1000   : > { %8665 = vmatprep.mubr.msk.f32.mxu1 %vm986_vm5, %v10597_v0  ;;  %8653 = vmatmul.mubr.msk.f32.gmra.mrb[106].mxu0 %vm986_vm5, %v10238_v52  ;;  %v3587_v52 = vld [vmem:[%s11184_s2 + $0x40] sm:$0xff] }
0x1001   : > { %8655 = vmatprep.mubr.msk.f32.mxu0 %vm986_vm5, %v10264_v36  ;;  %v9017_v60 = vpack.c.bf16 %v3587_v52, %v3586_v28  ;;  %v9021_v28 = vpack.c.bf16 %v3590_v17, %v3589_v61  ;;  %v3591_v52 = vld [vmem:[%s11184_s2 + $0x60] sm:$0xff] }
0x1003   : > { %8666 = vmatmul.mubr.msk.f32.gmra.mrb[108].mxu1 %vm986_vm5, %v10595_v15  ;;  %9018 = vmatprep.subr.bf16.mxu0 %v9017_v60 }
0x1004   : > { %8668 = vmatprep.mubr.msk.f32.mxu1 %vm986_vm5, %v10739_v8  ;;  %8656 = vmatmul.mubr.msk.f32.gmra.mrb[108].mxu0 %vm986_vm5, %v10262_v33 }
0x1005   : > { %9020 = vmatpush3.bf16.msra.mxu0 %v9017_v60  ;;  %9022 = vmatprep.subr.bf16.mxu1 %v9021_v28  ;;  %v3592_v60 = vld [vmem:[%s11184_s2 + $0x68] sm:$0xff] }
0x1006   : > { %9024 = vmatpush3.bf16.msra.mxu1 %v9021_v28 }
0x1007   : > { %8669 = vmatmul.mubr.msk.f32.gmra.mrb[110].mxu1 %vm986_vm5, %v10737_v41 }
0x10b7   : > { %v8593_v33 = vpop.f32.mrb[92].mxu0 }
0x10b8   : > { %v5165_v36 = vpop.f32.mrb[93].mxu0 }
0x10b9   : > { %8671 = vmatprep.mubr.msk.f32.mxu1 %vm986_vm5, %v5165_v36 }
0x10ba   : > { %8672 = vmatmul.mubr.msk.f32.gmra.mrb[112].mxu1 %vm986_vm5, %v8593_v33  ;;  %v9025_v33 = vpack.c.bf16 %v3592_v60, %v3591_v52 }
0x10bb   : > { %v8616_v21 = vpop.f32.mrb[94].mxu0  ;;  %8674 = vmatprep.mubr.msk.f32.mxu1 %vm986_vm5, %v10482_v35 }
0x10bc   : > { %v5393_v10 = vpop.f32.mrb[95].mxu0  ;;  %9026 = vmatprep.subr.bf16.mxu1 %v9025_v33 }
0x10bd   : > { %9028 = vmatpush3.bf16.msra.mxu1 %v9025_v33 }
0x10be   : > { %v8609_v15 = vpop.f32.mrb[96].mxu1  ;;  %8675 = vmatmul.mubr.msk.f32.gmra.mrb[114].mxu1 %vm986_vm5, %v10480_v7 }
0x10bf   : > { %v5294_v0 = vpop.f32.mrb[97].mxu1  ;;  %v8619_v41 = vpop.f32.mrb[96].mxu0  ;;  %8677 = vmatprep.mubr.msk.f32.mxu1 %vm986_vm5, %v10601_v49 }
0x10c0   : > { %v5403_v8 = vpop.f32.mrb[97].mxu0 }
0x10c2   : > { %v10852_v59 = vpop.f32.mrb[98].mxu1  ;;  %8678 = vmatmul.mubr.msk.f32.gmra.mrb[116].mxu1 %vm986_vm5, %v10599_v12  ;;  %v3583_v12 = vld [vmem:[%s11184_s2 + $0x20] sm:$0xff] }
0x10c3   : > { %v5522_v27 = vpop.f32.mrb[99].mxu1  ;;  %v8622_v16 = vpop.f32.mrb[98].mxu0  ;;  %8680 = vmatprep.mubr.msk.f32.mxu1 %vm986_vm5, %v10743_v26  ;;  %v5564_v3 = vrot.slane %v3583_v12, %v9354_v48 }
0x10c4   : > { %v5413_v35 = vpop.f32.mrb[99].mxu0 }
0x10c6   : > { %v10858_v11 = vpop.f32.mrb[100].mxu1  ;;  %8681 = vmatmul.mubr.msk.f32.gmra.mrb[118].mxu1 %vm986_vm5, %v10741_v31 }
0x10c7   : > { %v5532_v7 = vpop.f32.mrb[101].mxu1  ;;  %v8625_v62 = vpop.f32.mrb[100].mxu0  ;;  %8683 = vmatprep.mubr.msk.f32.mxu1 %vm986_vm5, %v5294_v0 }
0x10c8   : > { %v5423_v49 = vpop.f32.mrb[101].mxu0 }
0x10ca   : > { %v8638_v58 = vpop.f32.mrb[102].mxu1  ;;  %8684 = vmatmul.mubr.msk.f32.gmra.mrb[120].mxu1 %vm986_vm5, %v8609_v15 }
0x10cb   : > { %v5542_v14 = vpop.f32.mrb[103].mxu1  ;;  %v8648_v26 = vpop.f32.mrb[102].mxu0  ;;  %8686 = vmatprep.mubr.msk.f32.mxu1 %vm986_vm5, %v5393_v10 }
0x10cc   : > { %v5631_v57 = vpop.f32.mrb[103].mxu0  ;;  %v5637_v30 = vadd.f32 %v8648_v26, %v5564_v3 }
0x10cd   : > { %v5632_v47 = vadd.f32 %v5631_v57, %v5564_v3 }
0x10ce   : > { %v8641_v31 = vpop.f32.mrb[104].mxu1  ;;  %8687 = vmatmul.mubr.msk.f32.gmra.mrb[122].mxu1 %vm986_vm5, %v8616_v21 }
0x10cf   : > { %v5552_v5 = vpop.f32.mrb[105].mxu1  ;;  %v8651_v24 = vpop.f32.mrb[104].mxu0  ;;  %8689 = vmatprep.mubr.msk.f32.mxu1 %vm986_vm5, %v5403_v8 }
0x10d0   : > { %v10871_v39 = vadd.f32 %v8651_v24, %v5564_v3  ;;  %v5641_v51 = vpop.f32.mrb[105].mxu0 }
0x10d1   : > { %v10873_v13 = vadd.f32 %v5641_v51, %v5564_v3 }
0x10d2   : > { %v8664_v9 = vpop.f32.mrb[106].mxu1  ;;  %8690 = vmatmul.mubr.msk.f32.gmra.mrb[124].mxu1 %vm986_vm5, %v8619_v41 }
0x10d3   : > { %v5992_v29 = vadd.f32 %v8664_v9, %v5637_v30  ;;  %v5832_v38 = vpop.f32.mrb[107].mxu1  ;;  %v8654_v54 = vpop.f32.mrb[106].mxu0  ;;  %8692 = vmatprep.mubr.msk.f32.mxu1 %vm986_vm5, %v5413_v35 }
0x10d4   : > { %v5991_v20 = vadd.f32 %v5832_v38, %v5632_v47  ;;  %v10877_v56 = vadd.f32 %v8654_v54, %v5564_v3  ;;  %v5651_v55 = vpop.f32.mrb[107].mxu0 }
0x10d5   : > { %v10879_v19 = vadd.f32 %v5651_v55, %v5564_v3  ;;  %v6024_v50 = vmax.f32 %v5992_v29, 0.0 }
0x10d6   : > { %v6023_v1 = vmax.f32 %v5991_v20, 0.0  ;;  %v8667_v40 = vpop.f32.mrb[108].mxu1  ;;  %8693 = vmatmul.mubr.msk.f32.gmra.mrb[126].mxu1 %vm986_vm5, %v8622_v16 }
0x10d7   : > { %v5994_v43 = vadd.f32 %v8667_v40, %v5637_v30  ;;  %v5842_v46 = vpop.f32.mrb[109].mxu1  ;;  %v8657_v18 = vpop.f32.mrb[108].mxu0  ;;  %8695 = vmatprep.mubr.msk.f32.mxu1 %vm986_vm5, %v5423_v49 }
0x10d8   : > { %v5993_v45 = vadd.f32 %v5842_v46, %v5632_v47  ;;  %8718 = vmatprep.mubr.msk.f32.mxu0 %vm6059_vm11, %v6023_v1  ;;  %v10884_v42 = vadd.f32 %v8657_v18, %v5564_v3  ;;  %v5661_v53 = vpop.f32.mrb[109].mxu0  ;;  %v3588_v46 = vld [vmem:[%s11184_s2 + $0x48] sm:$0xff] }
0x10d9   : > { %8719 = vmatmul.mubr.msk.f32.vlgmr.msra.gmra.mrb[110].mxu0 %vm6059_vm11, %v6024_v50  ;;  %v10887_v63 = vadd.f32 %v5661_v53, %v5564_v3  ;;  %v6026_v2 = vmax.f32 %v5994_v43, 0.0 }
0x10da   : > { %v6025_v6 = vmax.f32 %v5993_v45, 0.0  ;;  %v8670_v44 = vpop.f32.mrb[110].mxu1  ;;  %8696 = vmatmul.mubr.msk.f32.gmra.mrb[128].mxu1 %vm986_vm5, %v8625_v62 }
0x10db   : > { %v5996_v23 = vadd.f32 %v8670_v44, %v5637_v30  ;;  %v5852_v4 = vpop.f32.mrb[111].mxu1  ;;  %8698 = vmatprep.mubr.msk.f32.mxu1 %vm986_vm5, %v5522_v27 }
0x10dc   : > { %v5995_v34 = vadd.f32 %v5852_v4, %v5632_v47  ;;  %8721 = vmatprep.mubr.msk.f32.mxu0 %vm6059_vm11, %v6025_v6  ;;  %v10944_v6 = vrot.slane %v3588_v46, %v9354_v48  ;;  %v3594_v46 = vld [vmem:[%s11184_s2 + $0x78] sm:$0xff] }
0x10dd   : > { %8722 = vmatmul.mubr.msk.f32.gmra.mrb[112].mxu0 %vm6059_vm11, %v6026_v2  ;;  %v6028_v37 = vmax.f32 %v5996_v23, 0.0 }
0x10de   : > { %v6027_v22 = vmax.f32 %v5995_v34, 0.0  ;;  %8699 = vmatmul.mubr.msk.f32.gmra.mrb[130].mxu1 %vm986_vm5, %v10852_v59 }
0x10df   : > { %8701 = vmatprep.mubr.msk.f32.mxu1 %vm986_vm5, %v5532_v7 }
0x10e0   : > { %8724 = vmatprep.mubr.msk.f32.mxu0 %vm6059_vm11, %v6027_v22 }
0x10e1   : > { %8725 = vmatmul.mubr.msk.f32.gmra.mrb[114].mxu0 %vm6059_vm11, %v6028_v37 }
0x10e2   : > { %8702 = vmatmul.mubr.msk.f32.gmra.mrb[132].mxu1 %vm986_vm5, %v10858_v11 }
0x10e3   : > { %8704 = vmatprep.mubr.msk.f32.mxu1 %vm986_vm5, %v5542_v14 }
0x10e6   : > { %8705 = vmatmul.mubr.msk.f32.gmra.mrb[134].mxu1 %vm986_vm5, %v8638_v58 }
0x10e7   : > { %8707 = vmatprep.mubr.msk.f32.mxu1 %vm986_vm5, %v5552_v5 }
0x10ea   : > { %8708 = vmatmul.mubr.msk.f32.gmra.mrb[136].mxu1 %vm986_vm5, %v8641_v31 }
0x118d   : > { %v8673_v36 = vpop.f32.mrb[112].mxu1 }
0x118e   : > { %v5998_v21 = vadd.f32 %v8673_v36, %v5637_v30  ;;  %v5862_v10 = vpop.f32.mrb[113].mxu1 }
0x118f   : > { %v5997_v15 = vadd.f32 %v5862_v10, %v5632_v47 }
0x1190   : > { %v6030_v8 = vmax.f32 %v5998_v21, 0.0 }
0x1191   : > { %v6029_v0 = vmax.f32 %v5997_v15, 0.0  ;;  %v8676_v41 = vpop.f32.mrb[114].mxu1 }
0x1192   : > { %v6000_v59 = vadd.f32 %v8676_v41, %v10871_v39  ;;  %v5872_v27 = vpop.f32.mrb[115].mxu1 }
0x1193   : > { %v5999_v16 = vadd.f32 %v5872_v27, %v10873_v13  ;;  %8727 = vmatprep.mubr.msk.f32.mxu0 %vm6059_vm11, %v6029_v0 }
0x1194   : > { %8728 = vmatmul.mubr.msk.f32.gmra.mrb[116].mxu0 %vm6059_vm11, %v6030_v8  ;;  %v6032_v7 = vmax.f32 %v6000_v59, 0.0 }
0x1195   : > { %v6031_v35 = vmax.f32 %v5999_v16, 0.0  ;;  %v8679_v11 = vpop.f32.mrb[116].mxu1 }
0x1196   : > { %v6002_v62 = vadd.f32 %v8679_v11, %v10871_v39  ;;  %v5882_v49 = vpop.f32.mrb[117].mxu1 }
0x1197   : > { %v6001_v58 = vadd.f32 %v5882_v49, %v10873_v13  ;;  %8730 = vmatprep.mubr.msk.f32.mxu0 %vm6059_vm11, %v6031_v35 }
0x1198   : > { %8731 = vmatmul.mubr.msk.f32.gmra.mrb[118].mxu0 %vm6059_vm11, %v6032_v7  ;;  %v6034_v26 = vmax.f32 %v6002_v62, 0.0 }
0x1199   : > { %v6033_v12 = vmax.f32 %v6001_v58, 0.0  ;;  %v8682_v14 = vpop.f32.mrb[118].mxu1 }
0x119a   : > { %v6004_v57 = vadd.f32 %v8682_v14, %v10871_v39  ;;  %v5892_v3 = vpop.f32.mrb[119].mxu1 }
0x119b   : > { %v6003_v31 = vadd.f32 %v5892_v3, %v10873_v13  ;;  %8733 = vmatprep.mubr.msk.f32.mxu0 %vm6059_vm11, %v6033_v12 }
0x119c   : > { %8734 = vmatmul.mubr.msk.f32.gmra.mrb[120].mxu0 %vm6059_vm11, %v6034_v26  ;;  %v6036_v51 = vmax.f32 %v6004_v57, 0.0 }
0x119d   : > { %v6035_v5 = vmax.f32 %v6003_v31, 0.0  ;;  %v8685_v24 = vpop.f32.mrb[120].mxu1 }
0x119e   : > { %v6006_v30 = vadd.f32 %v8685_v24, %v10871_v39  ;;  %v5902_v47 = vpop.f32.mrb[121].mxu1 }
0x119f   : > { %v6005_v9 = vadd.f32 %v5902_v47, %v10873_v13  ;;  %8736 = vmatprep.mubr.msk.f32.mxu0 %vm6059_vm11, %v6035_v5 }
0x11a0   : > { %8737 = vmatmul.mubr.msk.f32.gmra.mrb[122].mxu0 %vm6059_vm11, %v6036_v51  ;;  %v6038_v54 = vmax.f32 %v6006_v30, 0.0 }
0x11a1   : > { %v6037_v29 = vmax.f32 %v6005_v9, 0.0  ;;  %v8688_v38 = vpop.f32.mrb[122].mxu1 }
0x11a2   : > { %v6008_v20 = vadd.f32 %v8688_v38, %v10877_v56  ;;  %v5912_v55 = vpop.f32.mrb[123].mxu1 }
0x11a3   : > { %v6007_v1 = vadd.f32 %v5912_v55, %v10879_v19  ;;  %8739 = vmatprep.mubr.msk.f32.mxu0 %vm6059_vm11, %v6037_v29 }
0x11a4   : > { %8740 = vmatmul.mubr.msk.f32.gmra.mrb[124].mxu0 %vm6059_vm11, %v6038_v54  ;;  %v6040_v50 = vmax.f32 %v6008_v20, 0.0 }
0x11a5   : > { %v6039_v39 = vmax.f32 %v6007_v1, 0.0  ;;  %v8691_v40 = vpop.f32.mrb[124].mxu1 }
0x11a6   : > { %v6010_v13 = vadd.f32 %v8691_v40, %v10877_v56  ;;  %v5922_v43 = vpop.f32.mrb[125].mxu1 }
0x11a7   : > { %v6009_v18 = vadd.f32 %v5922_v43, %v10879_v19  ;;  %8742 = vmatprep.mubr.msk.f32.mxu0 %vm6059_vm11, %v6039_v39 }
0x11a8   : > { %8743 = vmatmul.mubr.msk.f32.gmra.mrb[126].mxu0 %vm6059_vm11, %v6040_v50  ;;  %v6042_v44 = vmax.f32 %v6010_v13, 0.0 }
0x11a9   : > { %v6041_v45 = vmax.f32 %v6009_v18, 0.0  ;;  %v8694_v53 = vpop.f32.mrb[126].mxu1 }
0x11aa   : > { %v6012_v2 = vadd.f32 %v8694_v53, %v10877_v56  ;;  %v5932_v23 = vpop.f32.mrb[127].mxu1 }
0x11ab   : > { %v6011_v4 = vadd.f32 %v5932_v23, %v10879_v19  ;;  %8745 = vmatprep.mubr.msk.f32.mxu0 %vm6059_vm11, %v6041_v45 }
0x11ac   : > { %v8720_v34 = vpop.f32.mrb[110].mxu0  ;;  %8746 = vmatmul.mubr.msk.f32.gmra.mrb[128].mxu0 %vm6059_vm11, %v6042_v44  ;;  %v6044_v28 = vmax.f32 %v6012_v2, 0.0 }
0x11ad   : > { %v6228_v22 = vadd.f32 %v8720_v34, %v10944_v6  ;;  %v6043_v37 = vmax.f32 %v6011_v4, 0.0  ;;  %v6222_v61 = vpop.f32.mrb[111].mxu0  ;;  %v8697_v17 = vpop.f32.mrb[128].mxu1 }
0x11ae   : > { %v6223_v52 = vadd.f32 %v6222_v61, %v10944_v6  ;;  %v6014_v60 = vadd.f32 %v8697_v17, %v10877_v56  ;;  %v5942_v33 = vpop.f32.mrb[129].mxu1 }
0x11af   : > { %v6013_v36 = vadd.f32 %v5942_v33, %v10879_v19  ;;  %8748 = vmatprep.mubr.msk.f32.mxu0 %vm6059_vm11, %v6043_v37  ;;  %v6382_v15 = vmax.f32 %v6228_v22, 0.0 }
0x11b0   : > { %v6381_v21 = vmax.f32 %v6223_v52, 0.0  ;;  %v8723_v10 = vpop.f32.mrb[112].mxu0  ;;  %8749 = vmatmul.mubr.msk.f32.gmra.mrb[130].mxu0 %vm6059_vm11, %v6044_v28  ;;  %v6046_v27 = vmax.f32 %v6014_v60, 0.0 }
0x11b1   : > { %v6238_v0 = vadd.f32 %v8723_v10, %v10944_v6  ;;  %v6045_v41 = vmax.f32 %v6013_v36, 0.0  ;;  %v6232_v8 = vpop.f32.mrb[113].mxu0  ;;  %v8700_v59 = vpop.f32.mrb[130].mxu1 }
0x11b2   : > { %v6233_v16 = vadd.f32 %v6232_v8, %v10944_v6  ;;  %8774 = vmatprep.mubr.msk.f32.mxu1 %vm6059_vm11, %v6381_v21  ;;  %v6016_v56 = vadd.f32 %v8700_v59, %v10884_v42  ;;  %v5952_v19 = vpop.f32.mrb[131].mxu1 }
0x11b3   : > { %8775 = vmatmul.mubr.msk.f32.vlgmr.msra.gmra.mrb[138].mxu1 %vm6059_vm11, %v6382_v15  ;;  %v6015_v35 = vadd.f32 %v5952_v19, %v10887_v63  ;;  %8751 = vmatprep.mubr.msk.f32.mxu0 %vm6059_vm11, %v6045_v41  ;;  %v6384_v62 = vmax.f32 %v6238_v0, 0.0 }
0x11b4   : > { %v6383_v11 = vmax.f32 %v6233_v16, 0.0  ;;  %v8726_v7 = vpop.f32.mrb[114].mxu0  ;;  %8752 = vmatmul.mubr.msk.f32.gmra.mrb[132].mxu0 %vm6059_vm11, %v6046_v27  ;;  %v6048_v26 = vmax.f32 %v6016_v56, 0.0 }
0x11b5   : > { %v6248_v49 = vadd.f32 %v8726_v7, %v10944_v6  ;;  %v6047_v58 = vmax.f32 %v6015_v35, 0.0  ;;  %v6242_v12 = vpop.f32.mrb[115].mxu0  ;;  %v8703_v14 = vpop.f32.mrb[132].mxu1 }
0x11b6   : > { %v6243_v57 = vadd.f32 %v6242_v12, %v10944_v6  ;;  %8777 = vmatprep.mubr.msk.f32.mxu1 %vm6059_vm11, %v6383_v11  ;;  %v6018_v3 = vadd.f32 %v8703_v14, %v10884_v42  ;;  %v5962_v31 = vpop.f32.mrb[133].mxu1 }
0x11b7   : > { %8778 = vmatmul.mubr.msk.f32.gmra.mrb[140].mxu1 %vm6059_vm11, %v6384_v62  ;;  %v6017_v5 = vadd.f32 %v5962_v31, %v10887_v63  ;;  %8754 = vmatprep.mubr.msk.f32.mxu0 %vm6059_vm11, %v6047_v58  ;;  %v6386_v51 = vmax.f32 %v6248_v49, 0.0 }
0x11b8   : > { %v6385_v24 = vmax.f32 %v6243_v57, 0.0  ;;  %8755 = vmatmul.mubr.msk.f32.gmra.mrb[134].mxu0 %vm6059_vm11, %v6048_v26  ;;  %v6050_v9 = vmax.f32 %v6018_v3, 0.0 }
0x11b9   : > { %v6049_v30 = vmax.f32 %v6017_v5, 0.0  ;;  %v8706_v47 = vpop.f32.mrb[134].mxu1  ;;  %v3593_v5 = vld [vmem:[%s11184_s2 + $0x70] sm:$0xff] }
0x11ba   : > { %8780 = vmatprep.mubr.msk.f32.mxu1 %vm6059_vm11, %v6385_v24  ;;  %v6020_v29 = vadd.f32 %v8706_v47, %v10884_v42  ;;  %v5972_v38 = vpop.f32.mrb[135].mxu1 }
0x11bb   : > { %8781 = vmatmul.mubr.msk.f32.gmra.mrb[142].mxu1 %vm6059_vm11, %v6386_v51  ;;  %v6019_v54 = vadd.f32 %v5972_v38, %v10887_v63  ;;  %8757 = vmatprep.mubr.msk.f32.mxu0 %vm6059_vm11, %v6049_v30 }
0x11bc   : > { %8758 = vmatmul.mubr.msk.f32.gmra.mrb[136].mxu0 %vm6059_vm11, %v6050_v9  ;;  %v6052_v1 = vmax.f32 %v6020_v29, 0.0  ;;  %v11021_v29 = vrot.slane %v3593_v5, %v9354_v48 }
0x11bd   : > { %v6051_v20 = vmax.f32 %v6019_v54, 0.0  ;;  %v8709_v55 = vpop.f32.mrb[136].mxu1 }
0x11be   : > { %v6022_v39 = vadd.f32 %v8709_v55, %v10884_v42  ;;  %v5982_v40 = vpop.f32.mrb[137].mxu1  ;;  %v3595_v42 = vld [vmem:[%s11184_s2 + $0x80] sm:$0xff] }
0x11bf   : > { %v6021_v50 = vadd.f32 %v5982_v40, %v10887_v63  ;;  %8760 = vmatprep.mubr.msk.f32.mxu0 %vm6059_vm11, %v6051_v20  ;;  %v9029_v18 = vpack.c.bf16 %v3595_v42, %v3594_v46 }
0x11c0   : > { %8761 = vmatmul.mubr.msk.f32.gmra.mrb[138].mxu0 %vm6059_vm11, %v6052_v1  ;;  %v6054_v43 = vmax.f32 %v6022_v39, 0.0 }
0x11c1   : > { %v6053_v13 = vmax.f32 %v6021_v50, 0.0  ;;  %9030 = vmatprep.subr.bf16.mxu0 %v9029_v18 }
0x11c2   : > { %9032 = vmatpush3.bf16.msra.mxu0 %v9029_v18 }
0x11c3   : > { %8763 = vmatprep.mubr.msk.f32.mxu0 %vm6059_vm11, %v6053_v13 }
0x11c4   : > { %8764 = vmatmul.mubr.msk.f32.gmra.mrb[140].mxu0 %vm6059_vm11, %v6054_v43 }
0x1267   : > { %v8729_v63 = vpop.f32.mrb[116].mxu0 }
0x1268   : > { %v6258_v45 = vadd.f32 %v8729_v63, %v10944_v6  ;;  %v6252_v53 = vpop.f32.mrb[117].mxu0 }
0x1269   : > { %v6253_v44 = vadd.f32 %v6252_v53, %v10944_v6 }
0x126a   : > { %v6388_v4 = vmax.f32 %v6258_v45, 0.0 }
0x126b   : > { %v6387_v2 = vmax.f32 %v6253_v44, 0.0  ;;  %v8732_v23 = vpop.f32.mrb[118].mxu0 }
0x126c   : > { %v6268_v34 = vadd.f32 %v8732_v23, %v10944_v6  ;;  %v6262_v22 = vpop.f32.mrb[119].mxu0 }
0x126d   : > { %v6263_v37 = vadd.f32 %v6262_v22, %v10944_v6  ;;  %8783 = vmatprep.mubr.msk.f32.mxu1 %vm6059_vm11, %v6387_v2 }
0x126e   : > { %8784 = vmatmul.mubr.msk.f32.gmra.mrb[144].mxu1 %vm6059_vm11, %v6388_v4  ;;  %v6390_v28 = vmax.f32 %v6268_v34, 0.0 }
0x126f   : > { %v6389_v61 = vmax.f32 %v6263_v37, 0.0  ;;  %v8735_v17 = vpop.f32.mrb[120].mxu0 }
0x1270   : > { %v6278_v52 = vadd.f32 %v8735_v17, %v10944_v6  ;;  %v6272_v60 = vpop.f32.mrb[121].mxu0 }
0x1271   : > { %v6273_v33 = vadd.f32 %v6272_v60, %v10944_v6  ;;  %8786 = vmatprep.mubr.msk.f32.mxu1 %vm6059_vm11, %v6389_v61 }
0x1272   : > { %8787 = vmatmul.mubr.msk.f32.gmra.mrb[146].mxu1 %vm6059_vm11, %v6390_v28  ;;  %v6392_v10 = vmax.f32 %v6278_v52, 0.0 }
0x1273   : > { %v6391_v36 = vmax.f32 %v6273_v33, 0.0  ;;  %v8738_v21 = vpop.f32.mrb[122].mxu0 }
0x1274   : > { %v6288_v15 = vadd.f32 %v8738_v21, %v10944_v6  ;;  %v6282_v0 = vpop.f32.mrb[123].mxu0 }
0x1275   : > { %v6283_v41 = vadd.f32 %v6282_v0, %v10944_v6  ;;  %8789 = vmatprep.mubr.msk.f32.mxu1 %vm6059_vm11, %v6391_v36 }
0x1276   : > { %8790 = vmatmul.mubr.msk.f32.gmra.mrb[148].mxu1 %vm6059_vm11, %v6392_v10  ;;  %v6394_v27 = vmax.f32 %v6288_v15, 0.0 }
0x1277   : > { %v6393_v8 = vmax.f32 %v6283_v41, 0.0  ;;  %v8741_v59 = vpop.f32.mrb[124].mxu0 }
0x1278   : > { %v6298_v16 = vadd.f32 %v8741_v59, %v10944_v6  ;;  %v6292_v56 = vpop.f32.mrb[125].mxu0 }
0x1279   : > { %v6293_v19 = vadd.f32 %v6292_v56, %v10944_v6  ;;  %8792 = vmatprep.mubr.msk.f32.mxu1 %vm6059_vm11, %v6393_v8 }
0x127a   : > { %8793 = vmatmul.mubr.msk.f32.gmra.mrb[150].mxu1 %vm6059_vm11, %v6394_v27  ;;  %v6396_v7 = vmax.f32 %v6298_v16, 0.0 }
0x127b   : > { %v6395_v35 = vmax.f32 %v6293_v19, 0.0  ;;  %v8744_v11 = vpop.f32.mrb[126].mxu0 }
0x127c   : > { %v6308_v62 = vadd.f32 %v8744_v11, %v10944_v6  ;;  %v6302_v49 = vpop.f32.mrb[127].mxu0 }
0x127d   : > { %v6303_v58 = vadd.f32 %v6302_v49, %v10944_v6  ;;  %8795 = vmatprep.mubr.msk.f32.mxu1 %vm6059_vm11, %v6395_v35 }
0x127e   : > { %8796 = vmatmul.mubr.msk.f32.gmra.mrb[152].mxu1 %vm6059_vm11, %v6396_v7  ;;  %v6398_v26 = vmax.f32 %v6308_v62, 0.0 }
0x127f   : > { %v6397_v12 = vmax.f32 %v6303_v58, 0.0  ;;  %v8747_v14 = vpop.f32.mrb[128].mxu0 }
0x1280   : > { %v6318_v57 = vadd.f32 %v8747_v14, %v10944_v6  ;;  %v6312_v3 = vpop.f32.mrb[129].mxu0 }
0x1281   : > { %v6313_v31 = vadd.f32 %v6312_v3, %v10944_v6  ;;  %8798 = vmatprep.mubr.msk.f32.mxu1 %vm6059_vm11, %v6397_v12 }
0x1282   : > { %8799 = vmatmul.mubr.msk.f32.gmra.mrb[154].mxu1 %vm6059_vm11, %v6398_v26  ;;  %v6400_v30 = vmax.f32 %v6318_v57, 0.0 }
0x1283   : > { %v6399_v24 = vmax.f32 %v6313_v31, 0.0  ;;  %v8750_v51 = vpop.f32.mrb[130].mxu0 }
0x1284   : > { %v6328_v47 = vadd.f32 %v8750_v51, %v10944_v6  ;;  %v6322_v9 = vpop.f32.mrb[131].mxu0  ;;  %v3596_v51 = vld [vmem:[%s11184_s2 + $0x88] sm:$0xff] }
0x1285   : > { %v6323_v38 = vadd.f32 %v6322_v9, %v10944_v6  ;;  %8801 = vmatprep.mubr.msk.f32.mxu1 %vm6059_vm11, %v6399_v24 }
0x1286   : > { %v8776_v54 = vpop.f32.mrb[138].mxu1  ;;  %8802 = vmatmul.mubr.msk.f32.gmra.mrb[156].mxu1 %vm6059_vm11, %v6400_v30  ;;  %v6402_v39 = vmax.f32 %v6328_v47, 0.0  ;;  %v3597_v30 = vld [vmem:[%s11184_s2 + $0x90] sm:$0xff] }
0x1287   : > { %v6401_v20 = vmax.f32 %v6323_v38, 0.0  ;;  %v6579_v55 = vpop.f32.mrb[139].mxu1  ;;  %v8753_v1 = vpop.f32.mrb[132].mxu0  ;;  %v6585_v13 = vadd.f32 %v8776_v54, %v11021_v29  ;;  %v9033_v47 = vpack.c.bf16 %v3597_v30, %v3596_v51 }
0x1288   : > { %v6338_v40 = vadd.f32 %v8753_v1, %v10944_v6  ;;  %v6332_v50 = vpop.f32.mrb[133].mxu0  ;;  %v6580_v46 = vadd.f32 %v6579_v55, %v11021_v29 }
0x1289   : > { %v6333_v43 = vadd.f32 %v6332_v50, %v10944_v6  ;;  %8804 = vmatprep.mubr.msk.f32.mxu1 %vm6059_vm11, %v6401_v20  ;;  %v6739_v34 = vmax.f32 %v6585_v13, 0.0  ;;  %9034 = vmatprep.subr.bf16.mxu0 %v9033_v47 }
0x128a   : > { %v8779_v42 = vpop.f32.mrb[140].mxu1  ;;  %8805 = vmatmul.mubr.msk.f32.gmra.mrb[158].mxu1 %vm6059_vm11, %v6402_v39  ;;  %v6404_v44 = vmax.f32 %v6338_v40, 0.0  ;;  %v6738_v61 = vmax.f32 %v6580_v46, 0.0  ;;  %9036 = vmatpush3.bf16.msra.mxu0 %v9033_v47 }
0x128b   : > { %v6595_v18 = vadd.f32 %v8779_v42, %v11021_v29  ;;  %v6403_v63 = vmax.f32 %v6333_v43, 0.0  ;;  %v6589_v45 = vpop.f32.mrb[141].mxu1  ;;  %v8756_v53 = vpop.f32.mrb[134].mxu0  ;;  %9037 = vmatprep.subr.bf16.mxu0 %v9173_v25 }
0x128c   : > { %v6590_v2 = vadd.f32 %v6589_v45, %v11021_v29  ;;  %v6348_v23 = vadd.f32 %v8756_v53, %v10944_v6  ;;  %v6342_v4 = vpop.f32.mrb[135].mxu0 }
0x128d   : > { %v6741_v22 = vmax.f32 %v6595_v18, 0.0  ;;  %v6343_v37 = vadd.f32 %v6342_v4, %v10944_v6  ;;  %8807 = vmatprep.mubr.msk.f32.mxu1 %vm6059_vm11, %v6403_v63 }
0x128e   : > { %v6740_v17 = vmax.f32 %v6590_v2, 0.0  ;;  %v8782_v28 = vpop.f32.mrb[142].mxu1  ;;  %8808 = vmatmul.mubr.msk.f32.gmra.mrb[160].mxu1 %vm6059_vm11, %v6404_v44  ;;  %v6406_v15 = vmax.f32 %v6348_v23, 0.0 }
0x128f   : > { %v6771_v52 = vadd.f32 %v6741_v22, %v6739_v34  ;;  %v6605_v60 = vadd.f32 %v8782_v28, %v11021_v29  ;;  %v6405_v33 = vmax.f32 %v6343_v37, 0.0  ;;  %v6599_v36 = vpop.f32.mrb[143].mxu1  ;;  %v8759_v21 = vpop.f32.mrb[136].mxu0 }
0x1290   : > { %v6770_v10 = vadd.f32 %v6740_v17, %v6738_v61  ;;  %v6600_v0 = vadd.f32 %v6599_v36, %v11021_v29  ;;  %v6358_v41 = vadd.f32 %v8759_v21, %v10944_v6  ;;  %v6352_v8 = vpop.f32.mrb[137].mxu0 }
0x1291   : > { %v6743_v59 = vmax.f32 %v6605_v60, 0.0  ;;  %v6353_v27 = vadd.f32 %v6352_v8, %v10944_v6  ;;  %8810 = vmatprep.mubr.msk.f32.mxu1 %vm6059_vm11, %v6405_v33 }
0x1292   : > { %v6742_v16 = vmax.f32 %v6600_v0, 0.0  ;;  %8811 = vmatmul.mubr.msk.f32.gmra.mrb[162].mxu1 %vm6059_vm11, %v6406_v15  ;;  %v6408_v7 = vmax.f32 %v6358_v41, 0.0 }
0x1293   : > { %v6779_v56 = vadd.f32 %v6771_v52, %v6743_v59  ;;  %v6407_v19 = vmax.f32 %v6353_v27, 0.0  ;;  %v8762_v35 = vpop.f32.mrb[138].mxu0 }
0x1294   : > { %v6778_v11 = vadd.f32 %v6770_v10, %v6742_v16  ;;  %v6368_v62 = vadd.f32 %v8762_v35, %v10944_v6  ;;  %v6362_v49 = vpop.f32.mrb[139].mxu0 }
0x1295   : > { %v6363_v58 = vadd.f32 %v6362_v49, %v10944_v6  ;;  %8813 = vmatprep.mubr.msk.f32.mxu1 %vm6059_vm11, %v6407_v19 }
0x1296   : > { %8814 = vmatmul.mubr.msk.f32.gmra.mrb[164].mxu1 %vm6059_vm11, %v6408_v7  ;;  %v6410_v26 = vmax.f32 %v6368_v62, 0.0 }
0x1297   : > { %v6409_v12 = vmax.f32 %v6363_v58, 0.0  ;;  %v8765_v14 = vpop.f32.mrb[140].mxu0 }
0x1298   : > { %v6378_v57 = vadd.f32 %v8765_v14, %v10944_v6  ;;  %v6372_v3 = vpop.f32.mrb[141].mxu0 }
0x1299   : > { %v6373_v31 = vadd.f32 %v6372_v3, %v10944_v6  ;;  %8816 = vmatprep.mubr.msk.f32.mxu1 %vm6059_vm11, %v6409_v12 }
0x129a   : > { %8817 = vmatmul.mubr.msk.f32.gmra.mrb[166].mxu1 %vm6059_vm11, %v6410_v26  ;;  %v6412_v24 = vmax.f32 %v6378_v57, 0.0 }
0x129b   : > { %v6411_v5 = vmax.f32 %v6373_v31, 0.0 }
0x129d   : > { %8819 = vmatprep.mubr.msk.f32.mxu1 %vm6059_vm11, %v6411_v5 }
0x129e   : > { %8820 = vmatmul.mubr.msk.f32.gmra.mrb[168].mxu1 %vm6059_vm11, %v6412_v24 }
0x1341   : > { %v8785_v6 = vpop.f32.mrb[144].mxu1 }
0x1342   : > { %v6615_v9 = vadd.f32 %v8785_v6, %v11021_v29  ;;  %v6609_v38 = vpop.f32.mrb[145].mxu1 }
0x1343   : > { %v6610_v54 = vadd.f32 %v6609_v38, %v11021_v29 }
0x1344   : > { %v6745_v20 = vmax.f32 %v6615_v9, 0.0 }
0x1345   : > { %v6744_v55 = vmax.f32 %v6610_v54, 0.0  ;;  %v8788_v1 = vpop.f32.mrb[146].mxu1 }
0x1346   : > { %v6787_v39 = vadd.f32 %v6779_v56, %v6745_v20  ;;  %v6619_v40 = vpop.f32.mrb[147].mxu1  ;;  %v6625_v13 = vadd.f32 %v8788_v1, %v11021_v29 }
0x1347   : > { %v6786_v50 = vadd.f32 %v6778_v11, %v6744_v55  ;;  %v6620_v46 = vadd.f32 %v6619_v40, %v11021_v29 }
0x1348   : > { %v6795_v18 = vmul.f32 0.25, %v6787_v39  ;;  %v6747_v44 = vmax.f32 %v6625_v13, 0.0 }
0x1349   : > { %v6794_v43 = vmul.f32 0.25, %v6786_v50  ;;  %v8791_v42 = vpop.f32.mrb[148].mxu1  ;;  %v6746_v23 = vmax.f32 %v6620_v46, 0.0 }
0x134a   : > { %v6635_v63 = vadd.f32 %v8791_v42, %v11021_v29  ;;  %v6629_v45 = vpop.f32.mrb[149].mxu1 }
0x134b   : > { %v6630_v53 = vadd.f32 %v6629_v45, %v11021_v29  ;;  %8830 = vmatprep.mubr.msk.f32.mxu0 %vm6059_vm11, %v6794_v43 }
0x134c   : > { %v6749_v2 = vmax.f32 %v6635_v63, 0.0  ;;  %8831 = vmatmul.mubr.msk.f32.vlgmr.msra.gmra.mrb[142].mxu0 %vm6059_vm11, %v6795_v18 }
0x134d   : > { %v6748_v4 = vmax.f32 %v6630_v53, 0.0  ;;  %v8794_v34 = vpop.f32.mrb[150].mxu1 }
0x134e   : > { %v6773_v22 = vadd.f32 %v6749_v2, %v6747_v44  ;;  %v6645_v37 = vadd.f32 %v8794_v34, %v11021_v29  ;;  %v6639_v61 = vpop.f32.mrb[151].mxu1 }
0x134f   : > { %v6772_v17 = vadd.f32 %v6748_v4, %v6746_v23  ;;  %v6640_v28 = vadd.f32 %v6639_v61, %v11021_v29 }
0x1350   : > { %v6751_v52 = vmax.f32 %v6645_v37, 0.0 }
0x1351   : > { %v6750_v60 = vmax.f32 %v6640_v28, 0.0  ;;  %v8797_v33 = vpop.f32.mrb[152].mxu1 }
0x1352   : > { %v6781_v36 = vadd.f32 %v6773_v22, %v6751_v52  ;;  %v6655_v21 = vadd.f32 %v8797_v33, %v11021_v29  ;;  %v6649_v10 = vpop.f32.mrb[153].mxu1 }
0x1353   : > { %v6780_v15 = vadd.f32 %v6772_v17, %v6750_v60  ;;  %v6650_v0 = vadd.f32 %v6649_v10, %v11021_v29 }
0x1354   : > { %v6753_v41 = vmax.f32 %v6655_v21, 0.0 }
0x1355   : > { %v6752_v8 = vmax.f32 %v6650_v0, 0.0  ;;  %v8800_v59 = vpop.f32.mrb[154].mxu1 }
0x1356   : > { %v6789_v27 = vadd.f32 %v6781_v36, %v6753_v41  ;;  %v6659_v16 = vpop.f32.mrb[155].mxu1  ;;  %v6665_v19 = vadd.f32 %v8800_v59, %v11021_v29 }
0x1357   : > { %v6788_v56 = vadd.f32 %v6780_v15, %v6752_v8  ;;  %v6660_v11 = vadd.f32 %v6659_v16, %v11021_v29 }
0x1358   : > { %v6797_v62 = vmul.f32 0.25, %v6789_v27  ;;  %v6755_v14 = vmax.f32 %v6665_v19, 0.0 }
0x1359   : > { %v6796_v35 = vmul.f32 0.25, %v6788_v56  ;;  %v8803_v7 = vpop.f32.mrb[156].mxu1  ;;  %v6754_v57 = vmax.f32 %v6660_v11, 0.0 }
0x135a   : > { %v6675_v49 = vadd.f32 %v8803_v7, %v11021_v29  ;;  %v6669_v58 = vpop.f32.mrb[157].mxu1 }
0x135b   : > { %v6670_v12 = vadd.f32 %v6669_v58, %v11021_v29  ;;  %8833 = vmatprep.mubr.msk.f32.mxu0 %vm6059_vm11, %v6796_v35 }
0x135c   : > { %v6757_v26 = vmax.f32 %v6675_v49, 0.0  ;;  %8834 = vmatmul.mubr.msk.f32.gmra.mrb[144].mxu0 %vm6059_vm11, %v6797_v62  ;;  %v3598_v62 = vld [vmem:[%s11184_s2 + $0x98] sm:$0xff] }
0x135d   : > { %v6756_v3 = vmax.f32 %v6670_v12, 0.0  ;;  %v8806_v31 = vpop.f32.mrb[158].mxu1  ;;  %v6805_v49 = vrot.slane %v3598_v62, %v9354_v48 }
0x135e   : > { %v6775_v5 = vadd.f32 %v6757_v26, %v6755_v14  ;;  %v6685_v24 = vadd.f32 %v8806_v31, %v11021_v29  ;;  %v6679_v51 = vpop.f32.mrb[159].mxu1 }
0x135f   : > { %v6774_v30 = vadd.f32 %v6756_v3, %v6754_v57  ;;  %v6680_v47 = vadd.f32 %v6679_v51, %v11021_v29  ;;  %v9177_v57 = vmov 0.0625  }
0x1360   : > { %v6759_v6 = vmax.f32 %v6685_v24, 0.0 }
0x1361   : > { %v6758_v9 = vmax.f32 %v6680_v47, 0.0  ;;  %v8809_v38 = vpop.f32.mrb[160].mxu1 }
0x1362   : > { %v6783_v54 = vadd.f32 %v6775_v5, %v6759_v6  ;;  %v6695_v20 = vadd.f32 %v8809_v38, %v11021_v29  ;;  %v6689_v55 = vpop.f32.mrb[161].mxu1 }
0x1363   : > { %v6782_v1 = vadd.f32 %v6774_v30, %v6758_v9  ;;  %v6690_v39 = vadd.f32 %v6689_v55, %v11021_v29 }
0x1364   : > { %v6761_v40 = vmax.f32 %v6695_v20, 0.0 }
0x1365   : > { %v6760_v50 = vmax.f32 %v6690_v39, 0.0  ;;  %v8812_v13 = vpop.f32.mrb[162].mxu1 }
0x1366   : > { %v6791_v43 = vadd.f32 %v6783_v54, %v6761_v40  ;;  %v6699_v46 = vpop.f32.mrb[163].mxu1  ;;  %v6705_v18 = vadd.f32 %v8812_v13, %v11021_v29  ;;  %v7218_v40 = vld [vmem:[%s11185_s3] sm:$0xff] }
0x1367   : > { %v6790_v42 = vadd.f32 %v6782_v1, %v6760_v50  ;;  %v6700_v45 = vadd.f32 %v6699_v46, %v11021_v29  ;;  %v7219_v50 = vld [vmem:[%s11185_s3 + $0x8] sm:$0xff] }
0x1368   : > { %v6799_v44 = vmul.f32 0.25, %v6791_v43  ;;  %v6763_v34 = vmax.f32 %v6705_v18, 0.0  ;;  %v9050_v13 = vpack.c.bf16 %v7219_v50, %v7218_v40  ;;  %v7220_v43 = vld [vmem:[%s11185_s3 + $0x10] sm:$0xff] }
0x1369   : > { %v6798_v63 = vmul.f32 0.25, %v6790_v42  ;;  %v8815_v53 = vpop.f32.mrb[164].mxu1  ;;  %v6762_v37 = vmax.f32 %v6700_v45, 0.0 }
0x136a   : > { %v6715_v2 = vadd.f32 %v8815_v53, %v11021_v29  ;;  %v6709_v23 = vpop.f32.mrb[165].mxu1 }
0x136b   : > { %v6710_v4 = vadd.f32 %v6709_v23, %v11021_v29  ;;  %8836 = vmatprep.mubr.msk.f32.mxu0 %vm6059_vm11, %v6798_v63 }
0x136c   : > { %v6765_v22 = vmax.f32 %v6715_v2, 0.0  ;;  %8837 = vmatmul.mubr.msk.f32.gmra.mrb[146].mxu0 %vm6059_vm11, %v6799_v44 }
0x136d   : > { %v6764_v61 = vmax.f32 %v6710_v4, 0.0  ;;  %v8818_v17 = vpop.f32.mrb[166].mxu1 }
0x136e   : > { %v6777_v28 = vadd.f32 %v6765_v22, %v6763_v34  ;;  %v6725_v52 = vadd.f32 %v8818_v17, %v11021_v29  ;;  %v6719_v60 = vpop.f32.mrb[167].mxu1  ;;  %v7222_v17 = vld [vmem:[%s11185_s3 + $0x20] sm:$0xff] }
0x136f   : > { %v6776_v33 = vadd.f32 %v6764_v61, %v6762_v37  ;;  %v6720_v36 = vadd.f32 %v6719_v60, %v11021_v29 }
0x1370   : > { %v6767_v21 = vmax.f32 %v6725_v52, 0.0 }
0x1371   : > { %v6766_v10 = vmax.f32 %v6720_v36, 0.0  ;;  %v8821_v15 = vpop.f32.mrb[168].mxu1 }
0x1372   : > { %v6785_v0 = vadd.f32 %v6777_v28, %v6767_v21  ;;  %v6735_v41 = vadd.f32 %v8821_v15, %v11021_v29  ;;  %v6729_v8 = vpop.f32.mrb[169].mxu1  ;;  %v7226_v28 = vrot.slane %v7222_v17, %v9354_v48 }
0x1373   : > { %v6784_v59 = vadd.f32 %v6776_v33, %v6766_v10  ;;  %v6730_v27 = vadd.f32 %v6729_v8, %v11021_v29 }
0x1374   : > { %v6769_v16 = vmax.f32 %v6735_v41, 0.0 }
0x1375   : > { %v6768_v56 = vmax.f32 %v6730_v27, 0.0 }
0x1376   : > { %v6793_v19 = vadd.f32 %v6785_v0, %v6769_v16 }
0x1377   : > { %v6792_v35 = vadd.f32 %v6784_v59, %v6768_v56 }
0x1378   : > { %v6801_v7 = vmul.f32 0.25, %v6793_v19 }
0x1379   : > { %v6800_v11 = vmul.f32 0.25, %v6792_v35 }
0x137b   : > { %8839 = vmatprep.mubr.msk.f32.mxu0 %vm6059_vm11, %v6800_v11 }
0x137c   : > { %8840 = vmatmul.mubr.msk.f32.gmra.mrb[148].mxu0 %vm6059_vm11, %v6801_v7 }
0x137d   : > { %8846 = vmatprep.mubr.msk.f32.mxu0 %vm9174_vm2, %v9175_v32 }
0x141f   : > { %v8832_v29 = vpop.f32.mrb[142].mxu0 }
0x1420   : > { %v6902_v58 = vadd.f32 %v8832_v29, %v6805_v49  ;;  %v6896_v12 = vpop.f32.mrb[143].mxu0 }
0x1421   : > { %v6897_v14 = vadd.f32 %v6896_v12, %v6805_v49 }
0x1423   : > { %v9038_v26 = vpack.c.bf16 %v6902_v58, %v6897_v14 }
0x1425   : > { %9039 = vmatpush3.bf16.msra.mxu0 %v9038_v26 }
0x1426   : > { %9040 = vmatprep.subr.bf16.mxu0 %v9173_v25 }
0x1428   : > { %8847 = vmatmul.mubr.msk.f32.vlgmr.msra.gmra.mrb[150].mxu0 %vm986_vm5, %v9177_v57 }
0x1429   : > { %8853 = vmatprep.mubr.msk.f32.mxu0 %vm9174_vm2, %v9175_v32 }
0x142f   : > { %v8835_v3 = vpop.f32.mrb[144].mxu0 }
0x1430   : > { %v6912_v31 = vadd.f32 %v8835_v3, %v6805_v49  ;;  %v6906_v5 = vpop.f32.mrb[145].mxu0 }
0x1431   : > { %v6907_v24 = vadd.f32 %v6906_v5, %v6805_v49 }
0x1433   : > { %v9041_v51 = vpack.c.bf16 %v6912_v31, %v6907_v24 }
0x1435   : > { %9042 = vmatpush3.bf16.msra.mxu0 %v9041_v51 }
0x1436   : > { %9043 = vmatprep.subr.bf16.mxu0 %v9173_v25 }
0x1438   : > { %8854 = vmatmul.mubr.msk.f32.vlgmr.msra.gmra.mrb[152].mxu0 %vm986_vm5, %v9177_v57 }
0x1439   : > { %8860 = vmatprep.mubr.msk.f32.mxu0 %vm9174_vm2, %v9175_v32 }
0x143f   : > { %v8838_v30 = vpop.f32.mrb[146].mxu0 }
0x1440   : > { %v6922_v47 = vadd.f32 %v8838_v30, %v6805_v49  ;;  %v6916_v6 = vpop.f32.mrb[147].mxu0 }
0x1441   : > { %v6917_v9 = vadd.f32 %v6916_v6, %v6805_v49 }
0x1443   : > { %v9044_v38 = vpack.c.bf16 %v6922_v47, %v6917_v9 }
0x1445   : > { %9045 = vmatpush3.bf16.msra.mxu0 %v9044_v38 }
0x1446   : > { %9046 = vmatprep.subr.bf16.mxu0 %v9173_v25 }
0x1448   : > { %8861 = vmatmul.mubr.msk.f32.vlgmr.msra.gmra.mrb[154].mxu0 %vm986_vm5, %v9177_v57 }
0x1449   : > { %8867 = vmatprep.mubr.msk.f32.mxu0 %vm9174_vm2, %v9175_v32 }
0x144f   : > { %v8841_v54 = vpop.f32.mrb[148].mxu0 }
0x1450   : > { %v6932_v20 = vadd.f32 %v8841_v54, %v6805_v49  ;;  %v6926_v55 = vpop.f32.mrb[149].mxu0 }
0x1451   : > { %v6927_v1 = vadd.f32 %v6926_v55, %v6805_v49 }
0x1453   : > { %v9047_v39 = vpack.c.bf16 %v6932_v20, %v6927_v1 }
0x1455   : > { %9048 = vmatpush3.bf16.msra.mxu0 %v9047_v39 }
0x1456   : > { %9049 = vmatprep.subr.bf16.mxu0 %v9173_v25 }
0x1458   : > { %8868 = vmatmul.mubr.msk.f32.vlgmr.msra.gmra.mrb[156].mxu0 %vm986_vm5, %v9177_v57  ;;  %vm7235_vm5 = vcmask 1042434  }
0x1459   : > { %8878 = vmatprep.mubr.msk.f32.mxu0 %vm9174_vm2, %v9175_v32  ;;  %9051 = vmatpush3.bf16.msra.mxu0 %v9050_v13  ;;  %v7221_v32 = vld [vmem:[%s11185_s3 + $0x18] sm:$0xff]  ;;  %vm7232_vm2 = vcmask 1041409  }
0x145a   : > { %9052 = vmatprep.subr.bf16.mxu0 %v9173_v25  ;;  %v9053_v46 = vpack.c.bf16 %v7221_v32, %v7220_v43 }
0x145d   : > { %9054 = vmatpush3.bf16.msra.mxu0 %v9053_v46 }
0x14fb   : > { %v7004_v42 = vpop.f32.mrb[150].mxu0 }
0x14fc   : > { %v8848_v18 = vpop.f32.mrb[151].mxu0 }
0x150b   : > { %v7074_v63 = vpop.f32.mrb[152].mxu0 }
0x150c   : > { %v7231_v45 = vrot.slane %v7074_v63, 7  ;;  %v8855_v53 = vpop.f32.mrb[153].mxu0 }
0x150e   : > { %v7233_v44 = vsel %vm7232_vm2, %v7231_v45, %v7004_v42 }
0x151b   : > { %v7144_v25 = vpop.f32.mrb[154].mxu0 }
0x151c   : > { %v7234_v2 = vrot.slane %v7144_v25, 6  ;;  %v8862_v23 = vpop.f32.mrb[155].mxu0 }
0x151e   : > { %v7236_v4 = vsel %vm7235_vm5, %v7234_v2, %v7233_v44 }
0x152b   : > { %v7214_v34 = vpop.f32.mrb[156].mxu0 }
0x152c   : > { %v7237_v22 = vrot.slane %v7214_v34, 5  ;;  %v8869_v37 = vpop.f32.mrb[157].mxu0 }
0x152e   : > { %v7239_v61 = vsel %vm7238_vm12, %v7237_v22, %v7236_v4 }
0x152f   : > { %8879 = vmatmul.mubr.msk.f32.vlgmr.msra.gmra.mrb[158].mxu0 %vm6059_vm11, %v7239_v61 }
0x1602   : > { %v7308_v52 = vpop.f32.mrb[158].mxu0 }
0x1603   : > { %v7309_v60 = vadd.f32 %v7308_v52, %v7226_v28  ;;  %v8880_v33 = vpop.f32.mrb[159].mxu0 }
0x1605   : > { %7313 = vst.msk [vmem:[%s193_s20] sm:$0xf] %vm7312_vm13, %v7309_v60 }
0x1606   : > { %9122 = shalt.err (!%p9119_p3)
}
0x1607   : > { %s9123_s7 = scalar_lea.hbm %s11140_s28, 64  ;;  %s9127_s10 = scalar_lea.hbm %s11186_s4, 128 }
0x1608   : > { %p9124_p4 = scmp.ne.s32.totalorder %s11140_s28, %s9123_s7  ;;  %p9128_p9 = scmp.lt.u32.totalorder %s11140_s28, %s11186_s4 }
0x1609   : > { %p9129_p10 = scmp.lt.u32.totalorder %s9127_s10, %s9123_s7  ;;  %p9131_p12 = scmp.lt.u32.totalorder %s9123_s7, %s11140_s28 }
0x160a   : > { %p9125_p7 = pnand %p9124_p4, %p9242_p5 }
0x160b   : > { %p9130_p11 = por %p9129_p10, %p9128_p9 }
0x160c   : > { %p9126_p8 = pneg %p9125_p7 }
0x160d   : > { %p9132_p13 = por %p9131_p12, %p9130_p11 }
0x160f   : > { %p9133_p0 = pnand %p9132_p13, %p9126_p8 }
0x1611   : > { %9136 = shalt.err (!%p9133_p0)
}
0x1612   : > { %9057 = dma.vmem_to_hbm [thread:$0]  (%p9242_p5), %s11142_s22, 64, %s11140_s28, %s7315_s29  }
0x1613 PF: > { %p9063_p1 = scmp.ge.s32.totalorder %s9171_s18, 2  ;;  %s7340_s13 = sand.u32 1, %s9159_s15  }
0x1614   : > { %s7341_s14 = scalar_lea.sflag [#allocation4], %s7340_s13 }
0x1615   : > { %p9060_p2 = pnand %p9063_p1, %p9246_p6 }
0x1617   : > { %9154 = dma.done.wait (!%p9060_p2), %s7341_s14, 64  }
0x1618   : > { %9156 = vsyncadd (!%p9060_p2), %s7341_s14, 4294967232  ;;  %p14_p3 = scmp.ge.s32.totalorder %s9229_s21, 4   ;;  %s11197_s15 = smov %s9163_s16 }
0x1619   : > { %s11198_s16 = smov %s9167_s17  ;;  %s11199_s17 = smov %s9240_s24 }
0x161a   : > { %s11200_s18 = smov %s9229_s21  ;;  %16 = sbr.rel (!%p14_p3) target bundleno = 3 (0x3), region = 71 }
0x1621   :  { %7346 = vsyncpa [#allocation4], 1 }
0x1622   :  { %7348 = vsyncpa [#allocation4 + $0x1], 1 }

</bundles_post_ra>
